<compile_context>
chip_gen: v6e
topology: v6e:2x2x1
jax: 0.10.0
libtpu: 0.0.40
codegen_flags: <defaults>
</compile_context>

<pallas_src>
import functools

import jax
import jax.numpy as jnp
import numpy as np
from jax.experimental import pallas as pl
from jax.experimental.pallas import tpu as pltpu

# ----------------------------- configuration -------------------------------
SHOT = 1
ZOOM = 8
NUM_CLASSES = 2
REDUCE_DIM = 16
PPM_SCALES = [8, 4, 2]          # small-shape stand-in for [60, 30, 15, 8]
C0, C1, C2, C3, C4 = 8, 8, 16, 24, 32
FEA_DIM = C3 + C2               # 1024 + 512 in the original, scaled down
COS_EPS = 1e-7

_PARALLEL = pltpu.CompilerParams(dimension_semantics=("parallel",))


# ----------------------------- Pallas kernels ------------------------------
def _conv_gemm_kernel(w_ref, a_ref, b_ref, o_ref, *, relu):
    # w_ref: (Cout, K) bf16, a_ref: (K, TM) bf16, b_ref: (Cout, 1) f32
    acc = jnp.dot(w_ref[...], a_ref[...], preferred_element_type=jnp.float32)
    acc = acc + b_ref[...]
    if relu:
        acc = jnp.maximum(acc, 0.0)
    o_ref[...] = acc


def _conv_gemm2_kernel(w1_ref, a_ref, b1_ref, w2_ref, b2_ref, o_ref,
                       *, relu1, relu2):
    # Fused conv (e.g. 3x3) -> ReLU -> 1x1 conv; intermediate stays in VMEM.
    h = jnp.dot(w1_ref[...], a_ref[...], preferred_element_type=jnp.float32)
    h = h + b1_ref[...]
    if relu1:
        h = jnp.maximum(h, 0.0)
    acc = jnp.dot(w2_ref[...], h.astype(jnp.bfloat16),
                  preferred_element_type=jnp.float32)
    acc = acc + b2_ref[...]
    if relu2:
        acc = jnp.maximum(acc, 0.0)
    o_ref[...] = acc


def _corr_kernel(s_ref, q_ref, o_ref):
    # One batch element per grid step.
    # s_ref: (1, HWs, C)  q_ref: (1, C, HWq)  o_ref: (1, 1, HWq)
    s = s_ref[0]
    q = q_ref[0]
    sim = jnp.dot(s, q, preferred_element_type=jnp.float32)           # (HWs, HWq)
    s_norm = jnp.sqrt(jnp.sum(s * s, axis=1, keepdims=True))          # (HWs, 1)
    q_norm = jnp.sqrt(jnp.sum(q * q, axis=0, keepdims=True))          # (1, HWq)
    # divides -> EUP reciprocal (keeps the +eps guard for masked zero pixels)
    sim = sim * pl.reciprocal(s_norm * q_norm + COS_EPS, approx=True)
    sim_max = jnp.max(sim, axis=0, keepdims=True)                     # (1, HWq)
    mn = jnp.min(sim_max, axis=1, keepdims=True)
    mx = jnp.max(sim_max, axis=1, keepdims=True)
    o_ref[0] = (sim_max - mn) * pl.reciprocal(mx - mn + COS_EPS, approx=True)


def _wgap_kernel(f_ref, m_ref, o_ref):
    # One batch element per grid step.
    # f_ref: (1, C, HW)  m_ref: (1, 1, HW)  o_ref: (1, C, 1)
    f = f_ref[0]
    m = m_ref[0]
    area = jnp.sum(m) + 0.0005
    o_ref[0] = jnp.sum(f * m, axis=1, keepdims=True) / area


# ----------------------------- Pallas wrappers ------------------------------
def _gemm_pallas(w, a, bias, relu, w2=None, bias2=None, relu2=False):
    """O(Cout, M) = W(Cout, K) @ A(K, M)  (+ optional fused 1x1 second GEMM)."""
    c1, k = w.shape
    k2, m = a.shape
    assert k == k2
    cout = c1 if w2 is None else w2.shape[0]

    # Lane tile: full M if small, else 512-lane tiles (partial tail handled by
    # Pallas masking — no host-side pad/slice).
    tm = m if m <= 512 else 512
    grid = (pl.cdiv(m, tm),)

    flops = 2 * c1 * k * m + (0 if w2 is None else 2 * cout * c1 * m)
    bytes_accessed = int(w.size * 2 + a.size * 2 + cout * m * 4
                         + (0 if w2 is None else w2.size * 2))
    cost = pl.CostEstimate(flops=flops, transcendentals=0,
                           bytes_accessed=bytes_accessed)

    if w2 is None:
        return pl.pallas_call(
            functools.partial(_conv_gemm_kernel, relu=relu),
            out_shape=jax.ShapeDtypeStruct((c1, m), jnp.float32),
            grid=grid,
            in_specs=[
                pl.BlockSpec((c1, k), lambda i: (0, 0)),
                pl.BlockSpec((k, tm), lambda i: (0, i)),
                pl.BlockSpec((c1, 1), lambda i: (0, 0)),
            ],
            out_specs=pl.BlockSpec((c1, tm), lambda i: (0, i)),
            compiler_params=_PARALLEL,
            cost_estimate=cost,
        )(w, a, bias)

    return pl.pallas_call(
        functools.partial(_conv_gemm2_kernel, relu1=relu, relu2=relu2),
        out_shape=jax.ShapeDtypeStruct((cout, m), jnp.float32),
        grid=grid,
        in_specs=[
            pl.BlockSpec((c1, k), lambda i: (0, 0)),
            pl.BlockSpec((k, tm), lambda i: (0, i)),
            pl.BlockSpec((c1, 1), lambda i: (0, 0)),
            pl.BlockSpec((cout, c1), lambda i: (0, 0)),
            pl.BlockSpec((cout, 1), lambda i: (0, 0)),
        ],
        out_specs=pl.BlockSpec((cout, tm), lambda i: (0, i)),
        compiler_params=_PARALLEL,
        cost_estimate=cost,
    )(w, a, bias, w2, bias2)


def conv2d(x, w, bias=None, stride=1, padding=0, dilation=1, relu=False,
           w2=None, bias2=None, relu2=False):
    """torch.nn.Conv2d on CNHW features via a (fused) Pallas transposed GEMM.

    x: (Cin, N, H, W).  w: (Cout, Cin, kh, kw).  Optionally fuses a following
    1x1 conv (w2/bias2) into the same kernel (e.g. 3x3 -> ReLU -> 1x1 head).
    """
    c, n, hh, ww = x.shape
    cout, cin, kh, kw = w.shape
    assert cin == c
    xb = x.astype(jnp.bfloat16)                       # bf16 MXU operands
    if padding:
        xb = jnp.pad(xb, ((0, 0), (0, 0), (padding, padding), (padding, padding)))
    hout = (hh + 2 * padding - dilation * (kh - 1) - 1) // stride + 1
    wout = (ww + 2 * padding - dilation * (kw - 1) - 1) // stride + 1

    # TODO(synk): move this tap loop into the kernel (grid axis over kh*kw with
    # an f32 accumulator scratch) when scaling to full PFENet feature sizes.
    cols = []
    for i in range(kh):
        for j in range(kw):
            sl = xb[:, :,
                    i * dilation: i * dilation + stride * (hout - 1) + 1: stride,
                    j * dilation: j * dilation + stride * (wout - 1) + 1: stride]
            cols.append(sl)
    # (Cin, kh*kw, N, Ho, Wo) -> (K, M); K ordering matches torch weight reshape.
    a = jnp.stack(cols, axis=1).reshape(c * kh * kw, n * hout * wout)

    wm = w.reshape(cout, c * kh * kw).astype(jnp.bfloat16)
    b1 = (jnp.zeros((cout,), jnp.float32) if bias is None else bias)
    b1 = b1.reshape(cout, 1).astype(jnp.float32)

    if w2 is None:
        out = _gemm_pallas(wm, a, b1, relu)
        cfin = cout
    else:
        c2 = w2.shape[0]
        wm2 = w2.reshape(c2, cout).astype(jnp.bfloat16)
        b2 = (jnp.zeros((c2,), jnp.float32) if bias2 is None else bias2)
        b2 = b2.reshape(c2, 1).astype(jnp.float32)
        out = _gemm_pallas(wm, a, b1, relu, w2=wm2, bias2=b2, relu2=relu2)
        cfin = c2
    return out.reshape(cfin, n, hout, wout)           # back to CNHW


def weighted_gap(feat, mask):
    """Weighted_GAP from PFENet: masked global average pooling (CNHW)."""
    c, n, h, w = feat.shape
    hw = h * w
    f3 = feat.reshape(c, n, hw).transpose(1, 0, 2)    # (N, C, HW)
    m3 = mask.reshape(1, n, hw).transpose(1, 0, 2)    # (N, 1, HW)
    out = pl.pallas_call(
        _wgap_kernel,
        out_shape=jax.ShapeDtypeStruct((n, c, 1), jnp.float32),
        grid=(n,),
        in_specs=[
            pl.BlockSpec((1, c, hw), lambda b: (b, 0, 0)),
            pl.BlockSpec((1, 1, hw), lambda b: (b, 0, 0)),
        ],
        out_specs=pl.BlockSpec((1, c, 1), lambda b: (b, 0, 0)),
        compiler_params=_PARALLEL,
    )(f3, m3)
    return out[:, :, 0].T.reshape(c, n, 1, 1)         # CNHW (C, N, 1, 1)


def correlation_prior(supp4_masked, query4):
    """Cosine similarity prior mask (max over support pixels, min-max norm)."""
    ch, n, sp, _ = query4.shape
    hws = supp4_masked.shape[2] * supp4_masked.shape[3]
    hwq = sp * sp
    s3 = supp4_masked.reshape(ch, n, hws).transpose(1, 2, 0)   # (N, HWs, C)
    q3 = query4.reshape(ch, n, hwq).transpose(1, 0, 2)         # (N, C, HWq)
    out = pl.pallas_call(
        _corr_kernel,
        out_shape=jax.ShapeDtypeStruct((n, 1, hwq), jnp.float32),
        grid=(n,),
        in_specs=[
            pl.BlockSpec((1, hws, ch), lambda b: (b, 0, 0)),
            pl.BlockSpec((1, ch, hwq), lambda b: (b, 0, 0)),
        ],
        out_specs=pl.BlockSpec((1, 1, hwq), lambda b: (b, 0, 0)),
        compiler_params=_PARALLEL,
    )(s3, q3)
    return out.reshape(n, sp, sp)[None]               # CNHW (1, N, sp, sp)


# ----------------------------- JAX glue ops ---------------------------------
def _lin_idx_w(in_size, out_size):
    if out_size == 1:
        idx0 = jnp.zeros((1,), jnp.int32)
        return idx0, idx0, jnp.zeros((1,), jnp.float32)
    pos = jnp.arange(out_size, dtype=jnp.float32) * ((in_size - 1) / (out_size - 1))
    idx0 = jnp.clip(jnp.floor(pos).astype(jnp.int32), 0, in_size - 1)
    idx1 = jnp.clip(idx0 + 1, 0, in_size - 1)
    return idx0, idx1, pos - idx0.astype(jnp.float32)


def resize_bilinear(x, out_h, out_w):
    """F.interpolate(mode='bilinear', align_corners=True) on the last 2 dims."""
    _, _, H, W = x.shape
    y0, y1, wy = _lin_idx_w(H, out_h)
    x0, x1, wx = _lin_idx_w(W, out_w)
    top = (x[:, :, y0, :] * (1.0 - wy)[None, None, :, None]
           + x[:, :, y1, :] * wy[None, None, :, None])
    out = top[:, :, :, x0] * (1.0 - wx) + top[:, :, :, x1] * wx
    return out


def adaptive_avg_pool2d(x, out_size):
    """torch.nn.AdaptiveAvgPool2d(out_size) on the last 2 dims."""
    _, _, H, W = x.shape

    def pool_mat(in_size, out):
        m = np.zeros((out, in_size), np.float32)
        for i in range(out):
            start = (i * in_size) // out
            end = -(-((i + 1) * in_size) // out)
            m[i, start:end] = 1.0 / (end - start)
        return jnp.asarray(m)

    Ph = pool_mat(H, out_size)
    Pw = pool_mat(W, out_size)
    return jnp.einsum('oh,abhw,pw->abop', Ph, x, Pw)


# ----------------------------- parameters -----------------------------------
def init_params(key):
    keys = iter(jax.random.split(key, 64))

    def w(shape, scale=0.1):
        return jax.random.normal(next(keys), shape, jnp.float32) * scale

    rd = REDUCE_DIM
    p = {}
    # stand-in backbone (see TODO(synk) above)
    p['l0'] = w((C0, 3, 3, 3))
    p['l1'] = w((C1, C0, 3, 3))
    p['l2'] = w((C2, C1, 3, 3))
    p['l3'] = w((C3, C2, 3, 3))
    p['l4'] = w((C4, C3, 3, 3))
    # PFENet head
    p['down_query'] = w((rd, FEA_DIM, 1, 1))
    p['down_supp'] = w((rd, FEA_DIM, 1, 1))
    p['init_merge'] = [w((rd, rd * 2 + 1, 1, 1)) for _ in PPM_SCALES]
    p['beta'] = [(w((rd, rd, 3, 3)), w((rd, rd, 3, 3))) for _ in PPM_SCALES]
    p['inner_cls'] = [(w((rd, rd, 3, 3)),
                       w((NUM_CLASSES, rd, 1, 1)),
                       w((NUM_CLASSES,))) for _ in PPM_SCALES]
    p['alpha'] = [w((rd, rd * 2, 1, 1)) for _ in range(len(PPM_SCALES) - 1)]
    p['res1'] = w((rd, rd * len(PPM_SCALES), 1, 1))
    p['res2'] = (w((rd, rd, 3, 3)), w((rd, rd, 3, 3)))
    p['cls'] = (w((rd, rd, 3, 3)), w((NUM_CLASSES, rd, 1, 1)), w((NUM_CLASSES,)))
    return p


# ----------------------------- forward pass ---------------------------------
def pfenet_forward(params, x, s_x, s_y):
    N, _, H, W = x.shape
    assert (H - 1) % 8 == 0 and (W - 1) % 8 == 0
    h = (H - 1) // 8 * ZOOM + 1
    w = (W - 1) // 8 * ZOOM + 1

    def backbone_to3(inp):                            # inp CNHW
        f0 = conv2d(inp, params['l0'], stride=2, padding=1, relu=True)
        f1 = conv2d(f0, params['l1'], stride=1, padding=1, relu=True)
        f2 = conv2d(f1, params['l2'], stride=2, padding=1, relu=True)
        f3 = conv2d(f2, params['l3'], stride=1, padding=2, dilation=2, relu=True)
        return f2, f3

    def layer4(inp):
        return conv2d(inp, params['l4'], stride=1, padding=2, dilation=2, relu=True)

    # ---- query branch ----
    xc = jnp.transpose(x, (1, 0, 2, 3))               # NCHW -> CNHW
    q2, q3 = backbone_to3(xc)
    q4 = layer4(q3)
    query_feat = jnp.concatenate([q3, q2], axis=0)
    query_feat = conv2d(query_feat, params['down_query'], relu=True)  # dropout = id (eval)

    # ---- support branch ----
    supp_feat_list, final_supp_list, mask_list = [], [], []
    for i in range(SHOT):
        mask = (s_y[:, i] == 1).astype(jnp.float32)[None]             # (1,N,H,W) CNHW
        mask_list.append(mask)
        sc = jnp.transpose(s_x[:, i], (1, 0, 2, 3))
        s2, s3 = backbone_to3(sc)
        mask_s = resize_bilinear(mask, s3.shape[2], s3.shape[3])
        s4 = layer4(s3 * mask_s)
        final_supp_list.append(s4)
        supp = jnp.concatenate([s3, s2], axis=0)
        supp = conv2d(supp, params['down_supp'], relu=True)           # dropout = id (eval)
        supp_feat_list.append(weighted_gap(supp, mask_s))

    # ---- correlation prior masks ----
    corr_query_mask_list = []
    for i, supp4 in enumerate(final_supp_list):
        resize_size = supp4.shape[2]
        tmp_mask = resize_bilinear(mask_list[i], resize_size, resize_size)
        corr = correlation_prior(supp4 * tmp_mask, q4)
        corr = resize_bilinear(corr, q3.shape[2], q3.shape[3])
        corr_query_mask_list.append(corr)
    corr_query_mask = jnp.mean(jnp.concatenate(corr_query_mask_list, 0),
                               axis=0, keepdims=True)
    corr_query_mask = resize_bilinear(corr_query_mask,
                                      query_feat.shape[2], query_feat.shape[3])

    # ---- k-shot feature averaging ----
    supp_feat = supp_feat_list[0]
    for i in range(1, len(supp_feat_list)):
        supp_feat = supp_feat + supp_feat_list[i]
    supp_feat = supp_feat / len(supp_feat_list)

    # ---- feature enrichment pyramid ----
    out_list, pyramid_feat_list = [], []
    for idx, tmp_bin in enumerate(PPM_SCALES):
        if tmp_bin <= 1.0:
            bin_ = int(query_feat.shape[2] * tmp_bin)
        else:
            bin_ = tmp_bin
        query_feat_bin = adaptive_avg_pool2d(query_feat, bin_)
        supp_feat_bin = jnp.broadcast_to(
            supp_feat, (supp_feat.shape[0], supp_feat.shape[1], bin_, bin_))
        corr_mask_bin = resize_bilinear(corr_query_mask, bin_, bin_)
        merge = jnp.concatenate([query_feat_bin, supp_feat_bin, corr_mask_bin], axis=0)
        merge = conv2d(merge, params['init_merge'][idx], relu=True)
        if idx >= 1:
            pre = resize_bilinear(pyramid_feat_list[idx - 1], bin_, bin_)
            rec = jnp.concatenate([merge, pre], axis=0)
            merge = conv2d(rec, params['alpha'][idx - 1], relu=True) + merge
        # TODO(synk): the 3x3->3x3 beta/res2 pairs need in-kernel halo handling
        # to fuse; kept as two GEMM launches each.
        beta = conv2d(merge, params['beta'][idx][0], padding=1, relu=True)
        beta = conv2d(beta, params['beta'][idx][1], padding=1, relu=True)
        merge = beta + merge
        # fused 3x3(+ReLU, dropout=id) -> 1x1(+bias) classifier head
        inner = conv2d(merge, params['inner_cls'][idx][0], padding=1, relu=True,
                       w2=params['inner_cls'][idx][1],
                       bias2=params['inner_cls'][idx][2])
        out_list.append(inner)
        pyramid_feat_list.append(
            resize_bilinear(merge, query_feat.shape[2], query_feat.shape[3]))

    qf = jnp.concatenate(pyramid_feat_list, axis=0)
    qf = conv2d(qf, params['res1'], relu=True)
    r = conv2d(qf, params['res2'][0], padding=1, relu=True)
    r = conv2d(r, params['res2'][1], padding=1, relu=True)
    qf = r + qf
    # fused cls head: 3x3(+ReLU, dropout=id) -> 1x1(+bias)
    out = conv2d(qf, params['cls'][0], padding=1, relu=True,
                 w2=params['cls'][1], bias2=params['cls'][2])
    if ZOOM != 1:
        out = resize_bilinear(out, h, w)
    return jnp.transpose(out, (1, 0, 2, 3))           # CNHW -> NCHW


# ----------------------------- main ------------------------------------------
if __name__ == "__main__":
    key = jax.random.PRNGKey(0)
    pkey, xkey, skey, ykey = jax.random.split(key, 4)
    params = init_params(pkey)

    H = W = 33                                   # (H-1) % 8 == 0
    x = jax.random.normal(xkey, (1, 3, H, W), jnp.float32)
    s_x = jax.random.normal(skey, (1, SHOT, 3, H, W), jnp.float32)
    s_y = (jax.random.uniform(ykey, (1, SHOT, H, W)) > 0.5).astype(jnp.float32)

    forward = jax.jit(pfenet_forward)            # single program: cuts dispatch cost
    out = forward(params, x, s_x, s_y)
    out = jax.block_until_ready(out)
    assert out.shape == (1, NUM_CLASSES, H, W), out.shape
    assert bool(jnp.all(jnp.isfinite(out)))
    print("KERNEL_OK")
</pallas_src>

<mosaic_0001>
module attributes {stable_mosaic.version = 11 : i64} {
  func.func @_conv_gemm_kernel(%arg0: i32, %arg1: memref<8x27xbf16, #tpu.memory_space<vmem>>, %arg2: memref<27x289xbf16, #tpu.memory_space<vmem>>, %arg3: memref<8x1xf32, #tpu.memory_space<vmem>>, %arg4: memref<8x289xf32, #tpu.memory_space<vmem>>) attributes {dimension_semantics = [#tpu.dimension_semantics<parallel>], iteration_bounds = array<i64: 1>, scalar_prefetch = 0 : i64, scratch_operands = 0 : i64, tpu.core_type = #tpu.core_type<tc>, window_params = [{pipeline_mode = #tpu.pipeline_mode<synchronous>, transform_indices = @transform_0, window_bounds = array<i64: 8, 27>}, {transform_indices = @transform_1, window_bounds = array<i64: 27, 289>}, {pipeline_mode = #tpu.pipeline_mode<synchronous>, transform_indices = @transform_2, window_bounds = array<i64: 8, 1>}, {transform_indices = @transform_3, window_bounds = array<i64: 8, 289>}]} {
    %c0 = arith.constant 0 : index
    %c0_0 = arith.constant 0 : index
    %0 = vector.load %arg1[%c0, %c0_0] : memref<8x27xbf16, #tpu.memory_space<vmem>>, vector<8x27xbf16>
    %c0_1 = arith.constant 0 : index
    %c0_2 = arith.constant 0 : index
    %1 = vector.load %arg2[%c0_1, %c0_2] : memref<27x289xbf16, #tpu.memory_space<vmem>>, vector<27x289xbf16>
    %cst = arith.constant dense<0.000000e+00> : vector<8x289xf32>
    %2 = tpu.matmul %0, %1, %cst {dimension_numbers = #tpu.dot_dimension_numbers<[1], [0], [0], [1], [0, 0, 1, 1], [], []>} : vector<8x27xbf16>, vector<27x289xbf16>, vector<8x289xf32> -> vector<8x289xf32>
    %c0_3 = arith.constant 0 : index
    %c0_4 = arith.constant 0 : index
    %3 = vector.load %arg3[%c0_3, %c0_4] : memref<8x1xf32, #tpu.memory_space<vmem>>, vector<8x1xf32>
    %4 = vector.broadcast %3 : vector<8x1xf32> to vector<8x289xf32>
    %5 = arith.addf %2, %4 : vector<8x289xf32>
    %cst_5 = arith.constant 0.000000e+00 : f32
    %6 = vector.broadcast %cst_5 : f32 to vector<8x289xf32>
    %7 = arith.maximumf %5, %6 : vector<8x289xf32>
    %c0_6 = arith.constant 0 : index
    %c0_7 = arith.constant 0 : index
    %8 = vector.load %arg4[%c0_6, %c0_7] : memref<8x289xf32, #tpu.memory_space<vmem>>, vector<8x289xf32>
    tpu.vector_store %arg4[%c0_6, %c0_7], %7 {strides = array<i32>} : memref<8x289xf32, #tpu.memory_space<vmem>>, vector<8x289xf32>,
    return
  }
  func.func @transform_0(%arg0: i32) -> (i32, i32) {
    %c0_i32 = arith.constant 0 : i32
    %c0_i32_0 = arith.constant 0 : i32
    %c0_i32_1 = arith.constant 0 : i32
    return %c0_i32, %c0_i32_0 : i32, i32
  }
  func.func @transform_1(%arg0: i32) -> (i32, i32) {
    %c0_i32 = arith.constant 0 : i32
    %c0_i32_0 = arith.constant 0 : i32
    return %c0_i32, %arg0 : i32, i32
  }
  func.func @transform_2(%arg0: i32) -> (i32, i32) {
    %c0_i32 = arith.constant 0 : i32
    %c0_i32_0 = arith.constant 0 : i32
    %c0_i32_1 = arith.constant 0 : i32
    return %c0_i32, %c0_i32_0 : i32, i32
  }
  func.func @transform_3(%arg0: i32) -> (i32, i32) {
    %c0_i32 = arith.constant 0 : i32
    %c0_i32_0 = arith.constant 0 : i32
    return %c0_i32, %arg0 : i32, i32
  }
}

module attributes {stable_mosaic.version = 11 : i64} {
  func.func @_conv_gemm_kernel(%arg0: i32, %arg1: memref<8x72xbf16, #tpu.memory_space<vmem>>, %arg2: memref<72x289xbf16, #tpu.memory_space<vmem>>, %arg3: memref<8x1xf32, #tpu.memory_space<vmem>>, %arg4: memref<8x289xf32, #tpu.memory_space<vmem>>) attributes {dimension_semantics = [#tpu.dimension_semantics<parallel>], iteration_bounds = array<i64: 1>, scalar_prefetch = 0 : i64, scratch_operands = 0 : i64, tpu.core_type = #tpu.core_type<tc>, window_params = [{pipeline_mode = #tpu.pipeline_mode<synchronous>, transform_indices = @transform_0, window_bounds = array<i64: 8, 72>}, {transform_indices = @transform_1, window_bounds = array<i64: 72, 289>}, {pipeline_mode = #tpu.pipeline_mode<synchronous>, transform_indices = @transform_2, window_bounds = array<i64: 8, 1>}, {transform_indices = @transform_3, window_bounds = array<i64: 8, 289>}]} {
    %c0 = arith.constant 0 : index
    %c0_0 = arith.constant 0 : index
    %0 = vector.load %arg1[%c0, %c0_0] : memref<8x72xbf16, #tpu.memory_space<vmem>>, vector<8x72xbf16>
    %c0_1 = arith.constant 0 : index
    %c0_2 = arith.constant 0 : index
    %1 = vector.load %arg2[%c0_1, %c0_2] : memref<72x289xbf16, #tpu.memory_space<vmem>>, vector<72x289xbf16>
    %cst = arith.constant dense<0.000000e+00> : vector<8x289xf32>
    %2 = tpu.matmul %0, %1, %cst {dimension_numbers = #tpu.dot_dimension_numbers<[1], [0], [0], [1], [0, 0, 1, 1], [], []>} : vector<8x72xbf16>, vector<72x289xbf16>, vector<8x289xf32> -> vector<8x289xf32>
    %c0_3 = arith.constant 0 : index
    %c0_4 = arith.constant 0 : index
    %3 = vector.load %arg3[%c0_3, %c0_4] : memref<8x1xf32, #tpu.memory_space<vmem>>, vector<8x1xf32>
    %4 = vector.broadcast %3 : vector<8x1xf32> to vector<8x289xf32>
    %5 = arith.addf %2, %4 : vector<8x289xf32>
    %cst_5 = arith.constant 0.000000e+00 : f32
    %6 = vector.broadcast %cst_5 : f32 to vector<8x289xf32>
    %7 = arith.maximumf %5, %6 : vector<8x289xf32>
    %c0_6 = arith.constant 0 : index
    %c0_7 = arith.constant 0 : index
    %8 = vector.load %arg4[%c0_6, %c0_7] : memref<8x289xf32, #tpu.memory_space<vmem>>, vector<8x289xf32>
    tpu.vector_store %arg4[%c0_6, %c0_7], %7 {strides = array<i32>} : memref<8x289xf32, #tpu.memory_space<vmem>>, vector<8x289xf32>,
    return
  }
  func.func @transform_0(%arg0: i32) -> (i32, i32) {
    %c0_i32 = arith.constant 0 : i32
    %c0_i32_0 = arith.constant 0 : i32
    %c0_i32_1 = arith.constant 0 : i32
    return %c0_i32, %c0_i32_0 : i32, i32
  }
  func.func @transform_1(%arg0: i32) -> (i32, i32) {
    %c0_i32 = arith.constant 0 : i32
    %c0_i32_0 = arith.constant 0 : i32
    return %c0_i32, %arg0 : i32, i32
  }
  func.func @transform_2(%arg0: i32) -> (i32, i32) {
    %c0_i32 = arith.constant 0 : i32
    %c0_i32_0 = arith.constant 0 : i32
    %c0_i32_1 = arith.constant 0 : i32
    return %c0_i32, %c0_i32_0 : i32, i32
  }
  func.func @transform_3(%arg0: i32) -> (i32, i32) {
    %c0_i32 = arith.constant 0 : i32
    %c0_i32_0 = arith.constant 0 : i32
    return %c0_i32, %arg0 : i32, i32
  }
}

module attributes {stable_mosaic.version = 11 : i64} {
  func.func @_conv_gemm_kernel(%arg0: i32, %arg1: memref<16x72xbf16, #tpu.memory_space<vmem>>, %arg2: memref<72x81xbf16, #tpu.memory_space<vmem>>, %arg3: memref<16x1xf32, #tpu.memory_space<vmem>>, %arg4: memref<16x81xf32, #tpu.memory_space<vmem>>) attributes {dimension_semantics = [#tpu.dimension_semantics<parallel>], iteration_bounds = array<i64: 1>, scalar_prefetch = 0 : i64, scratch_operands = 0 : i64, tpu.core_type = #tpu.core_type<tc>, window_params = [{pipeline_mode = #tpu.pipeline_mode<synchronous>, transform_indices = @transform_0, window_bounds = array<i64: 16, 72>}, {transform_indices = @transform_1, window_bounds = array<i64: 72, 81>}, {pipeline_mode = #tpu.pipeline_mode<synchronous>, transform_indices = @transform_2, window_bounds = array<i64: 16, 1>}, {transform_indices = @transform_3, window_bounds = array<i64: 16, 81>}]} {
    %c0 = arith.constant 0 : index
    %c0_0 = arith.constant 0 : index
    %0 = vector.load %arg1[%c0, %c0_0] : memref<16x72xbf16, #tpu.memory_space<vmem>>, vector<16x72xbf16>
    %c0_1 = arith.constant 0 : index
    %c0_2 = arith.constant 0 : index
    %1 = vector.load %arg2[%c0_1, %c0_2] : memref<72x81xbf16, #tpu.memory_space<vmem>>, vector<72x81xbf16>
    %cst = arith.constant dense<0.000000e+00> : vector<16x81xf32>
    %2 = tpu.matmul %0, %1, %cst {dimension_numbers = #tpu.dot_dimension_numbers<[1], [0], [0], [1], [0, 0, 1, 1], [], []>} : vector<16x72xbf16>, vector<72x81xbf16>, vector<16x81xf32> -> vector<16x81xf32>
    %c0_3 = arith.constant 0 : index
    %c0_4 = arith.constant 0 : index
    %3 = vector.load %arg3[%c0_3, %c0_4] : memref<16x1xf32, #tpu.memory_space<vmem>>, vector<16x1xf32>
    %4 = vector.broadcast %3 : vector<16x1xf32> to vector<16x81xf32>
    %5 = arith.addf %2, %4 : vector<16x81xf32>
    %cst_5 = arith.constant 0.000000e+00 : f32
    %6 = vector.broadcast %cst_5 : f32 to vector<16x81xf32>
    %7 = arith.maximumf %5, %6 : vector<16x81xf32>
    %c0_6 = arith.constant 0 : index
    %c0_7 = arith.constant 0 : index
    %8 = vector.load %arg4[%c0_6, %c0_7] : memref<16x81xf32, #tpu.memory_space<vmem>>, vector<16x81xf32>
    tpu.vector_store %arg4[%c0_6, %c0_7], %7 {strides = array<i32>} : memref<16x81xf32, #tpu.memory_space<vmem>>, vector<16x81xf32>,
    return
  }
  func.func @transform_0(%arg0: i32) -> (i32, i32) {
    %c0_i32 = arith.constant 0 : i32
    %c0_i32_0 = arith.constant 0 : i32
    %c0_i32_1 = arith.constant 0 : i32
    return %c0_i32, %c0_i32_0 : i32, i32
  }
  func.func @transform_1(%arg0: i32) -> (i32, i32) {
    %c0_i32 = arith.constant 0 : i32
    %c0_i32_0 = arith.constant 0 : i32
    return %c0_i32, %arg0 : i32, i32
  }
  func.func @transform_2(%arg0: i32) -> (i32, i32) {
    %c0_i32 = arith.constant 0 : i32
    %c0_i32_0 = arith.constant 0 : i32
    %c0_i32_1 = arith.constant 0 : i32
    return %c0_i32, %c0_i32_0 : i32, i32
  }
  func.func @transform_3(%arg0: i32) -> (i32, i32) {
    %c0_i32 = arith.constant 0 : i32
    %c0_i32_0 = arith.constant 0 : i32
    return %c0_i32, %arg0 : i32, i32
  }
}

module attributes {stable_mosaic.version = 11 : i64} {
  func.func @_conv_gemm_kernel(%arg0: i32, %arg1: memref<24x144xbf16, #tpu.memory_space<vmem>>, %arg2: memref<144x81xbf16, #tpu.memory_space<vmem>>, %arg3: memref<24x1xf32, #tpu.memory_space<vmem>>, %arg4: memref<24x81xf32, #tpu.memory_space<vmem>>) attributes {dimension_semantics = [#tpu.dimension_semantics<parallel>], iteration_bounds = array<i64: 1>, scalar_prefetch = 0 : i64, scratch_operands = 0 : i64, tpu.core_type = #tpu.core_type<tc>, window_params = [{pipeline_mode = #tpu.pipeline_mode<synchronous>, transform_indices = @transform_0, window_bounds = array<i64: 24, 144>}, {transform_indices = @transform_1, window_bounds = array<i64: 144, 81>}, {pipeline_mode = #tpu.pipeline_mode<synchronous>, transform_indices = @transform_2, window_bounds = array<i64: 24, 1>}, {transform_indices = @transform_3, window_bounds = array<i64: 24, 81>}]} {
    %c0 = arith.constant 0 : index
    %c0_0 = arith.constant 0 : index
    %0 = vector.load %arg1[%c0, %c0_0] : memref<24x144xbf16, #tpu.memory_space<vmem>>, vector<24x144xbf16>
    %c0_1 = arith.constant 0 : index
    %c0_2 = arith.constant 0 : index
    %1 = vector.load %arg2[%c0_1, %c0_2] : memref<144x81xbf16, #tpu.memory_space<vmem>>, vector<144x81xbf16>
    %cst = arith.constant dense<0.000000e+00> : vector<24x81xf32>
    %2 = tpu.matmul %0, %1, %cst {dimension_numbers = #tpu.dot_dimension_numbers<[1], [0], [0], [1], [0, 0, 1, 1], [], []>} : vector<24x144xbf16>, vector<144x81xbf16>, vector<24x81xf32> -> vector<24x81xf32>
    %c0_3 = arith.constant 0 : index
    %c0_4 = arith.constant 0 : index
    %3 = vector.load %arg3[%c0_3, %c0_4] : memref<24x1xf32, #tpu.memory_space<vmem>>, vector<24x1xf32>
    %4 = vector.broadcast %3 : vector<24x1xf32> to vector<24x81xf32>
    %5 = arith.addf %2, %4 : vector<24x81xf32>
    %cst_5 = arith.constant 0.000000e+00 : f32
    %6 = vector.broadcast %cst_5 : f32 to vector<24x81xf32>
    %7 = arith.maximumf %5, %6 : vector<24x81xf32>
    %c0_6 = arith.constant 0 : index
    %c0_7 = arith.constant 0 : index
    %8 = vector.load %arg4[%c0_6, %c0_7] : memref<24x81xf32, #tpu.memory_space<vmem>>, vector<24x81xf32>
    tpu.vector_store %arg4[%c0_6, %c0_7], %7 {strides = array<i32>} : memref<24x81xf32, #tpu.memory_space<vmem>>, vector<24x81xf32>,
    return
  }
  func.func @transform_0(%arg0: i32) -> (i32, i32) {
    %c0_i32 = arith.constant 0 : i32
    %c0_i32_0 = arith.constant 0 : i32
    %c0_i32_1 = arith.constant 0 : i32
    return %c0_i32, %c0_i32_0 : i32, i32
  }
  func.func @transform_1(%arg0: i32) -> (i32, i32) {
    %c0_i32 = arith.constant 0 : i32
    %c0_i32_0 = arith.constant 0 : i32
    return %c0_i32, %arg0 : i32, i32
  }
  func.func @transform_2(%arg0: i32) -> (i32, i32) {
    %c0_i32 = arith.constant 0 : i32
    %c0_i32_0 = arith.constant 0 : i32
    %c0_i32_1 = arith.constant 0 : i32
    return %c0_i32, %c0_i32_0 : i32, i32
  }
  func.func @transform_3(%arg0: i32) -> (i32, i32) {
    %c0_i32 = arith.constant 0 : i32
    %c0_i32_0 = arith.constant 0 : i32
    return %c0_i32, %arg0 : i32, i32
  }
}

module attributes {stable_mosaic.version = 11 : i64} {
  func.func @_conv_gemm_kernel(%arg0: i32, %arg1: memref<16x40xbf16, #tpu.memory_space<vmem>>, %arg2: memref<40x81xbf16, #tpu.memory_space<vmem>>, %arg3: memref<16x1xf32, #tpu.memory_space<vmem>>, %arg4: memref<16x81xf32, #tpu.memory_space<vmem>>) attributes {dimension_semantics = [#tpu.dimension_semantics<parallel>], iteration_bounds = array<i64: 1>, scalar_prefetch = 0 : i64, scratch_operands = 0 : i64, tpu.core_type = #tpu.core_type<tc>, window_params = [{pipeline_mode = #tpu.pipeline_mode<synchronous>, transform_indices = @transform_0, window_bounds = array<i64: 16, 40>}, {transform_indices = @transform_1, window_bounds = array<i64: 40, 81>}, {pipeline_mode = #tpu.pipeline_mode<synchronous>, transform_indices = @transform_2, window_bounds = array<i64: 16, 1>}, {transform_indices = @transform_3, window_bounds = array<i64: 16, 81>}]} {
    %c0 = arith.constant 0 : index
    %c0_0 = arith.constant 0 : index
    %0 = vector.load %arg1[%c0, %c0_0] : memref<16x40xbf16, #tpu.memory_space<vmem>>, vector<16x40xbf16>
    %c0_1 = arith.constant 0 : index
    %c0_2 = arith.constant 0 : index
    %1 = vector.load %arg2[%c0_1, %c0_2] : memref<40x81xbf16, #tpu.memory_space<vmem>>, vector<40x81xbf16>
    %cst = arith.constant dense<0.000000e+00> : vector<16x81xf32>
    %2 = tpu.matmul %0, %1, %cst {dimension_numbers = #tpu.dot_dimension_numbers<[1], [0], [0], [1], [0, 0, 1, 1], [], []>} : vector<16x40xbf16>, vector<40x81xbf16>, vector<16x81xf32> -> vector<16x81xf32>
    %c0_3 = arith.constant 0 : index
    %c0_4 = arith.constant 0 : index
    %3 = vector.load %arg3[%c0_3, %c0_4] : memref<16x1xf32, #tpu.memory_space<vmem>>, vector<16x1xf32>
    %4 = vector.broadcast %3 : vector<16x1xf32> to vector<16x81xf32>
    %5 = arith.addf %2, %4 : vector<16x81xf32>
    %cst_5 = arith.constant 0.000000e+00 : f32
    %6 = vector.broadcast %cst_5 : f32 to vector<16x81xf32>
    %7 = arith.maximumf %5, %6 : vector<16x81xf32>
    %c0_6 = arith.constant 0 : index
    %c0_7 = arith.constant 0 : index
    %8 = vector.load %arg4[%c0_6, %c0_7] : memref<16x81xf32, #tpu.memory_space<vmem>>, vector<16x81xf32>
    tpu.vector_store %arg4[%c0_6, %c0_7], %7 {strides = array<i32>} : memref<16x81xf32, #tpu.memory_space<vmem>>, vector<16x81xf32>,
    return
  }
  func.func @transform_0(%arg0: i32) -> (i32, i32) {
    %c0_i32 = arith.constant 0 : i32
    %c0_i32_0 = arith.constant 0 : i32
    %c0_i32_1 = arith.constant 0 : i32
    return %c0_i32, %c0_i32_0 : i32, i32
  }
  func.func @transform_1(%arg0: i32) -> (i32, i32) {
    %c0_i32 = arith.constant 0 : i32
    %c0_i32_0 = arith.constant 0 : i32
    return %c0_i32, %arg0 : i32, i32
  }
  func.func @transform_2(%arg0: i32) -> (i32, i32) {
    %c0_i32 = arith.constant 0 : i32
    %c0_i32_0 = arith.constant 0 : i32
    %c0_i32_1 = arith.constant 0 : i32
    return %c0_i32, %c0_i32_0 : i32, i32
  }
  func.func @transform_3(%arg0: i32) -> (i32, i32) {
    %c0_i32 = arith.constant 0 : i32
    %c0_i32_0 = arith.constant 0 : i32
    return %c0_i32, %arg0 : i32, i32
  }
}

module attributes {stable_mosaic.version = 11 : i64} {
  func.func @_conv_gemm_kernel(%arg0: i32, %arg1: memref<32x216xbf16, #tpu.memory_space<vmem>>, %arg2: memref<216x81xbf16, #tpu.memory_space<vmem>>, %arg3: memref<32x1xf32, #tpu.memory_space<vmem>>, %arg4: memref<32x81xf32, #tpu.memory_space<vmem>>) attributes {dimension_semantics = [#tpu.dimension_semantics<parallel>], iteration_bounds = array<i64: 1>, scalar_prefetch = 0 : i64, scratch_operands = 0 : i64, tpu.core_type = #tpu.core_type<tc>, window_params = [{pipeline_mode = #tpu.pipeline_mode<synchronous>, transform_indices = @transform_0, window_bounds = array<i64: 32, 216>}, {transform_indices = @transform_1, window_bounds = array<i64: 216, 81>}, {pipeline_mode = #tpu.pipeline_mode<synchronous>, transform_indices = @transform_2, window_bounds = array<i64: 32, 1>}, {transform_indices = @transform_3, window_bounds = array<i64: 32, 81>}]} {
    %c0 = arith.constant 0 : index
    %c0_0 = arith.constant 0 : index
    %0 = vector.load %arg1[%c0, %c0_0] : memref<32x216xbf16, #tpu.memory_space<vmem>>, vector<32x216xbf16>
    %c0_1 = arith.constant 0 : index
    %c0_2 = arith.constant 0 : index
    %1 = vector.load %arg2[%c0_1, %c0_2] : memref<216x81xbf16, #tpu.memory_space<vmem>>, vector<216x81xbf16>
    %cst = arith.constant dense<0.000000e+00> : vector<32x81xf32>
    %2 = tpu.matmul %0, %1, %cst {dimension_numbers = #tpu.dot_dimension_numbers<[1], [0], [0], [1], [0, 0, 1, 1], [], []>} : vector<32x216xbf16>, vector<216x81xbf16>, vector<32x81xf32> -> vector<32x81xf32>
    %c0_3 = arith.constant 0 : index
    %c0_4 = arith.constant 0 : index
    %3 = vector.load %arg3[%c0_3, %c0_4] : memref<32x1xf32, #tpu.memory_space<vmem>>, vector<32x1xf32>
    %4 = vector.broadcast %3 : vector<32x1xf32> to vector<32x81xf32>
    %5 = arith.addf %2, %4 : vector<32x81xf32>
    %cst_5 = arith.constant 0.000000e+00 : f32
    %6 = vector.broadcast %cst_5 : f32 to vector<32x81xf32>
    %7 = arith.maximumf %5, %6 : vector<32x81xf32>
    %c0_6 = arith.constant 0 : index
    %c0_7 = arith.constant 0 : index
    %8 = vector.load %arg4[%c0_6, %c0_7] : memref<32x81xf32, #tpu.memory_space<vmem>>, vector<32x81xf32>
    tpu.vector_store %arg4[%c0_6, %c0_7], %7 {strides = array<i32>} : memref<32x81xf32, #tpu.memory_space<vmem>>, vector<32x81xf32>,
    return
  }
  func.func @transform_0(%arg0: i32) -> (i32, i32) {
    %c0_i32 = arith.constant 0 : i32
    %c0_i32_0 = arith.constant 0 : i32
    %c0_i32_1 = arith.constant 0 : i32
    return %c0_i32, %c0_i32_0 : i32, i32
  }
  func.func @transform_1(%arg0: i32) -> (i32, i32) {
    %c0_i32 = arith.constant 0 : i32
    %c0_i32_0 = arith.constant 0 : i32
    return %c0_i32, %arg0 : i32, i32
  }
  func.func @transform_2(%arg0: i32) -> (i32, i32) {
    %c0_i32 = arith.constant 0 : i32
    %c0_i32_0 = arith.constant 0 : i32
    %c0_i32_1 = arith.constant 0 : i32
    return %c0_i32, %c0_i32_0 : i32, i32
  }
  func.func @transform_3(%arg0: i32) -> (i32, i32) {
    %c0_i32 = arith.constant 0 : i32
    %c0_i32_0 = arith.constant 0 : i32
    return %c0_i32, %arg0 : i32, i32
  }
}

module attributes {stable_mosaic.version = 11 : i64} {
  func.func @_corr_kernel(%arg0: i32, %arg1: memref<1x81x32xf32, #tpu.memory_space<vmem>>, %arg2: memref<1x32x81xf32, #tpu.memory_space<vmem>>, %arg3: memref<1x1x81xf32, #tpu.memory_space<vmem>>) attributes {dimension_semantics = [#tpu.dimension_semantics<parallel>], iteration_bounds = array<i64: 1>, scalar_prefetch = 0 : i64, scratch_operands = 0 : i64, tpu.core_type = #tpu.core_type<tc>, window_params = [{transform_indices = @transform_0, window_bounds = array<i64: 1, 81, 32>}, {transform_indices = @transform_1, window_bounds = array<i64: 1, 32, 81>}, {transform_indices = @transform_2, window_bounds = array<i64: 1, 1, 81>}]} {
    %c0 = arith.constant 0 : index
    %c0_0 = arith.constant 0 : index
    %c0_1 = arith.constant 0 : index
    %0 = vector.load %arg1[%c0, %c0_0, %c0_1] : memref<1x81x32xf32, #tpu.memory_space<vmem>>, vector<1x81x32xf32>
    %1 = vector.shape_cast %0 : vector<1x81x32xf32> to vector<81x32xf32>
    %c0_2 = arith.constant 0 : index
    %c0_3 = arith.constant 0 : index
    %c0_4 = arith.constant 0 : index
    %2 = vector.load %arg2[%c0_2, %c0_3, %c0_4] : memref<1x32x81xf32, #tpu.memory_space<vmem>>, vector<1x32x81xf32>
    %3 = vector.shape_cast %2 : vector<1x32x81xf32> to vector<32x81xf32>
    %cst = arith.constant dense<0.000000e+00> : vector<81x81xf32>
    %4 = tpu.matmul %1, %3, %cst {dimension_numbers = #tpu.dot_dimension_numbers<[1], [0], [0], [1], [0, 0, 1, 1], [], []>} : vector<81x32xf32>, vector<32x81xf32>, vector<81x81xf32> -> vector<81x81xf32>
    %5 = arith.mulf %1, %1 : vector<81x32xf32>
    %cst_5 = arith.constant dense<0.000000e+00> : vector<81xf32>
    %6 = vector.multi_reduction <add>, %5, %cst_5 [1] : vector<81x32xf32> to vector<81xf32>
    %7 = vector.shape_cast %6 : vector<81xf32> to vector<81x1xf32>
    %8 = math.sqrt %7 : vector<81x1xf32>
    %9 = arith.mulf %3, %3 : vector<32x81xf32>
    %cst_6 = arith.constant dense<0.000000e+00> : vector<81xf32>
    %10 = vector.multi_reduction <add>, %9, %cst_6 [0] : vector<32x81xf32> to vector<81xf32>
    %11 = vector.shape_cast %10 : vector<81xf32> to vector<1x81xf32>
    %12 = math.sqrt %11 : vector<1x81xf32>
    %13 = vector.broadcast %8 : vector<81x1xf32> to vector<81x81xf32>
    %14 = vector.broadcast %12 : vector<1x81xf32> to vector<81x81xf32>
    %15 = arith.mulf %13, %14 : vector<81x81xf32>
    %cst_7 = arith.constant 1.000000e-07 : f32
    %16 = vector.broadcast %cst_7 : f32 to vector<81x81xf32>
    %17 = arith.addf %15, %16 : vector<81x81xf32>
    %18 = tpu.reciprocal %17 {approx = true} : vector<81x81xf32> -> vector<81x81xf32>
    %19 = arith.mulf %4, %18 : vector<81x81xf32>
    %cst_8 = arith.constant dense<0xFF800000> : vector<81xf32>
    %20 = vector.multi_reduction <maximumf>, %19, %cst_8 [0] : vector<81x81xf32> to vector<81xf32>
    %21 = vector.shape_cast %20 : vector<81xf32> to vector<1x81xf32>
    %cst_9 = arith.constant dense<0x7F800000> : vector<1xf32>
    %22 = vector.multi_reduction <minimumf>, %21, %cst_9 [1] : vector<1x81xf32> to vector<1xf32>
    %23 = vector.shape_cast %22 : vector<1xf32> to vector<1x1xf32>
    %cst_10 = arith.constant dense<0xFF800000> : vector<1xf32>
    %24 = vector.multi_reduction <maximumf>, %21, %cst_10 [1] : vector<1x81xf32> to vector<1xf32>
    %25 = vector.shape_cast %24 : vector<1xf32> to vector<1x1xf32>
    %26 = vector.broadcast %23 : vector<1x1xf32> to vector<1x81xf32>
    %27 = arith.subf %21, %26 : vector<1x81xf32>
    %28 = arith.subf %25, %23 : vector<1x1xf32>
    %cst_11 = arith.constant 1.000000e-07 : f32
    %29 = vector.broadcast %cst_11 : f32 to vector<1x1xf32>
    %30 = arith.addf %28, %29 : vector<1x1xf32>
    %31 = tpu.reciprocal %30 {approx = true} : vector<1x1xf32> -> vector<1x1xf32>
    %32 = vector.broadcast %31 : vector<1x1xf32> to vector<1x81xf32>
    %33 = arith.mulf %27, %32 : vector<1x81xf32>
    %c0_12 = arith.constant 0 : index
    %c0_13 = arith.constant 0 : index
    %c0_14 = arith.constant 0 : index
    %34 = vector.load %arg3[%c0_12, %c0_13, %c0_14] : memref<1x1x81xf32, #tpu.memory_space<vmem>>, vector<1x1x81xf32>
    %35 = vector.shape_cast %34 : vector<1x1x81xf32> to vector<1x81xf32>
    %36 = vector.shape_cast %33 : vector<1x81xf32> to vector<1x1x81xf32>
    tpu.vector_store %arg3[%c0_12, %c0_13, %c0_14], %36 {strides = array<i32>} : memref<1x1x81xf32, #tpu.memory_space<vmem>>, vector<1x1x81xf32>,
    return
  }
  func.func @transform_0(%arg0: i32) -> (i32, i32, i32) {
    %c0_i32 = arith.constant 0 : i32
    %c0_i32_0 = arith.constant 0 : i32
    %c0_i32_1 = arith.constant 0 : i32
    return %arg0, %c0_i32, %c0_i32_0 : i32, i32, i32
  }
  func.func @transform_1(%arg0: i32) -> (i32, i32, i32) {
    %c0_i32 = arith.constant 0 : i32
    %c0_i32_0 = arith.constant 0 : i32
    %c0_i32_1 = arith.constant 0 : i32
    return %arg0, %c0_i32, %c0_i32_0 : i32, i32, i32
  }
  func.func @transform_2(%arg0: i32) -> (i32, i32, i32) {
    %c0_i32 = arith.constant 0 : i32
    %c0_i32_0 = arith.constant 0 : i32
    %c0_i32_1 = arith.constant 0 : i32
    return %arg0, %c0_i32, %c0_i32_0 : i32, i32, i32
  }
}

module attributes {stable_mosaic.version = 11 : i64} {
  func.func @_wgap_kernel(%arg0: i32, %arg1: memref<1x16x81xf32, #tpu.memory_space<vmem>>, %arg2: memref<1x1x81xf32, #tpu.memory_space<vmem>>, %arg3: memref<1x16x1xf32, #tpu.memory_space<vmem>>) attributes {dimension_semantics = [#tpu.dimension_semantics<parallel>], iteration_bounds = array<i64: 1>, scalar_prefetch = 0 : i64, scratch_operands = 0 : i64, tpu.core_type = #tpu.core_type<tc>, window_params = [{transform_indices = @transform_0, window_bounds = array<i64: 1, 16, 81>}, {transform_indices = @transform_1, window_bounds = array<i64: 1, 1, 81>}, {transform_indices = @transform_2, window_bounds = array<i64: 1, 16, 1>}]} {
    %c0 = arith.constant 0 : index
    %c0_0 = arith.constant 0 : index
    %c0_1 = arith.constant 0 : index
    %0 = vector.load %arg1[%c0, %c0_0, %c0_1] : memref<1x16x81xf32, #tpu.memory_space<vmem>>, vector<1x16x81xf32>
    %1 = vector.shape_cast %0 : vector<1x16x81xf32> to vector<16x81xf32>
    %c0_2 = arith.constant 0 : index
    %c0_3 = arith.constant 0 : index
    %c0_4 = arith.constant 0 : index
    %2 = vector.load %arg2[%c0_2, %c0_3, %c0_4] : memref<1x1x81xf32, #tpu.memory_space<vmem>>, vector<1x1x81xf32>
    %3 = vector.shape_cast %2 : vector<1x1x81xf32> to vector<1x81xf32>
    %4 = vector.shape_cast %3 : vector<1x81xf32> to vector<1x1x81xf32>
    %cst = arith.constant dense<0.000000e+00> : vector<1xf32>
    %5 = vector.multi_reduction <add>, %4, %cst [1, 2] : vector<1x1x81xf32> to vector<1xf32>
    %6 = vector.shape_cast %5 : vector<1xf32> to vector<1x1x1xf32>
    %7 = vector.extract %6[0, 0, 0] : f32 from vector<1x1x1xf32>
    %cst_5 = arith.constant 5.000000e-04 : f32
    %8 = arith.addf %7, %cst_5 : f32
    %9 = vector.broadcast %3 : vector<1x81xf32> to vector<16x81xf32>
    %10 = arith.mulf %1, %9 : vector<16x81xf32>
    %cst_6 = arith.constant dense<0.000000e+00> : vector<16xf32>
    %11 = vector.multi_reduction <add>, %10, %cst_6 [1] : vector<16x81xf32> to vector<16xf32>
    %12 = vector.shape_cast %11 : vector<16xf32> to vector<16x1xf32>
    %13 = vector.broadcast %8 : f32 to vector<16x1xf32>
    %14 = arith.divf %12, %13 : vector<16x1xf32>
    %c0_7 = arith.constant 0 : index
    %c0_8 = arith.constant 0 : index
    %c0_9 = arith.constant 0 : index
    %15 = vector.load %arg3[%c0_7, %c0_8, %c0_9] : memref<1x16x1xf32, #tpu.memory_space<vmem>>, vector<1x16x1xf32>
    %16 = vector.shape_cast %15 : vector<1x16x1xf32> to vector<16x1xf32>
    %17 = vector.shape_cast %14 : vector<16x1xf32> to vector<1x16x1xf32>
    tpu.vector_store %arg3[%c0_7, %c0_8, %c0_9], %17 {strides = array<i32>} : memref<1x16x1xf32, #tpu.memory_space<vmem>>, vector<1x16x1xf32>,
    return
  }
  func.func @transform_0(%arg0: i32) -> (i32, i32, i32) {
    %c0_i32 = arith.constant 0 : i32
    %c0_i32_0 = arith.constant 0 : i32
    %c0_i32_1 = arith.constant 0 : i32
    return %arg0, %c0_i32, %c0_i32_0 : i32, i32, i32
  }
  func.func @transform_1(%arg0: i32) -> (i32, i32, i32) {
    %c0_i32 = arith.constant 0 : i32
    %c0_i32_0 = arith.constant 0 : i32
    %c0_i32_1 = arith.constant 0 : i32
    return %arg0, %c0_i32, %c0_i32_0 : i32, i32, i32
  }
  func.func @transform_2(%arg0: i32) -> (i32, i32, i32) {
    %c0_i32 = arith.constant 0 : i32
    %c0_i32_0 = arith.constant 0 : i32
    %c0_i32_1 = arith.constant 0 : i32
    return %arg0, %c0_i32, %c0_i32_0 : i32, i32, i32
  }
}

module attributes {stable_mosaic.version = 11 : i64} {
  func.func @_conv_gemm_kernel(%arg0: i32, %arg1: memref<16x33xbf16, #tpu.memory_space<vmem>>, %arg2: memref<33x64xbf16, #tpu.memory_space<vmem>>, %arg3: memref<16x1xf32, #tpu.memory_space<vmem>>, %arg4: memref<16x64xf32, #tpu.memory_space<vmem>>) attributes {dimension_semantics = [#tpu.dimension_semantics<parallel>], iteration_bounds = array<i64: 1>, scalar_prefetch = 0 : i64, scratch_operands = 0 : i64, tpu.core_type = #tpu.core_type<tc>, window_params = [{pipeline_mode = #tpu.pipeline_mode<synchronous>, transform_indices = @transform_0, window_bounds = array<i64: 16, 33>}, {transform_indices = @transform_1, window_bounds = array<i64: 33, 64>}, {pipeline_mode = #tpu.pipeline_mode<synchronous>, transform_indices = @transform_2, window_bounds = array<i64: 16, 1>}, {transform_indices = @transform_3, window_bounds = array<i64: 16, 64>}]} {
    %c0 = arith.constant 0 : index
    %c0_0 = arith.constant 0 : index
    %0 = vector.load %arg1[%c0, %c0_0] : memref<16x33xbf16, #tpu.memory_space<vmem>>, vector<16x33xbf16>
    %c0_1 = arith.constant 0 : index
    %c0_2 = arith.constant 0 : index
    %1 = vector.load %arg2[%c0_1, %c0_2] : memref<33x64xbf16, #tpu.memory_space<vmem>>, vector<33x64xbf16>
    %cst = arith.constant dense<0.000000e+00> : vector<16x64xf32>
    %2 = tpu.matmul %0, %1, %cst {dimension_numbers = #tpu.dot_dimension_numbers<[1], [0], [0], [1], [0, 0, 1, 1], [], []>} : vector<16x33xbf16>, vector<33x64xbf16>, vector<16x64xf32> -> vector<16x64xf32>
    %c0_3 = arith.constant 0 : index
    %c0_4 = arith.constant 0 : index
    %3 = vector.load %arg3[%c0_3, %c0_4] : memref<16x1xf32, #tpu.memory_space<vmem>>, vector<16x1xf32>
    %4 = vector.broadcast %3 : vector<16x1xf32> to vector<16x64xf32>
    %5 = arith.addf %2, %4 : vector<16x64xf32>
    %cst_5 = arith.constant 0.000000e+00 : f32
    %6 = vector.broadcast %cst_5 : f32 to vector<16x64xf32>
    %7 = arith.maximumf %5, %6 : vector<16x64xf32>
    %c0_6 = arith.constant 0 : index
    %c0_7 = arith.constant 0 : index
    %8 = vector.load %arg4[%c0_6, %c0_7] : memref<16x64xf32, #tpu.memory_space<vmem>>, vector<16x64xf32>
    tpu.vector_store %arg4[%c0_6, %c0_7], %7 {strides = array<i32>} : memref<16x64xf32, #tpu.memory_space<vmem>>, vector<16x64xf32>,
    return
  }
  func.func @transform_0(%arg0: i32) -> (i32, i32) {
    %c0_i32 = arith.constant 0 : i32
    %c0_i32_0 = arith.constant 0 : i32
    %c0_i32_1 = arith.constant 0 : i32
    return %c0_i32, %c0_i32_0 : i32, i32
  }
  func.func @transform_1(%arg0: i32) -> (i32, i32) {
    %c0_i32 = arith.constant 0 : i32
    %c0_i32_0 = arith.constant 0 : i32
    return %c0_i32, %arg0 : i32, i32
  }
  func.func @transform_2(%arg0: i32) -> (i32, i32) {
    %c0_i32 = arith.constant 0 : i32
    %c0_i32_0 = arith.constant 0 : i32
    %c0_i32_1 = arith.constant 0 : i32
    return %c0_i32, %c0_i32_0 : i32, i32
  }
  func.func @transform_3(%arg0: i32) -> (i32, i32) {
    %c0_i32 = arith.constant 0 : i32
    %c0_i32_0 = arith.constant 0 : i32
    return %c0_i32, %arg0 : i32, i32
  }
}

module attributes {stable_mosaic.version = 11 : i64} {
  func.func @_conv_gemm_kernel(%arg0: i32, %arg1: memref<16x144xbf16, #tpu.memory_space<vmem>>, %arg2: memref<144x64xbf16, #tpu.memory_space<vmem>>, %arg3: memref<16x1xf32, #tpu.memory_space<vmem>>, %arg4: memref<16x64xf32, #tpu.memory_space<vmem>>) attributes {dimension_semantics = [#tpu.dimension_semantics<parallel>], iteration_bounds = array<i64: 1>, scalar_prefetch = 0 : i64, scratch_operands = 0 : i64, tpu.core_type = #tpu.core_type<tc>, window_params = [{pipeline_mode = #tpu.pipeline_mode<synchronous>, transform_indices = @transform_0, window_bounds = array<i64: 16, 144>}, {transform_indices = @transform_1, window_bounds = array<i64: 144, 64>}, {pipeline_mode = #tpu.pipeline_mode<synchronous>, transform_indices = @transform_2, window_bounds = array<i64: 16, 1>}, {transform_indices = @transform_3, window_bounds = array<i64: 16, 64>}]} {
    %c0 = arith.constant 0 : index
    %c0_0 = arith.constant 0 : index
    %0 = vector.load %arg1[%c0, %c0_0] : memref<16x144xbf16, #tpu.memory_space<vmem>>, vector<16x144xbf16>
    %c0_1 = arith.constant 0 : index
    %c0_2 = arith.constant 0 : index
    %1 = vector.load %arg2[%c0_1, %c0_2] : memref<144x64xbf16, #tpu.memory_space<vmem>>, vector<144x64xbf16>
    %cst = arith.constant dense<0.000000e+00> : vector<16x64xf32>
    %2 = tpu.matmul %0, %1, %cst {dimension_numbers = #tpu.dot_dimension_numbers<[1], [0], [0], [1], [0, 0, 1, 1], [], []>} : vector<16x144xbf16>, vector<144x64xbf16>, vector<16x64xf32> -> vector<16x64xf32>
    %c0_3 = arith.constant 0 : index
    %c0_4 = arith.constant 0 : index
    %3 = vector.load %arg3[%c0_3, %c0_4] : memref<16x1xf32, #tpu.memory_space<vmem>>, vector<16x1xf32>
    %4 = vector.broadcast %3 : vector<16x1xf32> to vector<16x64xf32>
    %5 = arith.addf %2, %4 : vector<16x64xf32>
    %cst_5 = arith.constant 0.000000e+00 : f32
    %6 = vector.broadcast %cst_5 : f32 to vector<16x64xf32>
    %7 = arith.maximumf %5, %6 : vector<16x64xf32>
    %c0_6 = arith.constant 0 : index
    %c0_7 = arith.constant 0 : index
    %8 = vector.load %arg4[%c0_6, %c0_7] : memref<16x64xf32, #tpu.memory_space<vmem>>, vector<16x64xf32>
    tpu.vector_store %arg4[%c0_6, %c0_7], %7 {strides = array<i32>} : memref<16x64xf32, #tpu.memory_space<vmem>>, vector<16x64xf32>,
    return
  }
  func.func @transform_0(%arg0: i32) -> (i32, i32) {
    %c0_i32 = arith.constant 0 : i32
    %c0_i32_0 = arith.constant 0 : i32
    %c0_i32_1 = arith.constant 0 : i32
    return %c0_i32, %c0_i32_0 : i32, i32
  }
  func.func @transform_1(%arg0: i32) -> (i32, i32) {
    %c0_i32 = arith.constant 0 : i32
    %c0_i32_0 = arith.constant 0 : i32
    return %c0_i32, %arg0 : i32, i32
  }
  func.func @transform_2(%arg0: i32) -> (i32, i32) {
    %c0_i32 = arith.constant 0 : i32
    %c0_i32_0 = arith.constant 0 : i32
    %c0_i32_1 = arith.constant 0 : i32
    return %c0_i32, %c0_i32_0 : i32, i32
  }
  func.func @transform_3(%arg0: i32) -> (i32, i32) {
    %c0_i32 = arith.constant 0 : i32
    %c0_i32_0 = arith.constant 0 : i32
    return %c0_i32, %arg0 : i32, i32
  }
}

module attributes {stable_mosaic.version = 11 : i64} {
  func.func @_conv_gemm_kernel(%arg0: i32, %arg1: memref<16x33xbf16, #tpu.memory_space<vmem>>, %arg2: memref<33x16xbf16, #tpu.memory_space<vmem>>, %arg3: memref<16x1xf32, #tpu.memory_space<vmem>>, %arg4: memref<16x16xf32, #tpu.memory_space<vmem>>) attributes {dimension_semantics = [#tpu.dimension_semantics<parallel>], iteration_bounds = array<i64: 1>, scalar_prefetch = 0 : i64, scratch_operands = 0 : i64, tpu.core_type = #tpu.core_type<tc>, window_params = [{pipeline_mode = #tpu.pipeline_mode<synchronous>, transform_indices = @transform_0, window_bounds = array<i64: 16, 33>}, {transform_indices = @transform_1, window_bounds = array<i64: 33, 16>}, {pipeline_mode = #tpu.pipeline_mode<synchronous>, transform_indices = @transform_2, window_bounds = array<i64: 16, 1>}, {transform_indices = @transform_3, window_bounds = array<i64: 16, 16>}]} {
    %c0 = arith.constant 0 : index
    %c0_0 = arith.constant 0 : index
    %0 = vector.load %arg1[%c0, %c0_0] : memref<16x33xbf16, #tpu.memory_space<vmem>>, vector<16x33xbf16>
    %c0_1 = arith.constant 0 : index
    %c0_2 = arith.constant 0 : index
    %1 = vector.load %arg2[%c0_1, %c0_2] : memref<33x16xbf16, #tpu.memory_space<vmem>>, vector<33x16xbf16>
    %cst = arith.constant dense<0.000000e+00> : vector<16x16xf32>
    %2 = tpu.matmul %0, %1, %cst {dimension_numbers = #tpu.dot_dimension_numbers<[1], [0], [0], [1], [0, 0, 1, 1], [], []>} : vector<16x33xbf16>, vector<33x16xbf16>, vector<16x16xf32> -> vector<16x16xf32>
    %c0_3 = arith.constant 0 : index
    %c0_4 = arith.constant 0 : index
    %3 = vector.load %arg3[%c0_3, %c0_4] : memref<16x1xf32, #tpu.memory_space<vmem>>, vector<16x1xf32>
    %4 = vector.broadcast %3 : vector<16x1xf32> to vector<16x16xf32>
    %5 = arith.addf %2, %4 : vector<16x16xf32>
    %cst_5 = arith.constant 0.000000e+00 : f32
    %6 = vector.broadcast %cst_5 : f32 to vector<16x16xf32>
    %7 = arith.maximumf %5, %6 : vector<16x16xf32>
    %c0_6 = arith.constant 0 : index
    %c0_7 = arith.constant 0 : index
    %8 = vector.load %arg4[%c0_6, %c0_7] : memref<16x16xf32, #tpu.memory_space<vmem>>, vector<16x16xf32>
    tpu.vector_store %arg4[%c0_6, %c0_7], %7 {strides = array<i32>} : memref<16x16xf32, #tpu.memory_space<vmem>>, vector<16x16xf32>,
    return
  }
  func.func @transform_0(%arg0: i32) -> (i32, i32) {
    %c0_i32 = arith.constant 0 : i32
    %c0_i32_0 = arith.constant 0 : i32
    %c0_i32_1 = arith.constant 0 : i32
    return %c0_i32, %c0_i32_0 : i32, i32
  }
  func.func @transform_1(%arg0: i32) -> (i32, i32) {
    %c0_i32 = arith.constant 0 : i32
    %c0_i32_0 = arith.constant 0 : i32
    return %c0_i32, %arg0 : i32, i32
  }
  func.func @transform_2(%arg0: i32) -> (i32, i32) {
    %c0_i32 = arith.constant 0 : i32
    %c0_i32_0 = arith.constant 0 : i32
    %c0_i32_1 = arith.constant 0 : i32
    return %c0_i32, %c0_i32_0 : i32, i32
  }
  func.func @transform_3(%arg0: i32) -> (i32, i32) {
    %c0_i32 = arith.constant 0 : i32
    %c0_i32_0 = arith.constant 0 : i32
    return %c0_i32, %arg0 : i32, i32
  }
}

module attributes {stable_mosaic.version = 11 : i64} {
  func.func @_conv_gemm_kernel(%arg0: i32, %arg1: memref<16x32xbf16, #tpu.memory_space<vmem>>, %arg2: memref<32x16xbf16, #tpu.memory_space<vmem>>, %arg3: memref<16x1xf32, #tpu.memory_space<vmem>>, %arg4: memref<16x16xf32, #tpu.memory_space<vmem>>) attributes {dimension_semantics = [#tpu.dimension_semantics<parallel>], iteration_bounds = array<i64: 1>, scalar_prefetch = 0 : i64, scratch_operands = 0 : i64, tpu.core_type = #tpu.core_type<tc>, window_params = [{pipeline_mode = #tpu.pipeline_mode<synchronous>, transform_indices = @transform_0, window_bounds = array<i64: 16, 32>}, {transform_indices = @transform_1, window_bounds = array<i64: 32, 16>}, {pipeline_mode = #tpu.pipeline_mode<synchronous>, transform_indices = @transform_2, window_bounds = array<i64: 16, 1>}, {transform_indices = @transform_3, window_bounds = array<i64: 16, 16>}]} {
    %c0 = arith.constant 0 : index
    %c0_0 = arith.constant 0 : index
    %0 = vector.load %arg1[%c0, %c0_0] : memref<16x32xbf16, #tpu.memory_space<vmem>>, vector<16x32xbf16>
    %c0_1 = arith.constant 0 : index
    %c0_2 = arith.constant 0 : index
    %1 = vector.load %arg2[%c0_1, %c0_2] : memref<32x16xbf16, #tpu.memory_space<vmem>>, vector<32x16xbf16>
    %cst = arith.constant dense<0.000000e+00> : vector<16x16xf32>
    %2 = tpu.matmul %0, %1, %cst {dimension_numbers = #tpu.dot_dimension_numbers<[1], [0], [0], [1], [0, 0, 1, 1], [], []>} : vector<16x32xbf16>, vector<32x16xbf16>, vector<16x16xf32> -> vector<16x16xf32>
    %c0_3 = arith.constant 0 : index
    %c0_4 = arith.constant 0 : index
    %3 = vector.load %arg3[%c0_3, %c0_4] : memref<16x1xf32, #tpu.memory_space<vmem>>, vector<16x1xf32>
    %4 = vector.broadcast %3 : vector<16x1xf32> to vector<16x16xf32>
    %5 = arith.addf %2, %4 : vector<16x16xf32>
    %cst_5 = arith.constant 0.000000e+00 : f32
    %6 = vector.broadcast %cst_5 : f32 to vector<16x16xf32>
    %7 = arith.maximumf %5, %6 : vector<16x16xf32>
    %c0_6 = arith.constant 0 : index
    %c0_7 = arith.constant 0 : index
    %8 = vector.load %arg4[%c0_6, %c0_7] : memref<16x16xf32, #tpu.memory_space<vmem>>, vector<16x16xf32>
    tpu.vector_store %arg4[%c0_6, %c0_7], %7 {strides = array<i32>} : memref<16x16xf32, #tpu.memory_space<vmem>>, vector<16x16xf32>,
    return
  }
  func.func @transform_0(%arg0: i32) -> (i32, i32) {
    %c0_i32 = arith.constant 0 : i32
    %c0_i32_0 = arith.constant 0 : i32
    %c0_i32_1 = arith.constant 0 : i32
    return %c0_i32, %c0_i32_0 : i32, i32
  }
  func.func @transform_1(%arg0: i32) -> (i32, i32) {
    %c0_i32 = arith.constant 0 : i32
    %c0_i32_0 = arith.constant 0 : i32
    return %c0_i32, %arg0 : i32, i32
  }
  func.func @transform_2(%arg0: i32) -> (i32, i32) {
    %c0_i32 = arith.constant 0 : i32
    %c0_i32_0 = arith.constant 0 : i32
    %c0_i32_1 = arith.constant 0 : i32
    return %c0_i32, %c0_i32_0 : i32, i32
  }
  func.func @transform_3(%arg0: i32) -> (i32, i32) {
    %c0_i32 = arith.constant 0 : i32
    %c0_i32_0 = arith.constant 0 : i32
    return %c0_i32, %arg0 : i32, i32
  }
}

module attributes {stable_mosaic.version = 11 : i64} {
  func.func @_conv_gemm_kernel(%arg0: i32, %arg1: memref<16x144xbf16, #tpu.memory_space<vmem>>, %arg2: memref<144x16xbf16, #tpu.memory_space<vmem>>, %arg3: memref<16x1xf32, #tpu.memory_space<vmem>>, %arg4: memref<16x16xf32, #tpu.memory_space<vmem>>) attributes {dimension_semantics = [#tpu.dimension_semantics<parallel>], iteration_bounds = array<i64: 1>, scalar_prefetch = 0 : i64, scratch_operands = 0 : i64, tpu.core_type = #tpu.core_type<tc>, window_params = [{pipeline_mode = #tpu.pipeline_mode<synchronous>, transform_indices = @transform_0, window_bounds = array<i64: 16, 144>}, {transform_indices = @transform_1, window_bounds = array<i64: 144, 16>}, {pipeline_mode = #tpu.pipeline_mode<synchronous>, transform_indices = @transform_2, window_bounds = array<i64: 16, 1>}, {transform_indices = @transform_3, window_bounds = array<i64: 16, 16>}]} {
    %c0 = arith.constant 0 : index
    %c0_0 = arith.constant 0 : index
    %0 = vector.load %arg1[%c0, %c0_0] : memref<16x144xbf16, #tpu.memory_space<vmem>>, vector<16x144xbf16>
    %c0_1 = arith.constant 0 : index
    %c0_2 = arith.constant 0 : index
    %1 = vector.load %arg2[%c0_1, %c0_2] : memref<144x16xbf16, #tpu.memory_space<vmem>>, vector<144x16xbf16>
    %cst = arith.constant dense<0.000000e+00> : vector<16x16xf32>
    %2 = tpu.matmul %0, %1, %cst {dimension_numbers = #tpu.dot_dimension_numbers<[1], [0], [0], [1], [0, 0, 1, 1], [], []>} : vector<16x144xbf16>, vector<144x16xbf16>, vector<16x16xf32> -> vector<16x16xf32>
    %c0_3 = arith.constant 0 : index
    %c0_4 = arith.constant 0 : index
    %3 = vector.load %arg3[%c0_3, %c0_4] : memref<16x1xf32, #tpu.memory_space<vmem>>, vector<16x1xf32>
    %4 = vector.broadcast %3 : vector<16x1xf32> to vector<16x16xf32>
    %5 = arith.addf %2, %4 : vector<16x16xf32>
    %cst_5 = arith.constant 0.000000e+00 : f32
    %6 = vector.broadcast %cst_5 : f32 to vector<16x16xf32>
    %7 = arith.maximumf %5, %6 : vector<16x16xf32>
    %c0_6 = arith.constant 0 : index
    %c0_7 = arith.constant 0 : index
    %8 = vector.load %arg4[%c0_6, %c0_7] : memref<16x16xf32, #tpu.memory_space<vmem>>, vector<16x16xf32>
    tpu.vector_store %arg4[%c0_6, %c0_7], %7 {strides = array<i32>} : memref<16x16xf32, #tpu.memory_space<vmem>>, vector<16x16xf32>,
    return
  }
  func.func @transform_0(%arg0: i32) -> (i32, i32) {
    %c0_i32 = arith.constant 0 : i32
    %c0_i32_0 = arith.constant 0 : i32
    %c0_i32_1 = arith.constant 0 : i32
    return %c0_i32, %c0_i32_0 : i32, i32
  }
  func.func @transform_1(%arg0: i32) -> (i32, i32) {
    %c0_i32 = arith.constant 0 : i32
    %c0_i32_0 = arith.constant 0 : i32
    return %c0_i32, %arg0 : i32, i32
  }
  func.func @transform_2(%arg0: i32) -> (i32, i32) {
    %c0_i32 = arith.constant 0 : i32
    %c0_i32_0 = arith.constant 0 : i32
    %c0_i32_1 = arith.constant 0 : i32
    return %c0_i32, %c0_i32_0 : i32, i32
  }
  func.func @transform_3(%arg0: i32) -> (i32, i32) {
    %c0_i32 = arith.constant 0 : i32
    %c0_i32_0 = arith.constant 0 : i32
    return %c0_i32, %arg0 : i32, i32
  }
}

module attributes {stable_mosaic.version = 11 : i64} {
  func.func @_conv_gemm_kernel(%arg0: i32, %arg1: memref<16x33xbf16, #tpu.memory_space<vmem>>, %arg2: memref<33x4xbf16, #tpu.memory_space<vmem>>, %arg3: memref<16x1xf32, #tpu.memory_space<vmem>>, %arg4: memref<16x4xf32, #tpu.memory_space<vmem>>) attributes {dimension_semantics = [#tpu.dimension_semantics<parallel>], iteration_bounds = array<i64: 1>, scalar_prefetch = 0 : i64, scratch_operands = 0 : i64, tpu.core_type = #tpu.core_type<tc>, window_params = [{pipeline_mode = #tpu.pipeline_mode<synchronous>, transform_indices = @transform_0, window_bounds = array<i64: 16, 33>}, {transform_indices = @transform_1, window_bounds = array<i64: 33, 4>}, {pipeline_mode = #tpu.pipeline_mode<synchronous>, transform_indices = @transform_2, window_bounds = array<i64: 16, 1>}, {transform_indices = @transform_3, window_bounds = array<i64: 16, 4>}]} {
    %c0 = arith.constant 0 : index
    %c0_0 = arith.constant 0 : index
    %0 = vector.load %arg1[%c0, %c0_0] : memref<16x33xbf16, #tpu.memory_space<vmem>>, vector<16x33xbf16>
    %c0_1 = arith.constant 0 : index
    %c0_2 = arith.constant 0 : index
    %1 = vector.load %arg2[%c0_1, %c0_2] : memref<33x4xbf16, #tpu.memory_space<vmem>>, vector<33x4xbf16>
    %cst = arith.constant dense<0.000000e+00> : vector<16x4xf32>
    %2 = tpu.matmul %0, %1, %cst {dimension_numbers = #tpu.dot_dimension_numbers<[1], [0], [0], [1], [0, 0, 1, 1], [], []>} : vector<16x33xbf16>, vector<33x4xbf16>, vector<16x4xf32> -> vector<16x4xf32>
    %c0_3 = arith.constant 0 : index
    %c0_4 = arith.constant 0 : index
    %3 = vector.load %arg3[%c0_3, %c0_4] : memref<16x1xf32, #tpu.memory_space<vmem>>, vector<16x1xf32>
    %4 = vector.broadcast %3 : vector<16x1xf32> to vector<16x4xf32>
    %5 = arith.addf %2, %4 : vector<16x4xf32>
    %cst_5 = arith.constant 0.000000e+00 : f32
    %6 = vector.broadcast %cst_5 : f32 to vector<16x4xf32>
    %7 = arith.maximumf %5, %6 : vector<16x4xf32>
    %c0_6 = arith.constant 0 : index
    %c0_7 = arith.constant 0 : index
    %8 = vector.load %arg4[%c0_6, %c0_7] : memref<16x4xf32, #tpu.memory_space<vmem>>, vector<16x4xf32>
    tpu.vector_store %arg4[%c0_6, %c0_7], %7 {strides = array<i32>} : memref<16x4xf32, #tpu.memory_space<vmem>>, vector<16x4xf32>,
    return
  }
  func.func @transform_0(%arg0: i32) -> (i32, i32) {
    %c0_i32 = arith.constant 0 : i32
    %c0_i32_0 = arith.constant 0 : i32
    %c0_i32_1 = arith.constant 0 : i32
    return %c0_i32, %c0_i32_0 : i32, i32
  }
  func.func @transform_1(%arg0: i32) -> (i32, i32) {
    %c0_i32 = arith.constant 0 : i32
    %c0_i32_0 = arith.constant 0 : i32
    return %c0_i32, %arg0 : i32, i32
  }
  func.func @transform_2(%arg0: i32) -> (i32, i32) {
    %c0_i32 = arith.constant 0 : i32
    %c0_i32_0 = arith.constant 0 : i32
    %c0_i32_1 = arith.constant 0 : i32
    return %c0_i32, %c0_i32_0 : i32, i32
  }
  func.func @transform_3(%arg0: i32) -> (i32, i32) {
    %c0_i32 = arith.constant 0 : i32
    %c0_i32_0 = arith.constant 0 : i32
    return %c0_i32, %arg0 : i32, i32
  }
}

module attributes {stable_mosaic.version = 11 : i64} {
  func.func @_conv_gemm_kernel(%arg0: i32, %arg1: memref<16x32xbf16, #tpu.memory_space<vmem>>, %arg2: memref<32x4xbf16, #tpu.memory_space<vmem>>, %arg3: memref<16x1xf32, #tpu.memory_space<vmem>>, %arg4: memref<16x4xf32, #tpu.memory_space<vmem>>) attributes {dimension_semantics = [#tpu.dimension_semantics<parallel>], iteration_bounds = array<i64: 1>, scalar_prefetch = 0 : i64, scratch_operands = 0 : i64, tpu.core_type = #tpu.core_type<tc>, window_params = [{pipeline_mode = #tpu.pipeline_mode<synchronous>, transform_indices = @transform_0, window_bounds = array<i64: 16, 32>}, {transform_indices = @transform_1, window_bounds = array<i64: 32, 4>}, {pipeline_mode = #tpu.pipeline_mode<synchronous>, transform_indices = @transform_2, window_bounds = array<i64: 16, 1>}, {transform_indices = @transform_3, window_bounds = array<i64: 16, 4>}]} {
    %c0 = arith.constant 0 : index
    %c0_0 = arith.constant 0 : index
    %0 = vector.load %arg1[%c0, %c0_0] : memref<16x32xbf16, #tpu.memory_space<vmem>>, vector<16x32xbf16>
    %c0_1 = arith.constant 0 : index
    %c0_2 = arith.constant 0 : index
    %1 = vector.load %arg2[%c0_1, %c0_2] : memref<32x4xbf16, #tpu.memory_space<vmem>>, vector<32x4xbf16>
    %cst = arith.constant dense<0.000000e+00> : vector<16x4xf32>
    %2 = tpu.matmul %0, %1, %cst {dimension_numbers = #tpu.dot_dimension_numbers<[1], [0], [0], [1], [0, 0, 1, 1], [], []>} : vector<16x32xbf16>, vector<32x4xbf16>, vector<16x4xf32> -> vector<16x4xf32>
    %c0_3 = arith.constant 0 : index
    %c0_4 = arith.constant 0 : index
    %3 = vector.load %arg3[%c0_3, %c0_4] : memref<16x1xf32, #tpu.memory_space<vmem>>, vector<16x1xf32>
    %4 = vector.broadcast %3 : vector<16x1xf32> to vector<16x4xf32>
    %5 = arith.addf %2, %4 : vector<16x4xf32>
    %cst_5 = arith.constant 0.000000e+00 : f32
    %6 = vector.broadcast %cst_5 : f32 to vector<16x4xf32>
    %7 = arith.maximumf %5, %6 : vector<16x4xf32>
    %c0_6 = arith.constant 0 : index
    %c0_7 = arith.constant 0 : index
    %8 = vector.load %arg4[%c0_6, %c0_7] : memref<16x4xf32, #tpu.memory_space<vmem>>, vector<16x4xf32>
    tpu.vector_store %arg4[%c0_6, %c0_7], %7 {strides = array<i32>} : memref<16x4xf32, #tpu.memory_space<vmem>>, vector<16x4xf32>,
    return
  }
  func.func @transform_0(%arg0: i32) -> (i32, i32) {
    %c0_i32 = arith.constant 0 : i32
    %c0_i32_0 = arith.constant 0 : i32
    %c0_i32_1 = arith.constant 0 : i32
    return %c0_i32, %c0_i32_0 : i32, i32
  }
  func.func @transform_1(%arg0: i32) -> (i32, i32) {
    %c0_i32 = arith.constant 0 : i32
    %c0_i32_0 = arith.constant 0 : i32
    return %c0_i32, %arg0 : i32, i32
  }
  func.func @transform_2(%arg0: i32) -> (i32, i32) {
    %c0_i32 = arith.constant 0 : i32
    %c0_i32_0 = arith.constant 0 : i32
    %c0_i32_1 = arith.constant 0 : i32
    return %c0_i32, %c0_i32_0 : i32, i32
  }
  func.func @transform_3(%arg0: i32) -> (i32, i32) {
    %c0_i32 = arith.constant 0 : i32
    %c0_i32_0 = arith.constant 0 : i32
    return %c0_i32, %arg0 : i32, i32
  }
}

module attributes {stable_mosaic.version = 11 : i64} {
  func.func @_conv_gemm_kernel(%arg0: i32, %arg1: memref<16x144xbf16, #tpu.memory_space<vmem>>, %arg2: memref<144x4xbf16, #tpu.memory_space<vmem>>, %arg3: memref<16x1xf32, #tpu.memory_space<vmem>>, %arg4: memref<16x4xf32, #tpu.memory_space<vmem>>) attributes {dimension_semantics = [#tpu.dimension_semantics<parallel>], iteration_bounds = array<i64: 1>, scalar_prefetch = 0 : i64, scratch_operands = 0 : i64, tpu.core_type = #tpu.core_type<tc>, window_params = [{pipeline_mode = #tpu.pipeline_mode<synchronous>, transform_indices = @transform_0, window_bounds = array<i64: 16, 144>}, {transform_indices = @transform_1, window_bounds = array<i64: 144, 4>}, {pipeline_mode = #tpu.pipeline_mode<synchronous>, transform_indices = @transform_2, window_bounds = array<i64: 16, 1>}, {transform_indices = @transform_3, window_bounds = array<i64: 16, 4>}]} {
    %c0 = arith.constant 0 : index
    %c0_0 = arith.constant 0 : index
    %0 = vector.load %arg1[%c0, %c0_0] : memref<16x144xbf16, #tpu.memory_space<vmem>>, vector<16x144xbf16>
    %c0_1 = arith.constant 0 : index
    %c0_2 = arith.constant 0 : index
    %1 = vector.load %arg2[%c0_1, %c0_2] : memref<144x4xbf16, #tpu.memory_space<vmem>>, vector<144x4xbf16>
    %cst = arith.constant dense<0.000000e+00> : vector<16x4xf32>
    %2 = tpu.matmul %0, %1, %cst {dimension_numbers = #tpu.dot_dimension_numbers<[1], [0], [0], [1], [0, 0, 1, 1], [], []>} : vector<16x144xbf16>, vector<144x4xbf16>, vector<16x4xf32> -> vector<16x4xf32>
    %c0_3 = arith.constant 0 : index
    %c0_4 = arith.constant 0 : index
    %3 = vector.load %arg3[%c0_3, %c0_4] : memref<16x1xf32, #tpu.memory_space<vmem>>, vector<16x1xf32>
    %4 = vector.broadcast %3 : vector<16x1xf32> to vector<16x4xf32>
    %5 = arith.addf %2, %4 : vector<16x4xf32>
    %cst_5 = arith.constant 0.000000e+00 : f32
    %6 = vector.broadcast %cst_5 : f32 to vector<16x4xf32>
    %7 = arith.maximumf %5, %6 : vector<16x4xf32>
    %c0_6 = arith.constant 0 : index
    %c0_7 = arith.constant 0 : index
    %8 = vector.load %arg4[%c0_6, %c0_7] : memref<16x4xf32, #tpu.memory_space<vmem>>, vector<16x4xf32>
    tpu.vector_store %arg4[%c0_6, %c0_7], %7 {strides = array<i32>} : memref<16x4xf32, #tpu.memory_space<vmem>>, vector<16x4xf32>,
    return
  }
  func.func @transform_0(%arg0: i32) -> (i32, i32) {
    %c0_i32 = arith.constant 0 : i32
    %c0_i32_0 = arith.constant 0 : i32
    %c0_i32_1 = arith.constant 0 : i32
    return %c0_i32, %c0_i32_0 : i32, i32
  }
  func.func @transform_1(%arg0: i32) -> (i32, i32) {
    %c0_i32 = arith.constant 0 : i32
    %c0_i32_0 = arith.constant 0 : i32
    return %c0_i32, %arg0 : i32, i32
  }
  func.func @transform_2(%arg0: i32) -> (i32, i32) {
    %c0_i32 = arith.constant 0 : i32
    %c0_i32_0 = arith.constant 0 : i32
    %c0_i32_1 = arith.constant 0 : i32
    return %c0_i32, %c0_i32_0 : i32, i32
  }
  func.func @transform_3(%arg0: i32) -> (i32, i32) {
    %c0_i32 = arith.constant 0 : i32
    %c0_i32_0 = arith.constant 0 : i32
    return %c0_i32, %arg0 : i32, i32
  }
}

module attributes {stable_mosaic.version = 11 : i64} {
  func.func @_conv_gemm_kernel(%arg0: i32, %arg1: memref<16x48xbf16, #tpu.memory_space<vmem>>, %arg2: memref<48x81xbf16, #tpu.memory_space<vmem>>, %arg3: memref<16x1xf32, #tpu.memory_space<vmem>>, %arg4: memref<16x81xf32, #tpu.memory_space<vmem>>) attributes {dimension_semantics = [#tpu.dimension_semantics<parallel>], iteration_bounds = array<i64: 1>, scalar_prefetch = 0 : i64, scratch_operands = 0 : i64, tpu.core_type = #tpu.core_type<tc>, window_params = [{pipeline_mode = #tpu.pipeline_mode<synchronous>, transform_indices = @transform_0, window_bounds = array<i64: 16, 48>}, {transform_indices = @transform_1, window_bounds = array<i64: 48, 81>}, {pipeline_mode = #tpu.pipeline_mode<synchronous>, transform_indices = @transform_2, window_bounds = array<i64: 16, 1>}, {transform_indices = @transform_3, window_bounds = array<i64: 16, 81>}]} {
    %c0 = arith.constant 0 : index
    %c0_0 = arith.constant 0 : index
    %0 = vector.load %arg1[%c0, %c0_0] : memref<16x48xbf16, #tpu.memory_space<vmem>>, vector<16x48xbf16>
    %c0_1 = arith.constant 0 : index
    %c0_2 = arith.constant 0 : index
    %1 = vector.load %arg2[%c0_1, %c0_2] : memref<48x81xbf16, #tpu.memory_space<vmem>>, vector<48x81xbf16>
    %cst = arith.constant dense<0.000000e+00> : vector<16x81xf32>
    %2 = tpu.matmul %0, %1, %cst {dimension_numbers = #tpu.dot_dimension_numbers<[1], [0], [0], [1], [0, 0, 1, 1], [], []>} : vector<16x48xbf16>, vector<48x81xbf16>, vector<16x81xf32> -> vector<16x81xf32>
    %c0_3 = arith.constant 0 : index
    %c0_4 = arith.constant 0 : index
    %3 = vector.load %arg3[%c0_3, %c0_4] : memref<16x1xf32, #tpu.memory_space<vmem>>, vector<16x1xf32>
    %4 = vector.broadcast %3 : vector<16x1xf32> to vector<16x81xf32>
    %5 = arith.addf %2, %4 : vector<16x81xf32>
    %cst_5 = arith.constant 0.000000e+00 : f32
    %6 = vector.broadcast %cst_5 : f32 to vector<16x81xf32>
    %7 = arith.maximumf %5, %6 : vector<16x81xf32>
    %c0_6 = arith.constant 0 : index
    %c0_7 = arith.constant 0 : index
    %8 = vector.load %arg4[%c0_6, %c0_7] : memref<16x81xf32, #tpu.memory_space<vmem>>, vector<16x81xf32>
    tpu.vector_store %arg4[%c0_6, %c0_7], %7 {strides = array<i32>} : memref<16x81xf32, #tpu.memory_space<vmem>>, vector<16x81xf32>,
    return
  }
  func.func @transform_0(%arg0: i32) -> (i32, i32) {
    %c0_i32 = arith.constant 0 : i32
    %c0_i32_0 = arith.constant 0 : i32
    %c0_i32_1 = arith.constant 0 : i32
    return %c0_i32, %c0_i32_0 : i32, i32
  }
  func.func @transform_1(%arg0: i32) -> (i32, i32) {
    %c0_i32 = arith.constant 0 : i32
    %c0_i32_0 = arith.constant 0 : i32
    return %c0_i32, %arg0 : i32, i32
  }
  func.func @transform_2(%arg0: i32) -> (i32, i32) {
    %c0_i32 = arith.constant 0 : i32
    %c0_i32_0 = arith.constant 0 : i32
    %c0_i32_1 = arith.constant 0 : i32
    return %c0_i32, %c0_i32_0 : i32, i32
  }
  func.func @transform_3(%arg0: i32) -> (i32, i32) {
    %c0_i32 = arith.constant 0 : i32
    %c0_i32_0 = arith.constant 0 : i32
    return %c0_i32, %arg0 : i32, i32
  }
}

module attributes {stable_mosaic.version = 11 : i64} {
  func.func @_conv_gemm_kernel(%arg0: i32, %arg1: memref<16x144xbf16, #tpu.memory_space<vmem>>, %arg2: memref<144x81xbf16, #tpu.memory_space<vmem>>, %arg3: memref<16x1xf32, #tpu.memory_space<vmem>>, %arg4: memref<16x81xf32, #tpu.memory_space<vmem>>) attributes {dimension_semantics = [#tpu.dimension_semantics<parallel>], iteration_bounds = array<i64: 1>, scalar_prefetch = 0 : i64, scratch_operands = 0 : i64, tpu.core_type = #tpu.core_type<tc>, window_params = [{pipeline_mode = #tpu.pipeline_mode<synchronous>, transform_indices = @transform_0, window_bounds = array<i64: 16, 144>}, {transform_indices = @transform_1, window_bounds = array<i64: 144, 81>}, {pipeline_mode = #tpu.pipeline_mode<synchronous>, transform_indices = @transform_2, window_bounds = array<i64: 16, 1>}, {transform_indices = @transform_3, window_bounds = array<i64: 16, 81>}]} {
    %c0 = arith.constant 0 : index
    %c0_0 = arith.constant 0 : index
    %0 = vector.load %arg1[%c0, %c0_0] : memref<16x144xbf16, #tpu.memory_space<vmem>>, vector<16x144xbf16>
    %c0_1 = arith.constant 0 : index
    %c0_2 = arith.constant 0 : index
    %1 = vector.load %arg2[%c0_1, %c0_2] : memref<144x81xbf16, #tpu.memory_space<vmem>>, vector<144x81xbf16>
    %cst = arith.constant dense<0.000000e+00> : vector<16x81xf32>
    %2 = tpu.matmul %0, %1, %cst {dimension_numbers = #tpu.dot_dimension_numbers<[1], [0], [0], [1], [0, 0, 1, 1], [], []>} : vector<16x144xbf16>, vector<144x81xbf16>, vector<16x81xf32> -> vector<16x81xf32>
    %c0_3 = arith.constant 0 : index
    %c0_4 = arith.constant 0 : index
    %3 = vector.load %arg3[%c0_3, %c0_4] : memref<16x1xf32, #tpu.memory_space<vmem>>, vector<16x1xf32>
    %4 = vector.broadcast %3 : vector<16x1xf32> to vector<16x81xf32>
    %5 = arith.addf %2, %4 : vector<16x81xf32>
    %cst_5 = arith.constant 0.000000e+00 : f32
    %6 = vector.broadcast %cst_5 : f32 to vector<16x81xf32>
    %7 = arith.maximumf %5, %6 : vector<16x81xf32>
    %c0_6 = arith.constant 0 : index
    %c0_7 = arith.constant 0 : index
    %8 = vector.load %arg4[%c0_6, %c0_7] : memref<16x81xf32, #tpu.memory_space<vmem>>, vector<16x81xf32>
    tpu.vector_store %arg4[%c0_6, %c0_7], %7 {strides = array<i32>} : memref<16x81xf32, #tpu.memory_space<vmem>>, vector<16x81xf32>,
    return
  }
  func.func @transform_0(%arg0: i32) -> (i32, i32) {
    %c0_i32 = arith.constant 0 : i32
    %c0_i32_0 = arith.constant 0 : i32
    %c0_i32_1 = arith.constant 0 : i32
    return %c0_i32, %c0_i32_0 : i32, i32
  }
  func.func @transform_1(%arg0: i32) -> (i32, i32) {
    %c0_i32 = arith.constant 0 : i32
    %c0_i32_0 = arith.constant 0 : i32
    return %c0_i32, %arg0 : i32, i32
  }
  func.func @transform_2(%arg0: i32) -> (i32, i32) {
    %c0_i32 = arith.constant 0 : i32
    %c0_i32_0 = arith.constant 0 : i32
    %c0_i32_1 = arith.constant 0 : i32
    return %c0_i32, %c0_i32_0 : i32, i32
  }
  func.func @transform_3(%arg0: i32) -> (i32, i32) {
    %c0_i32 = arith.constant 0 : i32
    %c0_i32_0 = arith.constant 0 : i32
    return %c0_i32, %arg0 : i32, i32
  }
}

module attributes {stable_mosaic.version = 11 : i64} {
  func.func @_conv_gemm2_kernel(%arg0: i32, %arg1: memref<16x144xbf16, #tpu.memory_space<vmem>>, %arg2: memref<144x81xbf16, #tpu.memory_space<vmem>>, %arg3: memref<16x1xf32, #tpu.memory_space<vmem>>, %arg4: memref<2x16xbf16, #tpu.memory_space<vmem>>, %arg5: memref<2x1xf32, #tpu.memory_space<vmem>>, %arg6: memref<2x81xf32, #tpu.memory_space<vmem>>) attributes {dimension_semantics = [#tpu.dimension_semantics<parallel>], iteration_bounds = array<i64: 1>, scalar_prefetch = 0 : i64, scratch_operands = 0 : i64, tpu.core_type = #tpu.core_type<tc>, window_params = [{pipeline_mode = #tpu.pipeline_mode<synchronous>, transform_indices = @transform_0, window_bounds = array<i64: 16, 144>}, {transform_indices = @transform_1, window_bounds = array<i64: 144, 81>}, {pipeline_mode = #tpu.pipeline_mode<synchronous>, transform_indices = @transform_2, window_bounds = array<i64: 16, 1>}, {pipeline_mode = #tpu.pipeline_mode<synchronous>, transform_indices = @transform_3, window_bounds = array<i64: 2, 16>}, {pipeline_mode = #tpu.pipeline_mode<synchronous>, transform_indices = @transform_4, window_bounds = array<i64: 2, 1>}, {transform_indices = @transform_5, window_bounds = array<i64: 2, 81>}]} {
    %c0 = arith.constant 0 : index
    %c0_0 = arith.constant 0 : index
    %0 = vector.load %arg1[%c0, %c0_0] : memref<16x144xbf16, #tpu.memory_space<vmem>>, vector<16x144xbf16>
    %c0_1 = arith.constant 0 : index
    %c0_2 = arith.constant 0 : index
    %1 = vector.load %arg2[%c0_1, %c0_2] : memref<144x81xbf16, #tpu.memory_space<vmem>>, vector<144x81xbf16>
    %cst = arith.constant dense<0.000000e+00> : vector<16x81xf32>
    %2 = tpu.matmul %0, %1, %cst {dimension_numbers = #tpu.dot_dimension_numbers<[1], [0], [0], [1], [0, 0, 1, 1], [], []>} : vector<16x144xbf16>, vector<144x81xbf16>, vector<16x81xf32> -> vector<16x81xf32>
    %c0_3 = arith.constant 0 : index
    %c0_4 = arith.constant 0 : index
    %3 = vector.load %arg3[%c0_3, %c0_4] : memref<16x1xf32, #tpu.memory_space<vmem>>, vector<16x1xf32>
    %4 = vector.broadcast %3 : vector<16x1xf32> to vector<16x81xf32>
    %5 = arith.addf %2, %4 : vector<16x81xf32>
    %cst_5 = arith.constant 0.000000e+00 : f32
    %6 = vector.broadcast %cst_5 : f32 to vector<16x81xf32>
    %7 = arith.maximumf %5, %6 : vector<16x81xf32>
    %c0_6 = arith.constant 0 : index
    %c0_7 = arith.constant 0 : index
    %8 = vector.load %arg4[%c0_6, %c0_7] : memref<2x16xbf16, #tpu.memory_space<vmem>>, vector<2x16xbf16>
    %9 = arith.truncf %7 : vector<16x81xf32> to vector<16x81xbf16>
    %cst_8 = arith.constant dense<0.000000e+00> : vector<2x81xf32>
    %10 = tpu.matmul %8, %9, %cst_8 {dimension_numbers = #tpu.dot_dimension_numbers<[1], [0], [0], [1], [0, 0, 1, 1], [], []>} : vector<2x16xbf16>, vector<16x81xbf16>, vector<2x81xf32> -> vector<2x81xf32>
    %c0_9 = arith.constant 0 : index
    %c0_10 = arith.constant 0 : index
    %11 = vector.load %arg5[%c0_9, %c0_10] : memref<2x1xf32, #tpu.memory_space<vmem>>, vector<2x1xf32>
    %12 = vector.broadcast %11 : vector<2x1xf32> to vector<2x81xf32>
    %13 = arith.addf %10, %12 : vector<2x81xf32>
    %c0_11 = arith.constant 0 : index
    %c0_12 = arith.constant 0 : index
    %14 = vector.load %arg6[%c0_11, %c0_12] : memref<2x81xf32, #tpu.memory_space<vmem>>, vector<2x81xf32>
    tpu.vector_store %arg6[%c0_11, %c0_12], %13 {strides = array<i32>} : memref<2x81xf32, #tpu.memory_space<vmem>>, vector<2x81xf32>,
    return
  }
  func.func @transform_0(%arg0: i32) -> (i32, i32) {
    %c0_i32 = arith.constant 0 : i32
    %c0_i32_0 = arith.constant 0 : i32
    %c0_i32_1 = arith.constant 0 : i32
    return %c0_i32, %c0_i32_0 : i32, i32
  }
  func.func @transform_1(%arg0: i32) -> (i32, i32) {
    %c0_i32 = arith.constant 0 : i32
    %c0_i32_0 = arith.constant 0 : i32
    return %c0_i32, %arg0 : i32, i32
  }
  func.func @transform_2(%arg0: i32) -> (i32, i32) {
    %c0_i32 = arith.constant 0 : i32
    %c0_i32_0 = arith.constant 0 : i32
    %c0_i32_1 = arith.constant 0 : i32
    return %c0_i32, %c0_i32_0 : i32, i32
  }
  func.func @transform_3(%arg0: i32) -> (i32, i32) {
    %c0_i32 = arith.constant 0 : i32
    %c0_i32_0 = arith.constant 0 : i32
    %c0_i32_1 = arith.constant 0 : i32
    return %c0_i32, %c0_i32_0 : i32, i32
  }
  func.func @transform_4(%arg0: i32) -> (i32, i32) {
    %c0_i32 = arith.constant 0 : i32
    %c0_i32_0 = arith.constant 0 : i32
    %c0_i32_1 = arith.constant 0 : i32
    return %c0_i32, %c0_i32_0 : i32, i32
  }
  func.func @transform_5(%arg0: i32) -> (i32, i32) {
    %c0_i32 = arith.constant 0 : i32
    %c0_i32_0 = arith.constant 0 : i32
    return %c0_i32, %arg0 : i32, i32
  }
}

</mosaic_0001>

<bundles_post_ra>
// kernel: pfenet_forward.29
= control target key start
LH: loop header
LB: loop body
LE: loop exit
PB: predicated region body
PF: predicated region fallthrough
CT: control target
= control target key end

     0   :  { %vm63_vm0 = vcmask 1044480   ;;  %vm64_vm1 = vcmask 1045504   ;;  %v200_v0 = vmov 0.0   ;;  %v201_v2 = vmov 65535   ;;  %s257_s1 = inlined_call_operand.vmem [shape: bf16[27,289], index: 1, kind: input, shape index: {}]   ;;  %s258_s2 = inlined_call_operand.vmem [shape: f32[8,1], index: 2, kind: input, shape index: {}]   ;;  %s259_s0 = inlined_call_operand.vmem [shape: bf16[8,27], index: 0, kind: input, shape index: {}]   ;;  %s260_s3 = inlined_call_operand.vmem [shape: f32[8,289], index: 3, kind: output, shape index: {}]  }
   0x1   :  { %179 = vmatprep.subr.bf16.mxu1 %v200_v0  ;;  %v192_v1 = vld [vmem:[%s257_s1 + $0x1c] ss:$12 sps:$4 sm:$0x3f]   ;;  %v65_v3 = vsel %vm63_vm0, 4294967295, %v201_v2  ;;  %vm202_vm2 = vmmov 0   ;;  %v203_v10 = vmov 0  }
   0x2   :  { %v66_v4 = vsel %vm64_vm1, %v65_v3, 0  ;;  %v194_v5 = vld [vmem:[%s257_s1 + $0x20] ss:$12 sps:$4 sm:$0x3f]   ;;  %183 = vmatprep.mubr.msk.bf16.mxu1 %vm202_vm2, %v200_v0  ;;  %v196_v9 = vld [vmem:[%s257_s1 + $0x4] ss:$12 sps:$4 sm:$0xff]   ;;  %108 = vmatprep.mubr.bf16.mxu0 %v203_v10 }
   0x3   :  { %v71_v6 = vand.u32 %v192_v1, %v66_v4  ;;  %v195_v7 = vld [vmem:[%s257_s1 + $0x18] ss:$12 sps:$4 sm:$0x3f]   ;;  %v74_v8 = vand.u32 %v194_v5, %v66_v4  ;;  %191 = vset.pattern.permute.xlu0 %v203_v10  ;;  %v198_v13 = vld [vmem:[%s257_s1 + $0x8] ss:$12 sps:$4 sm:$0xff]   ;;  %vm59_vm3 = vcmask 220160  }
   0x4   :  { %v68_v11 = vand.u32 %v195_v7, %v66_v4  ;;  %v24_v12 = vld [vmem:[%s258_s2] sm:$0xff]  ;;  %vm162_vm4 = vcmask 269312  }
   0x5   :  { %88 = vmatprep.subr.bf16.mxu0 %v71_v6  ;;  %180 = vmatpush3.bf16.msra.mxu1 %v74_v8  ;;  %v199_v14 = vld [vmem:[%s257_s1] ss:$12 sps:$4 sm:$0xff]  }
   0x6   :  { %27 = vperm.xlu0 %191, %v24_v12   ;;  %89 = vmatpush1.bf16.msra.mxu0 %v68_v11  ;;  %v15_v15 = vld [vmem:[%s259_s0] sm:$0xf] }
   0x7   :  { %181 = vmatprep.subr.bf16.mxu1 %v200_v0  ;;  %90 = vmatprep.subr.bf16.mxu0 %v196_v9 }
   0x9   :  { %182 = vmatpush3.bf16.msra.mxu1 %v198_v13 }
   0xa   :  { %91 = vmatpush1.bf16.msra.mxu0 %v199_v14 }
   0xc   :  { %184 = vmatmul.mubr.msk.bf16.vlgmr.msra.gmra.mxu1 %vm59_vm3, %v15_v15 }
   0xd   :  { %174 = vmatmul.mubr.msk.bf16.vlgmr.msra.gmra.mxu0 %vm59_vm3, %v15_v15 }
  0x81   :  { %v28_v16 = vpop.permute.xlu0 %27 }
  0xcc   :  { %v151_v17 = vpop.f32.mrf.mxu1 }
  0xcd   :  { %v152_v18 = vadd.f32 %v151_v17, %v28_v16  ;;  %v110_v19 = vpop.f32.mrf.mxu0 }
  0xce   :  { %v111_v20 = vadd.f32 %v110_v19, %v28_v16  ;;  %v185_v21 = vpop.f32.mrf.mxu1 }
  0xcf   :  { %v159_v22 = vmax.f32 %v152_v18, 0.0  ;;  %v112_v23 = vpop.f32.mrf.mxu0 }
  0xd0   :  { %v157_v24 = vmax.f32 %v111_v20, 0.0  ;;  %v113_v25 = vadd.f32 %v112_v23, %v28_v16  ;;  %v154_v26 = vpop.f32.mrf.mxu1 }
  0xd1   :  { %163 = vst.msk [vmem:[%s260_s3 + $0x10] sm:$0xff] %vm162_vm4, %v159_v22  ;;  %v114_v27 = vpop.f32.mrf.mxu0 }
  0xd2   :  { %160 = vst [vmem:[%s260_s3] sm:$0xff] %v157_v24  ;;  %v158_v28 = vmax.f32 %v113_v25, 0.0  ;;  %v186_v29 = vpop.f32.mrf.mxu1 }
  0xd3   :  { %v115_v30 = vpop.f32.mrf.mxu0 }
  0xd4   :  { %161 = vst [vmem:[%s260_s3 + $0x8] sm:$0xff] %v158_v28 }

// kernel: pfenet_forward.30
= control target key start
LH: loop header
LB: loop body
LE: loop exit
PB: predicated region body
PF: predicated region fallthrough
CT: control target
= control target key end

     0   :  { %vm116_vm0 = vcmask 1043456   ;;  %v279_v1 = vmov 0.0   ;;  %v280_v3 = vmov 0   ;;  %vm281_vm1 = vmmov 0   ;;  %s359_s1 = inlined_call_operand.vmem [shape: bf16[72,289], index: 1, kind: input, shape index: {}]   ;;  %s360_s2 = inlined_call_operand.vmem [shape: f32[8,1], index: 2, kind: input, shape index: {}]   ;;  %s361_s0 = inlined_call_operand.vmem [shape: bf16[8,72], index: 0, kind: input, shape index: {}]   ;;  %s362_s3 = inlined_call_operand.vmem [shape: f32[8,289], index: 3, kind: output, shape index: {}]  }
   0x1   :  { %v32_v0 = vld [vmem:[%s359_s1 + $0x60] sm:$0xff]  ;;  %242 = vmatprep.subr.bf16.mxu1 %v279_v1  ;;  %v262_v2 = vld [vmem:[%s359_s1 + $0x68] ss:$0 sps:$4 sm:$0xff]   ;;  %158 = vmatprep.mubr.bf16.mxu0 %v280_v3  ;;  %v263_v6 = vld [vmem:[%s359_s1 + $0x4c] ss:$12 sps:$4 sm:$0xff]   ;;  %vm112_vm2 = vcmask 588800  }
   0x2   :  { %v231_v4 = vcombine.high %v32_v0, %v32_v0  ;;  %v230_v5 = vcombine.low %v32_v0, %v32_v0  ;;  %252 = vmatprep.mubr.msk.bf16.mxu1 %vm281_vm1, %v279_v1  ;;  %259 = vset.pattern.permute.xlu0 %v280_v3  ;;  %v124_v7 = vsel %vm116_vm0, %v262_v2, 0  ;;  %v266_v9 = vld [vmem:[%s359_s1 + $0x50] ss:$12 sps:$4 sm:$0xff]   ;;  %v265_v10 = vld [vmem:[%s359_s1 + $0x48] ss:$12 sps:$4 sm:$0xff]   ;;  %v34_v15 = vld [vmem:[%s360_s2] sm:$0xff] }
   0x3   :  { %243 = vmatpush3.bf16.msra.mxu1 %v124_v7  ;;  %v267_v11 = vld [vmem:[%s359_s1 + $0x34] ss:$12 sps:$4 sm:$0xff]   ;;  %v270_v12 = vld [vmem:[%s359_s1 + $0x38] ss:$12 sps:$4 sm:$0xff]   ;;  %v269_v13 = vld [vmem:[%s359_s1 + $0x30] ss:$12 sps:$4 sm:$0xff]   ;;  %37 = vperm.xlu0 %259, %v34_v15  }
   0x4   :  { %233 = vmatprep.subr.msk.bf16.mxu0 %vm116_vm0, %v231_v4  ;;  %v118_v8 = vsel %vm116_vm0, %v230_v5, 0  ;;  %244 = vmatprep.subr.bf16.mxu1 %v279_v1  ;;  %v271_v14 = vld [vmem:[%s359_s1 + $0x1c] ss:$12 sps:$4 sm:$0xff]   ;;  %v274_v16 = vld [vmem:[%s359_s1 + $0x20] ss:$12 sps:$4 sm:$0xff]   ;;  %vm212_vm3 = vcmask 269312  }
   0x5   :  { %133 = vmatpush1.bf16.msra.mxu0 %v118_v8  ;;  %v273_v17 = vld [vmem:[%s359_s1 + $0x18] ss:$12 sps:$4 sm:$0xff]   ;;  %v278_v19 = vld [vmem:[%s359_s1 + $0x8] ss:$12 sps:$4 sm:$0xff]   ;;  %v277_v20 = vld [vmem:[%s359_s1] ss:$12 sps:$4 sm:$0xff]  }
   0x6   :  { %134 = vmatprep.subr.bf16.mxu0 %v263_v6  ;;  %v275_v18 = vld [vmem:[%s359_s1 + $0x4] ss:$12 sps:$4 sm:$0xff]   ;;  %v15_v21 = vld [vmem:[%s361_s0] sm:$0xf] }
   0x7   :  { %245 = vmatpush3.bf16.msra.mxu1 %v266_v9 }
   0x8   :  { %246 = vmatprep.subr.bf16.mxu1 %v279_v1 }
   0x9   :  { %135 = vmatpush1.bf16.msra.mxu0 %v265_v10 }
   0xa   :  { %136 = vmatprep.subr.bf16.mxu0 %v267_v11 }
   0xb   :  { %247 = vmatpush3.bf16.msra.mxu1 %v270_v12 }
   0xc   :  { %248 = vmatprep.subr.bf16.mxu1 %v279_v1 }
   0xd   :  { %137 = vmatpush1.bf16.msra.mxu0 %v269_v13 }
   0xe   :  { %138 = vmatprep.subr.bf16.mxu0 %v271_v14 }
   0xf   :  { %249 = vmatpush3.bf16.msra.mxu1 %v274_v16 }
  0x10   :  { %250 = vmatprep.subr.bf16.mxu1 %v279_v1 }
  0x11   :  { %139 = vmatpush1.bf16.msra.mxu0 %v273_v17 }
  0x12   :  { %140 = vmatprep.subr.bf16.mxu0 %v275_v18 }
  0x13   :  { %251 = vmatpush3.bf16.msra.mxu1 %v278_v19 }
  0x15   :  { %141 = vmatpush1.bf16.msra.mxu0 %v277_v20 }
  0x16   :  { %253 = vmatmul.mubr.msk.bf16.vlgmr.msra.gmra.mxu1 %vm112_vm2, %v15_v21 }
  0x18   :  { %234 = vmatmul.mubr.msk.bf16.vlgmr.msra.gmra.mxu0 %vm112_vm2, %v15_v21 }
  0x7e   :  { %v38_v22 = vpop.permute.xlu0 %37 }
  0xd6   :  { %v201_v23 = vpop.f32.mrf.mxu1 }
  0xd7   :  { %v202_v25 = vadd.f32 %v201_v23, %v38_v22 }
  0xd8   :  { %v160_v24 = vpop.f32.mrf.mxu0  ;;  %v254_v27 = vpop.f32.mrf.mxu1 }
  0xd9   :  { %v161_v26 = vadd.f32 %v160_v24, %v38_v22  ;;  %v209_v28 = vmax.f32 %v202_v25, 0.0 }
  0xda   :  { %v162_v29 = vpop.f32.mrf.mxu0  ;;  %v204_v32 = vpop.f32.mrf.mxu1 }
  0xdb   :  { %v207_v30 = vmax.f32 %v161_v26, 0.0  ;;  %v163_v31 = vadd.f32 %v162_v29, %v38_v22  ;;  %213 = vst.msk [vmem:[%s362_s3 + $0x10] sm:$0xff] %vm212_vm3, %v209_v28 }
  0xdc   :  { %v164_v33 = vpop.f32.mrf.mxu0  ;;  %v255_v35 = vpop.f32.mrf.mxu1 }
  0xdd   :  { %210 = vst [vmem:[%s362_s3] sm:$0xff] %v207_v30  ;;  %v208_v34 = vmax.f32 %v163_v31, 0.0 }
  0xde   :  { %v165_v36 = vpop.f32.mrf.mxu0 }
  0xdf   :  { %211 = vst [vmem:[%s362_s3 + $0x8] sm:$0xff] %v208_v34 }

// kernel: pfenet_forward.31
= control target key start
LH: loop header
LB: loop body
LE: loop exit
PB: predicated region body
PF: predicated region fallthrough
CT: control target
= control target key end

     0   :  { %vm74_vm0 = vcmask 1043456   ;;  %v165_v0 = vmov 0.0   ;;  %vm166_vm1 = vmmov 0   ;;  %v167_v3 = vmov 0   ;;  %s218_s1 = inlined_call_operand.vmem [shape: bf16[72,81], index: 1, kind: input, shape index: {}]   ;;  %s219_s2 = inlined_call_operand.vmem [shape: f32[16,1], index: 2, kind: input, shape index: {}]   ;;  %s220_s0 = inlined_call_operand.vmem [shape: bf16[16,72], index: 0, kind: input, shape index: {}]   ;;  %s221_s3 = inlined_call_operand.vmem [shape: f32[16,81], index: 3, kind: output, shape index: {}]  }
   0x1   :  { %141 = vmatprep.subr.bf16.mxu0 %v165_v0  ;;  %v159_v1 = vld [vmem:[%s218_s1 + $0x20] ss:$0 sps:$4 sm:$0xff]   ;;  %151 = vmatprep.mubr.msk.bf16.mxu0 %vm166_vm1, %v165_v0  ;;  %v160_v4 = vld [vmem:[%s218_s1 + $0x18] sm:$0xff]   ;;  %v161_v6 = vld [vmem:[%s218_s1 + $0x10] sm:$0xff]   ;;  %vm70_vm2 = vcmask 588800   ;;  %vm121_vm3 = vcmask 662528  }
   0x2   :  { %v76_v2 = vsel %vm74_vm0, %v159_v1, 0  ;;  %158 = vset.pattern.permute.xlu0 %v167_v3  ;;  %v26_v5 = vld [vmem:[%s219_s2] sm:$0xff]  ;;  %v27_v7 = vld [vmem:[%s219_s2 + $0x8] sm:$0xff] }
   0x3   :  { %142 = vmatpush3.bf16.msra.mxu0 %v76_v2  ;;  %30 = vperm.xlu0 %158, %v26_v5   ;;  %v162_v8 = vld [vmem:[%s218_s1 + $0x8] sm:$0xff]   ;;  %v163_v9 = vld [vmem:[%s218_s1] sm:$0xff]  }
   0x4   :  { %143 = vmatprep.subr.bf16.mxu0 %v165_v0  ;;  %v164_v10 = vld [vmem:[%s220_s0] sm:$0xff]  }
   0x7   :  { %144 = vmatpush3.bf16.msra.mxu0 %v160_v4  ;;  %35 = vperm.xlu0 %158, %v27_v7  }
   0x8   :  { %145 = vmatprep.subr.bf16.mxu0 %v165_v0 }
   0xb   :  { %146 = vmatpush3.bf16.msra.mxu0 %v161_v6 }
   0xc   :  { %147 = vmatprep.subr.bf16.mxu0 %v165_v0 }
   0xf   :  { %148 = vmatpush3.bf16.msra.mxu0 %v162_v8 }
  0x10   :  { %149 = vmatprep.subr.bf16.mxu0 %v165_v0 }
  0x13   :  { %150 = vmatpush3.bf16.msra.mxu0 %v163_v9 }
  0x16   :  { %152 = vmatmul.mubr.msk.bf16.vlgmr.msra.gmra.mxu0 %vm70_vm2, %v164_v10 }
  0x7e   :  { %v31_v11 = vpop.permute.xlu0 %30 }
  0x82   :  { %v36_v16 = vpop.permute.xlu0 %35 }
  0xd6   :  { %v112_v12 = vpop.f32.mrf.mxu0 }
  0xd7   :  { %v113_v13 = vadd.f32 %v112_v12, %v31_v11 }
  0xd8   :  { %v153_v14 = vpop.f32.mrf.mxu0 }
  0xd9   :  { %v119_v15 = vmax.f32 %v113_v13, 0.0 }
  0xda   :  { %v115_v17 = vpop.f32.mrf.mxu0 }
  0xdb   :  { %122 = vst.msk [vmem:[%s221_s3] sm:$0xff] %vm121_vm3, %v119_v15  ;;  %v116_v18 = vadd.f32 %v115_v17, %v36_v16 }
  0xdc   :  { %v154_v19 = vpop.f32.mrf.mxu0 }
  0xdd   :  { %v120_v20 = vmax.f32 %v116_v18, 0.0 }
  0xdf   :  { %123 = vst.msk [vmem:[%s221_s3 + $0x8] sm:$0xff] %vm121_vm3, %v120_v20 }

// kernel: pfenet_forward.32
= control target key start
LH: loop header
LB: loop body
LE: loop exit
PB: predicated region body
PF: predicated region fallthrough
CT: control target
= control target key end

     0   :  { %v239_v0 = vmov 0   ;;  %vm123_vm0 = vcmask 130048   ;;  %vm181_vm1 = vcmask 662528   ;;  %s314_s1 = inlined_call_operand.vmem [shape: bf16[144,81], index: 1, kind: input, shape index: {}]   ;;  %s315_s0 = inlined_call_operand.vmem [shape: bf16[24,144], index: 0, kind: input, shape index: {}]   ;;  %s316_s2 = inlined_call_operand.vmem [shape: f32[24,1], index: 2, kind: input, shape index: {}]   ;;  %s317_s3 = inlined_call_operand.vmem [shape: f32[24,81], index: 3, kind: output, shape index: {}]  }
   0x1   :  { %130 = vmatprep.subr.bf16.mxu0 %v239_v0  ;;  %204 = vmatprep.subr.bf16.mxu1 %v239_v0  ;;  %v225_v1 = vld [vmem:[%s314_s1 + $0x38] sm:$0xff]   ;;  %v226_v2 = vld [vmem:[%s314_s1 + $0x30] sm:$0xff]   ;;  %v227_v3 = vld [vmem:[%s314_s1 + $0x28] sm:$0xff]  }
   0x2   :  { %223 = vset.pattern.permute.xlu0 %v239_v0  ;;  %224 = vset.pattern.permute.xlu1 %v239_v0  ;;  %v228_v4 = vld [vmem:[%s314_s1 + $0x20] sm:$0xff]   ;;  %v17_v6 = vld [vmem:[%s315_s0 + $0x10] sm:$0xff]  ;;  %v37_v10 = vld [vmem:[%s316_s2 + $0x8] sm:$0xff] }
   0x3   :  { %131 = vmatpush1.bf16.msra.mxu0 %v225_v1  ;;  %213 = vmatpush1.bf16.msra.mxu1 %v225_v1  ;;  %v236_v5 = vld [vmem:[%s315_s0 + $0x4] ss:$8 sps:$4 sm:$0xff]   ;;  %v192_v8 = vcombine.high %v17_v6, %v17_v6  ;;  %v38_v9 = vld [vmem:[%s316_s2 + $0x10] sm:$0xff]  ;;  %v229_v11 = vld [vmem:[%s314_s1 + $0x18] sm:$0xff]   ;;  %v191_v17 = vcombine.low %v17_v6, %v17_v6 }
   0x4   :  { %132 = vmatprep.subr.bf16.mxu0 %v239_v0  ;;  %205 = vmatprep.subr.bf16.mxu1 %v239_v0  ;;  %v36_v7 = vld [vmem:[%s316_s2] sm:$0xff]  ;;  %v230_v12 = vld [vmem:[%s314_s1 + $0x10] sm:$0xff]   ;;  %v231_v13 = vld [vmem:[%s314_s1 + $0x8] sm:$0xff]  }
   0x5   :  { %202 = vmatprep.mubr.msk.bf16.mxu0 %vm123_vm0, %v236_v5  ;;  %41 = vperm.xlu0 %223, %v36_v7   ;;  %v232_v14 = vld [vmem:[%s314_s1] sm:$0xff]  }
   0x6   :  { %203 = vmatprep.mubr.msk.bf16.mxu1 %vm123_vm0, %v192_v8  ;;  %51 = vperm.xlu1 %224, %v38_v9   ;;  %v233_v15 = vld [vmem:[%s314_s1 + $0x40] sm:$0xff]  }
   0x7   :  { %133 = vmatpush1.bf16.msra.mxu0 %v226_v2  ;;  %214 = vmatpush1.bf16.msra.mxu1 %v226_v2  ;;  %v234_v16 = vld [vmem:[%s315_s0] ss:$8 sps:$4 sm:$0xff]  }
   0x8   :  { %134 = vmatprep.subr.bf16.mxu0 %v239_v0  ;;  %206 = vmatprep.subr.bf16.mxu1 %v239_v0 }
   0x9   :  { %46 = vperm.xlu0 %223, %v37_v10  }
   0xb   :  { %135 = vmatpush1.bf16.msra.mxu0 %v227_v3  ;;  %215 = vmatpush1.bf16.msra.mxu1 %v227_v3 }
   0xc   :  { %136 = vmatprep.subr.bf16.mxu0 %v239_v0  ;;  %207 = vmatprep.subr.bf16.mxu1 %v239_v0 }
   0xf   :  { %137 = vmatpush1.bf16.msra.mxu0 %v228_v4  ;;  %216 = vmatpush1.bf16.msra.mxu1 %v228_v4 }
  0x10   :  { %138 = vmatprep.subr.bf16.mxu0 %v239_v0  ;;  %208 = vmatprep.subr.bf16.mxu1 %v239_v0 }
  0x13   :  { %139 = vmatpush1.bf16.msra.mxu0 %v229_v11  ;;  %217 = vmatpush1.bf16.msra.mxu1 %v229_v11 }
  0x14   :  { %140 = vmatprep.subr.bf16.mxu0 %v239_v0  ;;  %209 = vmatprep.subr.bf16.mxu1 %v239_v0 }
  0x17   :  { %141 = vmatpush1.bf16.msra.mxu0 %v230_v12  ;;  %218 = vmatpush1.bf16.msra.mxu1 %v230_v12 }
  0x18   :  { %142 = vmatprep.subr.bf16.mxu0 %v239_v0  ;;  %210 = vmatprep.subr.bf16.mxu1 %v239_v0 }
  0x1b   :  { %143 = vmatpush1.bf16.msra.mxu0 %v231_v13  ;;  %219 = vmatpush1.bf16.msra.mxu1 %v231_v13 }
  0x1c   :  { %144 = vmatprep.subr.bf16.mxu0 %v239_v0  ;;  %211 = vmatprep.subr.bf16.mxu1 %v239_v0 }
  0x1f   :  { %145 = vmatpush1.bf16.msra.mxu0 %v232_v14  ;;  %220 = vmatpush1.bf16.msra.mxu1 %v232_v14 }
  0x20   :  { %160 = vmatprep.subr.bf16.mxu0 %v239_v0  ;;  %212 = vmatprep.subr.bf16.mxu1 %v239_v0 }
  0x23   :  { %161 = vmatpush2.bf16.msra.mxu0 %v233_v15  ;;  %221 = vmatpush2.bf16.msra.mxu1 %v233_v15 }
  0x26   :  { %163 = vmatmul.mubr.bf16.vlgmr.msra.gmra.mxu0 %v234_v16  ;;  %171 = vmatmul.mubr.bf16.vlgmr.msra.gmra.mxu1 %v191_v17 }
  0x80   :  { %v42_v18 = vpop.permute.xlu0 %41 }
  0x81   :  { %v52_v19 = vpop.permute.xlu1 %51 }
  0x84   :  { %v47_v26 = vpop.permute.xlu0 %46 }
  0xe6   :  { %v164_v20 = vpop.f32.mrf.mxu0  ;;  %v172_v21 = vpop.f32.mrf.mxu1 }
  0xe7   :  { %v165_v22 = vadd.f32 %v164_v20, %v42_v18  ;;  %v173_v23 = vadd.f32 %v172_v21, %v52_v19 }
  0xe8   :  { %v166_v24 = vpop.f32.mrf.mxu0  ;;  %v174_v25 = vpop.f32.mrf.mxu1 }
  0xe9   :  { %v178_v27 = vmax.f32 %v165_v22, 0.0  ;;  %v180_v28 = vmax.f32 %v173_v23, 0.0 }
  0xea   :  { %v167_v29 = vpop.f32.mrf.mxu0  ;;  %v175_v30 = vpop.f32.mrf.mxu1 }
  0xeb   :  { %182 = vst.msk [vmem:[%s317_s3] sm:$0xff] %vm181_vm1, %v178_v27  ;;  %184 = vst.msk [vmem:[%s317_s3 + $0x10] sm:$0xff] %vm181_vm1, %v180_v28  ;;  %v168_v31 = vadd.f32 %v167_v29, %v47_v26 }
  0xec   :  { %v169_v32 = vpop.f32.mrf.mxu0  ;;  %v176_v33 = vpop.f32.mrf.mxu1 }
  0xed   :  { %v179_v34 = vmax.f32 %v168_v31, 0.0 }
  0xef   :  { %183 = vst.msk [vmem:[%s317_s3 + $0x8] sm:$0xff] %vm181_vm1, %v179_v34 }

// kernel: pfenet_forward.34
= control target key start
LH: loop header
LB: loop body
LE: loop exit
PB: predicated region body
PF: predicated region fallthrough
CT: control target
= control target key end

     0   :  { %vm58_vm0 = vcmask 1043456   ;;  %v139_v0 = vmov 0.0   ;;  %vm140_vm1 = vmmov 0   ;;  %v141_v3 = vmov 0   ;;  %s186_s1 = inlined_call_operand.vmem [shape: bf16[40,81], index: 1, kind: input, shape index: {}]   ;;  %s187_s2 = inlined_call_operand.vmem [shape: f32[16,1], index: 2, kind: input, shape index: {}]   ;;  %s188_s0 = inlined_call_operand.vmem [shape: bf16[16,40], index: 0, kind: input, shape index: {}]   ;;  %s189_s3 = inlined_call_operand.vmem [shape: f32[16,81], index: 3, kind: output, shape index: {}]  }
   0x1   :  { %121 = vmatprep.subr.bf16.mxu0 %v139_v0  ;;  %v135_v1 = vld [vmem:[%s186_s1 + $0x10] ss:$0 sps:$4 sm:$0xff]   ;;  %127 = vmatprep.mubr.msk.bf16.mxu0 %vm140_vm1, %v139_v0  ;;  %v136_v4 = vld [vmem:[%s186_s1 + $0x8] sm:$0xff]   ;;  %v22_v5 = vld [vmem:[%s187_s2] sm:$0xff]  ;;  %vm54_vm2 = vcmask 326656   ;;  %vm105_vm3 = vcmask 662528  }
   0x2   :  { %v60_v2 = vsel %vm58_vm0, %v135_v1, 0  ;;  %134 = vset.pattern.permute.xlu0 %v141_v3  ;;  %v23_v6 = vld [vmem:[%s187_s2 + $0x8] sm:$0xff]  ;;  %v137_v7 = vld [vmem:[%s186_s1] sm:$0xff]  }
   0x3   :  { %122 = vmatpush3.bf16.msra.mxu0 %v60_v2  ;;  %26 = vperm.xlu0 %134, %v22_v5   ;;  %v138_v8 = vld [vmem:[%s188_s0] sm:$0xff]  }
   0x4   :  { %123 = vmatprep.subr.bf16.mxu0 %v139_v0 }
   0x7   :  { %124 = vmatpush3.bf16.msra.mxu0 %v136_v4  ;;  %31 = vperm.xlu0 %134, %v23_v6  }
   0x8   :  { %125 = vmatprep.subr.bf16.mxu0 %v139_v0 }
   0xb   :  { %126 = vmatpush3.bf16.msra.mxu0 %v137_v7 }
   0xe   :  { %128 = vmatmul.mubr.msk.bf16.vlgmr.msra.gmra.mxu0 %vm54_vm2, %v138_v8 }
  0x7e   :  { %v27_v9 = vpop.permute.xlu0 %26 }
  0x82   :  { %v32_v14 = vpop.permute.xlu0 %31 }
  0xce   :  { %v96_v10 = vpop.f32.mrf.mxu0 }
  0xcf   :  { %v97_v11 = vadd.f32 %v96_v10, %v27_v9 }
  0xd0   :  { %v129_v12 = vpop.f32.mrf.mxu0 }
  0xd1   :  { %v103_v13 = vmax.f32 %v97_v11, 0.0 }
  0xd2   :  { %v99_v15 = vpop.f32.mrf.mxu0 }
  0xd3   :  { %106 = vst.msk [vmem:[%s189_s3] sm:$0xff] %vm105_vm3, %v103_v13  ;;  %v100_v16 = vadd.f32 %v99_v15, %v32_v14 }
  0xd4   :  { %v130_v17 = vpop.f32.mrf.mxu0 }
  0xd5   :  { %v104_v18 = vmax.f32 %v100_v16, 0.0 }
  0xd7   :  { %107 = vst.msk [vmem:[%s189_s3 + $0x8] sm:$0xff] %vm105_vm3, %v104_v18 }

// kernel: pfenet_forward.33
= control target key start
LH: loop header
LB: loop body
LE: loop exit
PB: predicated region body
PF: predicated region fallthrough
CT: control target
= control target key end

     0   :  { %v313_v0 = vmov 0   ;;  %vm169_vm0 = vcmask 719872   ;;  %vm176_vm1 = vcmask 1043456   ;;  %vm233_vm2 = vcmask 662528   ;;  %s448_s1 = inlined_call_operand.vmem [shape: bf16[216,81], index: 1, kind: input, shape index: {}]   ;;  %s449_s0 = inlined_call_operand.vmem [shape: bf16[32,216], index: 0, kind: input, shape index: {}]   ;;  %s450_s2 = inlined_call_operand.vmem [shape: f32[32,1], index: 2, kind: input, shape index: {}]   ;;  %s451_s3 = inlined_call_operand.vmem [shape: f32[32,81], index: 3, kind: output, shape index: {}]  }
   0x1   :  { %180 = vmatprep.subr.bf16.mxu0 %v313_v0  ;;  %262 = vmatprep.subr.bf16.mxu1 %v313_v0  ;;  %v293_v1 = vld [vmem:[%s448_s1 + $0x38] sm:$0xff]   ;;  %v294_v2 = vld [vmem:[%s448_s1 + $0x30] sm:$0xff]   ;;  %v295_v3 = vld [vmem:[%s448_s1 + $0x28] sm:$0xff]  }
   0x2   :  { %292 = vset.pattern.permute.xlu1 %v313_v0  ;;  %291 = vset.pattern.permute.xlu0 %v313_v0  ;;  %v296_v4 = vld [vmem:[%s448_s1 + $0x20] sm:$0xff]   ;;  %v297_v5 = vld [vmem:[%s448_s1 + $0x18] sm:$0xff]   ;;  %v48_v8 = vld [vmem:[%s450_s2 + $0x10] sm:$0xff] }
   0x3   :  { %181 = vmatpush1.bf16.msra.mxu0 %v293_v1  ;;  %276 = vmatpush1.bf16.msra.mxu1 %v293_v1  ;;  %v309_v6 = vld [vmem:[%s449_s0 + $0x4] ss:$8 sps:$4 sm:$0xff]   ;;  %v312_v7 = vld [vmem:[%s449_s0 + $0x14] ss:$8 sps:$4 sm:$0xff]   ;;  %v301_v15 = vld [vmem:[%s448_s1 + $0x68] ss:$0 sps:$4 sm:$0xff]  }
   0x4   :  { %182 = vmatprep.subr.bf16.mxu0 %v313_v0  ;;  %263 = vmatprep.subr.bf16.mxu1 %v313_v0  ;;  %v46_v9 = vld [vmem:[%s450_s2] sm:$0xff]  ;;  %v298_v10 = vld [vmem:[%s448_s1 + $0x10] sm:$0xff]   ;;  %v49_v11 = vld [vmem:[%s450_s2 + $0x18] sm:$0xff]  ;;  %v178_v16 = vsel %vm176_vm1, %v301_v15, 0 }
   0x5   :  { %260 = vmatprep.mubr.msk.bf16.mxu0 %vm169_vm0, %v309_v6  ;;  %62 = vperm.xlu1 %292, %v48_v8   ;;  %v47_v12 = vld [vmem:[%s450_s2 + $0x8] sm:$0xff]  ;;  %v300_v14 = vld [vmem:[%s448_s1] sm:$0xff]   ;;  %v303_v18 = vld [vmem:[%s448_s1 + $0x58] sm:$0xff]  }
   0x6   :  { %52 = vperm.xlu0 %291, %v46_v9   ;;  %261 = vmatprep.mubr.msk.bf16.mxu1 %vm169_vm0, %v312_v7  ;;  %v299_v13 = vld [vmem:[%s448_s1 + $0x8] sm:$0xff]   ;;  %v302_v17 = vld [vmem:[%s448_s1 + $0x60] sm:$0xff]   ;;  %v304_v19 = vld [vmem:[%s448_s1 + $0x50] sm:$0xff]  }
   0x7   :  { %183 = vmatpush1.bf16.msra.mxu0 %v294_v2  ;;  %277 = vmatpush1.bf16.msra.mxu1 %v294_v2  ;;  %v305_v20 = vld [vmem:[%s448_s1 + $0x48] sm:$0xff]   ;;  %v306_v21 = vld [vmem:[%s448_s1 + $0x40] sm:$0xff]   ;;  %v310_v23 = vld [vmem:[%s449_s0 + $0x10] ss:$8 sps:$4 sm:$0xff]  }
   0x8   :  { %184 = vmatprep.subr.bf16.mxu0 %v313_v0  ;;  %264 = vmatprep.subr.bf16.mxu1 %v313_v0  ;;  %v307_v22 = vld [vmem:[%s449_s0] ss:$8 sps:$4 sm:$0xff]  }
   0x9   :  { %67 = vperm.xlu1 %292, %v49_v11  }
   0xa   :  { %57 = vperm.xlu0 %291, %v47_v12  }
   0xb   :  { %185 = vmatpush1.bf16.msra.mxu0 %v295_v3  ;;  %278 = vmatpush1.bf16.msra.mxu1 %v295_v3 }
   0xc   :  { %186 = vmatprep.subr.bf16.mxu0 %v313_v0  ;;  %265 = vmatprep.subr.bf16.mxu1 %v313_v0 }
   0xf   :  { %187 = vmatpush1.bf16.msra.mxu0 %v296_v4  ;;  %279 = vmatpush1.bf16.msra.mxu1 %v296_v4 }
  0x10   :  { %188 = vmatprep.subr.bf16.mxu0 %v313_v0  ;;  %266 = vmatprep.subr.bf16.mxu1 %v313_v0 }
  0x13   :  { %189 = vmatpush1.bf16.msra.mxu0 %v297_v5  ;;  %280 = vmatpush1.bf16.msra.mxu1 %v297_v5 }
  0x14   :  { %190 = vmatprep.subr.bf16.mxu0 %v313_v0  ;;  %267 = vmatprep.subr.bf16.mxu1 %v313_v0 }
  0x17   :  { %191 = vmatpush1.bf16.msra.mxu0 %v298_v10  ;;  %281 = vmatpush1.bf16.msra.mxu1 %v298_v10 }
  0x18   :  { %192 = vmatprep.subr.bf16.mxu0 %v313_v0  ;;  %268 = vmatprep.subr.bf16.mxu1 %v313_v0 }
  0x1b   :  { %193 = vmatpush1.bf16.msra.mxu0 %v299_v13  ;;  %282 = vmatpush1.bf16.msra.mxu1 %v299_v13 }
  0x1c   :  { %194 = vmatprep.subr.bf16.mxu0 %v313_v0  ;;  %269 = vmatprep.subr.bf16.mxu1 %v313_v0 }
  0x1f   :  { %195 = vmatpush1.bf16.msra.mxu0 %v300_v14  ;;  %283 = vmatpush1.bf16.msra.mxu1 %v300_v14 }
  0x20   :  { %200 = vmatprep.subr.bf16.mxu0 %v313_v0  ;;  %270 = vmatprep.subr.bf16.mxu1 %v313_v0 }
  0x23   :  { %201 = vmatpush2.bf16.msra.mxu0 %v178_v16  ;;  %284 = vmatpush2.bf16.msra.mxu1 %v178_v16 }
  0x24   :  { %202 = vmatprep.subr.bf16.mxu0 %v313_v0  ;;  %271 = vmatprep.subr.bf16.mxu1 %v313_v0 }
  0x27   :  { %203 = vmatpush2.bf16.msra.mxu0 %v302_v17  ;;  %285 = vmatpush2.bf16.msra.mxu1 %v302_v17 }
  0x28   :  { %204 = vmatprep.subr.bf16.mxu0 %v313_v0  ;;  %272 = vmatprep.subr.bf16.mxu1 %v313_v0 }
  0x2b   :  { %205 = vmatpush2.bf16.msra.mxu0 %v303_v18  ;;  %286 = vmatpush2.bf16.msra.mxu1 %v303_v18 }
  0x2c   :  { %206 = vmatprep.subr.bf16.mxu0 %v313_v0  ;;  %273 = vmatprep.subr.bf16.mxu1 %v313_v0 }
  0x2f   :  { %207 = vmatpush2.bf16.msra.mxu0 %v304_v19  ;;  %287 = vmatpush2.bf16.msra.mxu1 %v304_v19 }
  0x30   :  { %208 = vmatprep.subr.bf16.mxu0 %v313_v0  ;;  %274 = vmatprep.subr.bf16.mxu1 %v313_v0 }
  0x33   :  { %209 = vmatpush2.bf16.msra.mxu0 %v305_v20  ;;  %288 = vmatpush2.bf16.msra.mxu1 %v305_v20 }
  0x34   :  { %210 = vmatprep.subr.bf16.mxu0 %v313_v0  ;;  %275 = vmatprep.subr.bf16.mxu1 %v313_v0 }
  0x37   :  { %211 = vmatpush2.bf16.msra.mxu0 %v306_v21  ;;  %289 = vmatpush2.bf16.msra.mxu1 %v306_v21 }
  0x3a   :  { %213 = vmatmul.mubr.bf16.vlgmr.msra.gmra.mxu0 %v307_v22  ;;  %221 = vmatmul.mubr.bf16.vlgmr.msra.gmra.mxu1 %v310_v23 }
  0x80   :  { %v63_v24 = vpop.permute.xlu1 %62 }
  0x81   :  { %v53_v25 = vpop.permute.xlu0 %52 }
  0x84   :  { %v68_v32 = vpop.permute.xlu1 %67 }
  0x85   :  { %v58_v33 = vpop.permute.xlu0 %57 }
  0xfa   :  { %v214_v26 = vpop.f32.mrf.mxu0  ;;  %v222_v27 = vpop.f32.mrf.mxu1 }
  0xfb   :  { %v215_v28 = vadd.f32 %v214_v26, %v53_v25  ;;  %v223_v29 = vadd.f32 %v222_v27, %v63_v24 }
  0xfc   :  { %v216_v30 = vpop.f32.mrf.mxu0  ;;  %v224_v31 = vpop.f32.mrf.mxu1 }
  0xfd   :  { %v229_v34 = vmax.f32 %v215_v28, 0.0  ;;  %v231_v35 = vmax.f32 %v223_v29, 0.0 }
  0xfe   :  { %v217_v36 = vpop.f32.mrf.mxu0  ;;  %v225_v37 = vpop.f32.mrf.mxu1 }
  0xff   :  { %234 = vst.msk [vmem:[%s451_s3] sm:$0xff] %vm233_vm2, %v229_v34  ;;  %236 = vst.msk [vmem:[%s451_s3 + $0x10] sm:$0xff] %vm233_vm2, %v231_v35  ;;  %v218_v38 = vadd.f32 %v217_v36, %v58_v33  ;;  %v226_v39 = vadd.f32 %v225_v37, %v68_v32 }
 0x100   :  { %v219_v40 = vpop.f32.mrf.mxu0  ;;  %v227_v41 = vpop.f32.mrf.mxu1 }
 0x101   :  { %v230_v42 = vmax.f32 %v218_v38, 0.0  ;;  %v232_v43 = vmax.f32 %v226_v39, 0.0 }
 0x103   :  { %235 = vst.msk [vmem:[%s451_s3 + $0x8] sm:$0xff] %vm233_vm2, %v230_v42  ;;  %237 = vst.msk [vmem:[%s451_s3 + $0x18] sm:$0xff] %vm233_vm2, %v232_v43 }

// kernel: pfenet_forward.42
= control target key start
LH: loop header
LB: loop body
LE: loop exit
PB: predicated region body
PF: predicated region fallthrough
CT: control target
= control target key end

     0   :  { %v540_v0 = vmov 0.0   ;;  %vm821_vm0 = vcmask 662528   ;;  %vm26_vm1 = vcmask 261120   ;;  %vm541_vm2 = vmmov 0   ;;  %s818_s1 = inlined_call_operand.vmem [shape: f32[1,32,81], index: 1, kind: input, shape index: {}]   ;;  %s819_s0 = inlined_call_operand.vmem [shape: f32[1,81,32], index: 0, kind: input, shape index: {}]   ;;  %s820_s2 = inlined_call_operand.vmem [shape: f32[1,1,81], index: 2, kind: output, shape index: {}]  }
   0x1   :  { %441 = vmatprep.subr.mxu0 %v540_v0  ;;  %482 = vmatprep.subr.mxu1 %v540_v0  ;;  %v25_v1 = vld [vmem:[%s818_s1 + $0x18] sm:$0xff]  ;;  %v24_v2 = vld [vmem:[%s818_s1 + $0x10] sm:$0xff]  ;;  %v23_v3 = vld [vmem:[%s818_s1 + $0x8] sm:$0xff]  ;;  %vm221_vm3 = vcmask 253952  }
   0x2   :  { %442 = vmatpush3.msra.mxu0 %v25_v1  ;;  %486 = vmatpush3.msra.mxu1 %v25_v1  ;;  %v304_v4 = vmul.f32 %v24_v2, %v24_v2  ;;  %v303_v5 = vmul.f32 %v23_v3, %v23_v3  ;;  %v22_v6 = vld [vmem:[%s818_s1] sm:$0xff]  ;;  %v305_v7 = vmul.f32 %v25_v1, %v25_v1  ;;  %v13_v9 = vld [vmem:[%s819_s0 + $0x10] sm:$0xff]  ;;  %v12_v21 = vld [vmem:[%s819_s0 + $0x8] sm:$0xff] }
   0x3   :  { %443 = vmatprep.subr.mxu0 %v540_v0  ;;  %483 = vmatprep.subr.mxu1 %v540_v0  ;;  %v302_v8 = vmul.f32 %v22_v6, %v22_v6  ;;  %v11_v11 = vld [vmem:[%s819_s0] sm:$0xff]  ;;  %v182_v15 = vmul.f32 %v13_v9, %v13_v9  ;;  %v17_v19 = vld [vmem:[%s819_s0 + $0x30] sm:$0xff]  ;;  %v181_v24 = vmul.f32 %v12_v21, %v12_v21  ;;  %v16_v27 = vld [vmem:[%s819_s0 + $0x28] sm:$0xff] }
   0x4   :  { %444 = vmatpush3.msra.mxu0 %v24_v2  ;;  %487 = vmatpush3.msra.mxu1 %v24_v2  ;;  %v308_v10 = vsel %vm821_vm0, %v303_v5, 0.0  ;;  %v310_v12 = vsel %vm821_vm0, %v304_v4, 0.0  ;;  %v180_v14 = vmul.f32 %v11_v11, %v11_v11  ;;  %v587_v17 = vld [vmem:[%s819_s0 + $0x20] sm:$0xff]  ;;  %v312_v18 = vsel %vm821_vm0, %v305_v7, 0.0  ;;  %v18_v28 = vld [vmem:[%s819_s0 + $0x38] sm:$0xff]  ;;  %v20_v39 = vld [vmem:[%s819_s0 + $0x48] sm:$0xff] }
   0x5   :  { %445 = vmatprep.subr.mxu0 %v540_v0  ;;  %484 = vmatprep.subr.mxu1 %v540_v0  ;;  %v307_v13 = vsel %vm821_vm0, %v302_v8, 0.0  ;;  %v197_v23 = vsel %vm26_vm1, %v182_v15, 0.0  ;;  %v184_v25 = vmul.f32 %v587_v17, %v587_v17  ;;  %v194_v29 = vsel %vm26_vm1, %v181_v24, 0.0  ;;  %v19_v33 = vld [vmem:[%s819_s0 + $0x40] sm:$0xff]  ;;  %v14_v34 = vld [vmem:[%s819_s0 + $0x18] sm:$0xff] }
   0x6   :  { %446 = vmatpush3.msra.mxu0 %v23_v3  ;;  %488 = vmatpush3.msra.mxu1 %v23_v3  ;;  %v309_v16 = vadd.f32 %v308_v10, %v307_v13  ;;  %v191_v22 = vsel %vm26_vm1, %v180_v14, 0.0  ;;  %v185_v31 = vmul.f32 %v16_v27, %v16_v27  ;;  %v186_v32 = vmul.f32 %v17_v19, %v17_v19  ;;  %v21_v44 = vld [vmem:[%s819_s0 + $0x50] sm:$0x1] }
   0x7   :  { %447 = vmatprep.subr.mxu0 %v540_v0  ;;  %485 = vmatprep.subr.mxu1 %v540_v0  ;;  %v203_v30 = vsel %vm26_vm1, %v184_v25, 0.0  ;;  %v183_v37 = vmul.f32 %v14_v34, %v14_v34  ;;  %v187_v38 = vmul.f32 %v18_v28, %v18_v28  ;;  %v188_v42 = vmul.f32 %v19_v33, %v19_v33 }
   0x8   :  { %448 = vmatpush3.msra.mxu0 %v22_v6  ;;  %v311_v20 = vadd.f32 %v310_v12, %v309_v16  ;;  %489 = vmatpush3.msra.mxu1 %v22_v6  ;;  %v206_v35 = vsel %vm26_vm1, %v185_v31, 0.0  ;;  %v209_v36 = vsel %vm26_vm1, %v186_v32, 0.0  ;;  %v189_v43 = vmul.f32 %v20_v39, %v20_v39 }
   0x9   :  { %449 = vmatprep.mubr.msk.f32.mxu0 %vm541_vm2, %v540_v0  ;;  %467 = vmatprep.mubr.msk.f32.mxu1 %vm541_vm2, %v540_v0  ;;  %v200_v40 = vsel %vm26_vm1, %v183_v37, 0.0  ;;  %v212_v41 = vsel %vm26_vm1, %v187_v38, 0.0  ;;  %v215_v45 = vsel %vm26_vm1, %v188_v42, 0.0  ;;  %v190_v47 = vmul.f32 %v21_v44, %v21_v44 }
   0xa   :  { %v313_v26 = vadd.f32 %v312_v18, %v311_v20  ;;  %450 = vmatmul.mubr.msk.f32.vlgmr.msra.gmra.mxu0 %vm26_vm1, %v11_v11  ;;  %468 = vmatmul.mubr.msk.f32.vlgmr.msra.gmra.mxu1 %vm26_vm1, %v17_v19  ;;  %v218_v46 = vsel %vm26_vm1, %v189_v43, 0.0 }
   0xb   :  { %452 = vmatprep.mubr.msk.f32.mxu0 %vm541_vm2, %v540_v0  ;;  %470 = vmatprep.mubr.msk.f32.mxu1 %vm541_vm2, %v540_v0  ;;  %v222_v48 = vsel %vm221_vm3, %v190_v47, 0.0 }
   0xc   :  { %192 = vadd.xlane.f32.xlu0 %v191_v22  ;;  %198 = vadd.xlane.f32.xlu1 %v197_v23  ;;  %v314_v49 = vrot.slane %v313_v26, 4 }
   0xe   :  { %453 = vmatmul.mubr.msk.f32.gmra.mxu0 %vm26_vm1, %v12_v21  ;;  %471 = vmatmul.mubr.msk.f32.gmra.mxu1 %vm26_vm1, %v18_v28  ;;  %v315_v50 = vadd.f32 %v314_v49, %v313_v26 }
   0xf   :  { %455 = vmatprep.mubr.msk.f32.mxu0 %vm541_vm2, %v540_v0  ;;  %473 = vmatprep.mubr.msk.f32.mxu1 %vm541_vm2, %v540_v0 }
  0x10   :  { %195 = vadd.xlane.f32.xlu0 %v194_v29  ;;  %204 = vadd.xlane.f32.xlu1 %v203_v30  ;;  %v316_v51 = vrot.slane %v315_v50, 2 }
  0x12   :  { %456 = vmatmul.mubr.msk.f32.gmra.mxu0 %vm26_vm1, %v13_v9  ;;  %474 = vmatmul.mubr.msk.f32.gmra.mxu1 %vm26_vm1, %v19_v33  ;;  %v317_v52 = vadd.f32 %v316_v51, %v315_v50 }
  0x13   :  { %458 = vmatprep.mubr.msk.f32.mxu0 %vm541_vm2, %v540_v0  ;;  %476 = vmatprep.mubr.msk.f32.mxu1 %vm541_vm2, %v540_v0 }
  0x14   :  { %207 = vadd.xlane.f32.xlu0 %v206_v35  ;;  %210 = vadd.xlane.f32.xlu1 %v209_v36  ;;  %v318_v53 = vrot.slane %v317_v52, 1 }
  0x16   :  { %459 = vmatmul.mubr.msk.f32.gmra.mxu0 %vm26_vm1, %v14_v34  ;;  %477 = vmatmul.mubr.msk.f32.gmra.mxu1 %vm26_vm1, %v20_v39  ;;  %v319_v56 = vadd.f32 %v318_v53, %v317_v52 }
  0x17   :  { %461 = vmatprep.mubr.msk.f32.mxu0 %vm541_vm2, %v540_v0  ;;  %479 = vmatprep.mubr.msk.f32.mxu1 %vm541_vm2, %v540_v0 }
  0x18   :  { %201 = vadd.xlane.f32.xlu0 %v200_v40  ;;  %213 = vadd.xlane.f32.xlu1 %v212_v41  ;;  %492 = vrsqrt.f32 %v319_v56  ;;  %vm322_vm4 = vcmp.eq.f32.partialorder %v319_v56, inf  ;;  %v325_v4 = vand.u32 2147483648, %v319_v56  ;;  %vm324_vm5 = vcmp.eq.f32.partialorder %v319_v56, 0.0 }
  0x1a   :  { %462 = vmatmul.mubr.msk.f32.gmra.mxu0 %vm26_vm1, %v587_v17  ;;  %480 = vmatmul.mubr.msk.f32.gmra.mxu1 %vm26_vm1, %v21_v44 }
  0x1b   :  { %464 = vmatprep.mubr.msk.f32.mxu0 %vm541_vm2, %v540_v0 }
  0x1c   :  { %216 = vadd.xlane.f32.xlu0 %v215_v45  ;;  %219 = vadd.xlane.f32.xlu1 %v218_v46 }
  0x1e   :  { %465 = vmatmul.mubr.msk.f32.gmra.mxu0 %vm26_vm1, %v16_v27 }
  0x20   :  { %223 = vadd.xlane.f32.xlu0 %v222_v48 }
  0x25   :  { %v493_v0 = vpop.eup %492 }
  0x26   :  { %v321_v2 = vmul.f32 %v493_v0, %v319_v56 }
  0x28   :  { %v323_v5 = vsel %vm322_vm4, %v319_v56, %v321_v2 }
  0x29   :  { %v695_v7 = vsel %vm324_vm5, %v325_v4, %v323_v5 }
  0x95   :  { %v662_v54 = vpop.xlane.xlu0 %192  ;;  %v664_v55 = vpop.xlane.xlu1 %198 }
  0x96   :  { %494 = vrsqrt.f32 %v662_v54  ;;  %vm227_vm6 = vcmp.eq.f32.partialorder %v662_v54, inf  ;;  %vm229_vm7 = vcmp.eq.f32.partialorder %v662_v54, 0.0  ;;  %v230_v10 = vand.u32 2147483648, %v662_v54 }
  0x97   :  { %496 = vrsqrt.f32 %v664_v55  ;;  %vm241_vm8 = vcmp.eq.f32.partialorder %v664_v55, inf  ;;  %vm243_vm9 = vcmp.eq.f32.partialorder %v664_v55, 0.0  ;;  %v244_v12 = vand.u32 2147483648, %v664_v55 }
  0x99   :  { %v666_v57 = vpop.xlane.xlu0 %195  ;;  %v668_v58 = vpop.xlane.xlu1 %204 }
  0x9a   :  { %498 = vrsqrt.f32 %v666_v57  ;;  %vm234_vm10 = vcmp.eq.f32.partialorder %v666_v57, inf  ;;  %vm236_vm11 = vcmp.eq.f32.partialorder %v666_v57, 0.0  ;;  %v237_v14 = vand.u32 2147483648, %v666_v57 }
  0x9b   :  { %500 = vrsqrt.f32 %v668_v58  ;;  %vm255_vm12 = vcmp.eq.f32.partialorder %v668_v58, inf  ;;  %vm257_vm13 = vcmp.eq.f32.partialorder %v668_v58, 0.0  ;;  %v258_v15 = vand.u32 2147483648, %v668_v58 }
  0x9d   :  { %v670_v59 = vpop.xlane.xlu0 %207  ;;  %v672_v60 = vpop.xlane.xlu1 %210 }
  0x9e   :  { %502 = vrsqrt.f32 %v670_v59  ;;  %vm262_vm14 = vcmp.eq.f32.partialorder %v670_v59, inf  ;;  %vm264_vm15 = vcmp.eq.f32.partialorder %v670_v59, 0.0  ;;  %v265_v18 = vand.u32 2147483648, %v670_v59 }
  0x9f   :  { %504 = vrsqrt.f32 %v672_v60  ;;  %vm269_vm1 = vcmp.eq.f32.partialorder %v672_v60, inf  ;;  %vm271_vm2 = vcmp.eq.f32.partialorder %v672_v60, 0.0  ;;  %v272_v24 = vand.u32 2147483648, %v672_v60 }
  0xa1   :  { %v674_v61 = vpop.xlane.xlu0 %201  ;;  %v680_v63 = vpop.xlane.xlu1 %213 }
  0xa2   :  { %vm248_vm3 = vcmp.eq.f32.partialorder %v674_v61, inf  ;;  %vm250_vm4 = vcmp.eq.f32.partialorder %v674_v61, 0.0  ;;  %v251_v27 = vand.u32 2147483648, %v674_v61  ;;  %vm276_vm5 = vcmp.eq.f32.partialorder %v680_v63, inf }
  0xa3   :  { %v495_v6 = vpop.eup %494  ;;  %v279_v32 = vand.u32 2147483648, %v680_v63 }
  0xa4   :  { %v497_v8 = vpop.eup %496  ;;  %v226_v9 = vmul.f32 %v495_v6, %v662_v54 }
  0xa5   :  { %v677_v62 = vpop.xlane.xlu0 %216  ;;  %v690_v3 = vpop.xlane.xlu1 %219  ;;  %v240_v17 = vmul.f32 %v497_v8, %v664_v55 }
  0xa6   :  { %v228_v20 = vsel %vm227_vm6, %v662_v54, %v226_v9  ;;  %vm283_vm0 = vcmp.eq.f32.partialorder %v677_v62, inf  ;;  %vm285_vm6 = vcmp.eq.f32.partialorder %v677_v62, 0.0  ;;  %v286_v39 = vand.u32 2147483648, %v677_v62 }
  0xa7   :  { %v499_v11 = vpop.eup %498  ;;  %v231_v29 = vsel %vm229_vm7, %v230_v10, %v228_v20  ;;  %v242_v30 = vsel %vm241_vm8, %v664_v55, %v240_v17 }
  0xa8   :  { %v501_v13 = vpop.eup %500  ;;  %v233_v21 = vmul.f32 %v499_v11, %v666_v57  ;;  %v327_v40 = vmul.f32 %v695_v7, %v231_v29  ;;  %v245_v41 = vsel %vm243_vm9, %v244_v12, %v242_v30  ;;  %vm290_vm9 = vcmp.eq.f32.partialorder %v690_v3, inf }
  0xa9   :  { %v685_v1 = vpop.xlane.xlu0 %223  ;;  %v254_v23 = vmul.f32 %v501_v13, %v668_v58  ;;  %v329_v51 = vmul.f32 %v695_v7, %v245_v41 }
  0xaa   :  { %506 = vrsqrt.f32 %v685_v1  ;;  %v235_v34 = vsel %vm234_vm10, %v666_v57, %v233_v21  ;;  %vm297_vm7 = vcmp.eq.f32.partialorder %v685_v1, inf  ;;  %v300_v47 = vand.u32 2147483648, %v685_v1 }
  0xab   :  { %508 = vrsqrt.f32 %v674_v61  ;;  %v503_v16 = vpop.eup %502  ;;  %v256_v37 = vsel %vm255_vm12, %v668_v58, %v254_v23  ;;  %v238_v44 = vsel %vm236_vm11, %v237_v14, %v235_v34  ;;  %vm299_vm8 = vcmp.eq.f32.partialorder %v685_v1, 0.0 }
  0xac   :  { %510 = vrsqrt.f32 %v680_v63  ;;  %v505_v19 = vpop.eup %504  ;;  %v261_v26 = vmul.f32 %v503_v16, %v670_v59  ;;  %v259_v48 = vsel %vm257_vm13, %v258_v15, %v256_v37  ;;  %v328_v54 = vmul.f32 %v695_v7, %v238_v44 }
  0xad   :  { %512 = vrsqrt.f32 %v677_v62  ;;  %v268_v31 = vmul.f32 %v505_v19, %v672_v60  ;;  %vm292_vm10 = vcmp.eq.f32.partialorder %v690_v3, 0.0  ;;  %v331_v57 = vmul.f32 %v695_v7, %v259_v48 }
  0xae   :  { %514 = vrsqrt.f32 %v690_v3  ;;  %v263_v42 = vsel %vm262_vm14, %v670_v59, %v261_v26  ;;  %v293_v59 = vand.u32 2147483648, %v690_v3  ;;  %v338_v4 = vadd.f32 1e-07, %v327_v40 }
  0xaf   :  { %v270_v45 = vsel %vm269_vm1, %v672_v60, %v268_v31  ;;  %v266_v52 = vsel %vm264_vm15, %v265_v18, %v263_v42  ;;  %vm822_vm11 = vcmp.eq.f32.partialorder %v680_v63, 0.0  ;;  %v340_v8 = vadd.f32 1e-07, %v329_v51 }
  0xb0   :  { %v273_v55 = vsel %vm271_vm2, %v272_v24, %v270_v45  ;;  %v339_v11 = vadd.f32 1e-07, %v328_v54  ;;  %v342_v13 = vadd.f32 1e-07, %v331_v57  ;;  %516 = vrcp.f32 %v338_v4 }
  0xb1   :  { %v333_v5 = vmul.f32 %v695_v7, %v273_v55  ;;  %518 = vrcp.f32 %v340_v8  ;;  %vm823_vm12 = vcmask 662528  }
  0xb2   :  { %520 = vrcp.f32 %v339_v11  ;;  %vm824_vm13 = vmmov %vm823_vm12 }
  0xb3   :  { %v344_v16 = vadd.f32 1e-07, %v333_v5  ;;  %522 = vrcp.f32 %v342_v13  ;;  %vm825_vm14 = vmmov %vm823_vm12 }
  0xb4   :  { %vm826_vm15 = vmmov %vm823_vm12 }
  0xb5   :  { %vm827_vm1 = vmmov %vm823_vm12 }
  0xb6   :  { %vm828_vm2 = vmmov %vm827_vm1 }
  0xb7   :  { %v507_v22 = vpop.eup %506 }
  0xb8   :  { %v509_v25 = vpop.eup %508  ;;  %v296_v35 = vmul.f32 %v507_v22, %v685_v1 }
  0xb9   :  { %v511_v28 = vpop.eup %510  ;;  %v247_v38 = vmul.f32 %v509_v25, %v674_v61 }
  0xba   :  { %v513_v33 = vpop.eup %512  ;;  %v275_v43 = vmul.f32 %v511_v28, %v680_v63  ;;  %v298_v50 = vsel %vm297_vm7, %v685_v1, %v296_v35  ;;  %v332_v1 = vmul.f32 %v695_v7, %v266_v52  ;;  %vm833_vm7 = vmmov %vm827_vm1 }
  0xbb   :  { %v515_v36 = vpop.eup %514  ;;  %v282_v46 = vmul.f32 %v513_v33, %v677_v62  ;;  %v249_v53 = vsel %vm248_vm3, %v674_v61, %v247_v38  ;;  %v301_v0 = vsel %vm299_vm8, %v300_v47, %v298_v50  ;;  %vm829_vm3 = vmmov %vm827_vm1 }
  0xbc   :  { %v289_v49 = vmul.f32 %v515_v36, %v690_v3  ;;  %v277_v56 = vsel %vm276_vm5, %v680_v63, %v275_v43  ;;  %v252_v60 = vsel %vm250_vm4, %v251_v27, %v249_v53  ;;  %v337_v10 = vmul.f32 %v695_v7, %v301_v0  ;;  %vm830_vm4 = vmmov %vm827_vm1 }
  0xbd   :  { %v284_v58 = vsel %vm283_vm0, %v677_v62, %v282_v46  ;;  %v280_v6 = vsel %vm822_vm11, %v279_v32, %v277_v56  ;;  %v330_v12 = vmul.f32 %v695_v7, %v252_v60  ;;  %v343_v15 = vadd.f32 1e-07, %v332_v1  ;;  %v517_v30 = vpop.eup %516  ;;  %vm831_vm5 = vmmov %vm827_vm1 }
  0xbe   :  { %v291_v2 = vsel %vm290_vm9, %v690_v3, %v289_v49  ;;  %v287_v9 = vsel %vm285_vm6, %v286_v39, %v284_v58  ;;  %v334_v14 = vmul.f32 %v695_v7, %v280_v6  ;;  %v348_v17 = vadd.f32 1e-07, %v337_v10  ;;  %v519_v33 = vpop.eup %518  ;;  %vm832_vm6 = vmmov %vm827_vm1 }
  0xbf   :  { %v294_v61 = vsel %vm292_vm10, %v293_v59, %v291_v2  ;;  %v335_v63 = vmul.f32 %v695_v7, %v287_v9  ;;  %v341_v20 = vadd.f32 1e-07, %v330_v12  ;;  %524 = vrcp.f32 %v343_v15  ;;  %v521_v34 = vpop.eup %520  ;;  %vm834_vm8 = vmmov %vm827_vm1 }
  0xc0   :  { %v336_v62 = vmul.f32 %v695_v7, %v294_v61  ;;  %v345_v21 = vadd.f32 1e-07, %v334_v14  ;;  %526 = vrcp.f32 %v344_v16  ;;  %v523_v37 = vpop.eup %522  ;;  %vm387_vm0 = vcmask 655360  }
  0xc1   :  { %v346_v23 = vadd.f32 1e-07, %v335_v63  ;;  %528 = vrcp.f32 %v348_v17 }
  0xc2   :  { %v347_v24 = vadd.f32 1e-07, %v336_v62  ;;  %530 = vrcp.f32 %v341_v20 }
  0xc3   :  { %532 = vrcp.f32 %v345_v21 }
  0xc4   :  { %534 = vrcp.f32 %v346_v23 }
  0xc5   :  { %536 = vrcp.f32 %v347_v24 }
  0xca   :  { %v126_v18 = vpop.f32.mrf.mxu0  ;;  %v156_v19 = vpop.f32.mrf.mxu1 }
  0xcb   :  { %v360_v44 = vmul.f32 %v517_v30, %v126_v18 }
  0xcc   :  { %v451_v3 = vpop.f32.mrf.mxu0  ;;  %v469_v22 = vpop.f32.mrf.mxu1 }
  0xcd   :  { %v525_v38 = vpop.eup %524  ;;  %v371_v0 = vsel %vm825_vm14, %v360_v44, -inf }
  0xce   :  { %v131_v25 = vpop.f32.mrf.mxu0  ;;  %v161_v26 = vpop.f32.mrf.mxu1 }
  0xcf   :  { %v527_v41 = vpop.eup %526  ;;  %v361_v55 = vmul.f32 %v521_v34, %v131_v25 }
  0xd0   :  { %v454_v27 = vpop.f32.mrf.mxu0  ;;  %v472_v7 = vpop.f32.mrf.mxu1  ;;  %v366_v45 = vmul.f32 %v527_v41, %v156_v19 }
  0xd1   :  { %v529_v43 = vpop.eup %528  ;;  %v372_v12 = vsel %vm827_vm1, %v361_v55, -inf }
  0xd2   :  { %v136_v28 = vpop.f32.mrf.mxu0  ;;  %v166_v29 = vpop.f32.mrf.mxu1  ;;  %v379_v1 = vsel %vm826_vm15, %v366_v45, -inf }
  0xd3   :  { %v362_v42 = vmul.f32 %v519_v33, %v136_v28  ;;  %v531_v48 = vpop.eup %530 }
  0xd4   :  { %v457_v31 = vpop.f32.mrf.mxu0  ;;  %v475_v32 = vpop.f32.mrf.mxu1 }
  0xd5   :  { %v533_v51 = vpop.eup %532  ;;  %v373_v56 = vsel %vm823_vm12, %v362_v42, -inf }
  0xd6   :  { %v141_v35 = vpop.f32.mrf.mxu0  ;;  %v171_v36 = vpop.f32.mrf.mxu1  ;;  %v367_v60 = vmul.f32 %v533_v51, %v161_v26  ;;  %v380_v9 = vmax.f32 %v373_v56, %v379_v1 }
  0xd7   :  { %v535_v54 = vpop.eup %534  ;;  %v363_v57 = vmul.f32 %v531_v48, %v141_v35 }
  0xd8   :  { %v460_v39 = vpop.f32.mrf.mxu0  ;;  %v478_v40 = vpop.f32.mrf.mxu1  ;;  %v368_v4 = vmul.f32 %v535_v54, %v166_v29  ;;  %v381_v63 = vsel %vm830_vm4, %v367_v60, -inf }
  0xd9   :  { %v537_v59 = vpop.eup %536  ;;  %v374_v61 = vsel %vm828_vm2, %v363_v57, -inf }
  0xda   :  { %v146_v46 = vpop.f32.mrf.mxu0  ;;  %v176_v47 = vpop.f32.mrf.mxu1  ;;  %v369_v5 = vmul.f32 %v537_v59, %v171_v36  ;;  %v383_v16 = vsel %vm831_vm5, %v368_v4, -inf  ;;  %v382_v17 = vmax.f32 %v374_v61, %v381_v63 }
  0xdb   :  { %v364_v49 = vmul.f32 %v523_v37, %v146_v46  ;;  %v370_v50 = vmul.f32 %v529_v43, %v176_v47 }
  0xdc   :  { %v463_v52 = vpop.f32.mrf.mxu0  ;;  %v481_v53 = vpop.f32.mrf.mxu1  ;;  %v385_v62 = vsel %vm832_vm6, %v369_v5, -inf }
  0xdd   :  { %v375_v58 = vsel %vm824_vm13, %v364_v49, -inf  ;;  %v388_v6 = vsel %vm387_vm0, %v370_v50, -inf }
  0xde   :  { %v151_v2 = vpop.f32.mrf.mxu0  ;;  %v376_v10 = vmax.f32 %v371_v0, %v375_v58  ;;  %v389_v14 = vmax.f32 %v380_v9, %v388_v6 }
  0xdf   :  { %v365_v8 = vmul.f32 %v525_v38, %v151_v2 }
  0xe0   :  { %v466_v11 = vpop.f32.mrf.mxu0  ;;  %v384_v18 = vmax.f32 %v376_v10, %v383_v16  ;;  %v391_v20 = vmax.f32 %v389_v14, %v382_v17 }
  0xe1   :  { %v377_v13 = vsel %vm829_vm3, %v365_v8, -inf }
  0xe2   :  { %v378_v15 = vmax.f32 %v372_v12, %v377_v13 }
  0xe4   :  { %v386_v19 = vmax.f32 %v378_v15, %v385_v62 }
  0xe6   :  { %v390_v21 = vmax.f32 %v384_v18, %v386_v19 }
  0xe8   :  { %v392_v3 = vmax.f32 %v390_v21, %v391_v20 }
  0xea   :  { %v393_v22 = vrot.slane %v392_v3, 4 }
  0xec   :  { %v394_v23 = vmax.f32 %v392_v3, %v393_v22 }
  0xee   :  { %v395_v24 = vrot.slane %v394_v23, 2 }
  0xf0   :  { %v396_v25 = vmax.f32 %v394_v23, %v395_v24 }
  0xf2   :  { %v397_v26 = vrot.slane %v396_v25, 1 }
  0xf4   :  { %v398_v27 = vmax.f32 %v396_v25, %v397_v26 }
  0xf6   :  { %v402_v7 = vsel %vm833_vm7, %v398_v27, -inf  ;;  %v399_v28 = vsel %vm834_vm8, %v398_v27, inf }
  0xf7   :  { %403 = vmax.xlane.f32.xlu0 %v402_v7  ;;  %400 = vmin.xlane.f32.xlu1 %v399_v28 }
 0x180   :  { %v404_v29 = vpop.xlane.xlu0 %403  ;;  %v401_v30 = vpop.xlane.xlu1 %400 }
 0x181   :  { %v406_v31 = vsub.f32 %v404_v29, %v401_v30  ;;  %v405_v33 = vsub.f32 %v398_v27, %v401_v30 }
 0x183   :  { %v407_v32 = vadd.f32 1e-07, %v406_v31 }
 0x185   :  { %538 = vrcp.f32 %v407_v32 }
 0x192   :  { %v539_v34 = vpop.eup %538 }
 0x193   :  { %v409_v35 = vmul.f32 %v539_v34, %v405_v33 }
 0x195   :  { %410 = vst.msk [vmem:[%s820_s2] sm:$0x1] %vm387_vm0, %v409_v35 }

// kernel: pfenet_forward.41
= control target key start
LH: loop header
LB: loop body
LE: loop exit
PB: predicated region body
PF: predicated region fallthrough
CT: control target
= control target key end

     0   :  { %vm14_vm0 = vcmask 655360   ;;  %v27_v0 = vlaneseq  ;;  %vm34_vm1 = vcmask 662528   ;;  %vm45_vm2 = vcmask 7168   ;;  %s86_s1 = inlined_call_operand.vmem [shape: f32[1,1,81], index: 1, kind: input, shape index: {}]   ;;  %s87_s0 = inlined_call_operand.vmem [shape: f32[1,16,81], index: 0, kind: input, shape index: {}]   ;;  %s88_s2 = inlined_call_operand.vmem [shape: f32[1,16,1], index: 2, kind: output, shape index: {}]  }
   0x1   :  { %v13_v1 = vld [vmem:[%s86_s1] sm:$0x1]  ;;  %v12_v5 = vld [vmem:[%s87_s0 + $0x8] sm:$0xff] }
   0x2   :  { %v15_v2 = vsel %vm14_vm0, %v13_v1, 0.0  ;;  %v28_v3 = vshrl.u32 %v27_v0, 7  ;;  %v11_v6 = vld [vmem:[%s87_s0] sm:$0xff] }
   0x3   :  { %16 = vadd.xlane.f32.xlu0 %v15_v2 }
   0x4   :  { %v29_v4 = vsub.s32 0, %v28_v3 }
   0x6   :  { %v30_v7 = vrot.slane %v13_v1, %v29_v4 }
   0x8   :  { %v33_v8 = vmul.f32 %v30_v7, %v12_v5  ;;  %v32_v9 = vmul.f32 %v30_v7, %v11_v6 }
   0xa   :  { %v38_v10 = vsel %vm34_vm1, %v33_v8, 0.0  ;;  %v35_v11 = vsel %vm34_vm1, %v32_v9, 0.0 }
   0xb   :  { %39 = vadd.xlane.f32.xlu1 %v38_v10  ;;  %36 = vadd.xlane.f32.xlu0 %v35_v11 }
  0x8c   :  { %v17_v12 = vpop.xlane.xlu0 %16 }
  0x8d   :  { %v18_v13 = vrot.slane %v17_v12, 4 }
  0x8f   :  { %v19_v14 = vadd.f32 %v18_v13, %v17_v12 }
  0x91   :  { %v20_v15 = vrot.slane %v19_v14, 2 }
  0x93   :  { %v21_v16 = vadd.f32 %v20_v15, %v19_v14 }
  0x94   :  { %v40_v20 = vpop.xlane.xlu1 %39  ;;  %v37_v21 = vpop.xlane.xlu0 %36 }
  0x95   :  { %v22_v17 = vrot.slane %v21_v16, 1 }
  0x97   :  { %v23_v18 = vadd.f32 %v22_v17, %v21_v16 }
  0x99   :  { %52 = vpush %v23_v18 }
  0xca   :  { %s53_s1 = spop %52 }
  0xcb   :  { %s25_s15 = sadd.f32 0.0005, %s53_s1 }
  0xcd   :  { %v41_v19 = vstv %s25_s15 }
  0xce   :  { %54 = vrcp.f32 %v41_v19 }
  0xdb   :  { %v55_v22 = vpop.eup %54 }
  0xdc   :  { %v44_v23 = vmul.f32 %v55_v22, %v40_v20  ;;  %v43_v24 = vmul.f32 %v55_v22, %v37_v21 }
  0xde   :  { %47 = vst.msk [vmem:[%s88_s2 + $0x8] sm:$0xff] %vm45_vm2, %v44_v23  ;;  %46 = vst.msk [vmem:[%s88_s2] sm:$0xff] %vm45_vm2, %v43_v24 }

// kernel: pfenet_forward.43
= control target key start
LH: loop header
LB: loop body
LE: loop exit
PB: predicated region body
PF: predicated region fallthrough
CT: control target
= control target key end

     0   :  { %vm58_vm0 = vcmask 1040384   ;;  %v141_v0 = vmov 0.0   ;;  %v142_v2 = vmov 0   ;;  %vm143_vm1 = vmmov 0   ;;  %s188_s1 = inlined_call_operand.vmem [shape: bf16[33,64], index: 1, kind: input, shape index: {}]   ;;  %s189_s2 = inlined_call_operand.vmem [shape: f32[16,1], index: 2, kind: input, shape index: {}]   ;;  %s190_s0 = inlined_call_operand.vmem [shape: bf16[16,33], index: 0, kind: input, shape index: {}]   ;;  %s191_s3 = inlined_call_operand.vmem [shape: f32[16,64], index: 3, kind: output, shape index: {}]  }
   0x1   :  { %123 = vmatprep.subr.bf16.mxu0 %v141_v0  ;;  %v137_v1 = vld [vmem:[%s188_s1 + $0x10] ss:$0 sps:$4 sm:$0x11]   ;;  %v60_v3 = vsel %vm58_vm0, 65535, %v142_v2  ;;  %129 = vmatprep.mubr.msk.bf16.mxu0 %vm143_vm1, %v141_v0  ;;  %v138_v5 = vld [vmem:[%s188_s1 + $0x8] sm:$0xff]   ;;  %v22_v6 = vld [vmem:[%s189_s2] sm:$0xff] }
   0x2   :  { %136 = vset.pattern.permute.xlu0 %v142_v2  ;;  %v62_v4 = vand.u32 %v137_v1, %v60_v3  ;;  %v23_v7 = vld [vmem:[%s189_s2 + $0x8] sm:$0xff]  ;;  %v139_v8 = vld [vmem:[%s188_s1] sm:$0xff]   ;;  %vm54_vm2 = vcmask 269312   ;;  %vm107_vm3 = vcmask 523264  }
   0x3   :  { %26 = vperm.xlu0 %136, %v22_v6   ;;  %v140_v9 = vld [vmem:[%s190_s0] sm:$0xff]  }
   0x4   :  { %124 = vmatpush3.bf16.msra.mxu0 %v62_v4 }
   0x5   :  { %125 = vmatprep.subr.bf16.mxu0 %v141_v0 }
   0x7   :  { %31 = vperm.xlu0 %136, %v23_v7  }
   0x8   :  { %126 = vmatpush3.bf16.msra.mxu0 %v138_v5 }
   0x9   :  { %127 = vmatprep.subr.bf16.mxu0 %v141_v0 }
   0xc   :  { %128 = vmatpush3.bf16.msra.mxu0 %v139_v8 }
   0xf   :  { %130 = vmatmul.mubr.msk.bf16.vlgmr.msra.gmra.mxu0 %vm54_vm2, %v140_v9 }
  0x7e   :  { %v27_v10 = vpop.permute.xlu0 %26 }
  0x82   :  { %v32_v15 = vpop.permute.xlu0 %31 }
  0xcf   :  { %v98_v11 = vpop.f32.mrf.mxu0 }
  0xd0   :  { %v99_v12 = vadd.f32 %v98_v11, %v27_v10 }
  0xd1   :  { %v131_v13 = vpop.f32.mrf.mxu0 }
  0xd2   :  { %v105_v14 = vmax.f32 %v99_v12, 0.0 }
  0xd3   :  { %v101_v16 = vpop.f32.mrf.mxu0 }
  0xd4   :  { %108 = vst.msk [vmem:[%s191_s3] sm:$0xff] %vm107_vm3, %v105_v14  ;;  %v102_v17 = vadd.f32 %v101_v16, %v32_v15 }
  0xd5   :  { %v132_v18 = vpop.f32.mrf.mxu0 }
  0xd6   :  { %v106_v19 = vmax.f32 %v102_v17, 0.0 }
  0xd8   :  { %109 = vst.msk [vmem:[%s191_s3 + $0x8] sm:$0xff] %vm107_vm3, %v106_v19 }

// kernel: pfenet_forward.44
= control target key start
LH: loop header
LB: loop body
LE: loop exit
PB: predicated region body
PF: predicated region fallthrough
CT: control target
= control target key end

     0   :  { %v190_v0 = vmov 0   ;;  %vm110_vm0 = vcmask 130048   ;;  %vm157_vm1 = vcmask 523264   ;;  %s256_s1 = inlined_call_operand.vmem [shape: bf16[144,64], index: 1, kind: input, shape index: {}]   ;;  %s257_s0 = inlined_call_operand.vmem [shape: bf16[16,144], index: 0, kind: input, shape index: {}]   ;;  %s258_s2 = inlined_call_operand.vmem [shape: f32[16,1], index: 2, kind: input, shape index: {}]   ;;  %s259_s3 = inlined_call_operand.vmem [shape: f32[16,64], index: 3, kind: output, shape index: {}]  }
   0x1   :  { %114 = vmatprep.subr.bf16.mxu0 %v190_v0  ;;  %v178_v1 = vld [vmem:[%s256_s1 + $0x38] sm:$0xff]   ;;  %177 = vset.pattern.permute.xlu0 %v190_v0  ;;  %v179_v2 = vld [vmem:[%s256_s1 + $0x30] sm:$0xff]   ;;  %v180_v3 = vld [vmem:[%s256_s1 + $0x28] sm:$0xff]  }
   0x2   :  { %115 = vmatpush1.bf16.msra.mxu0 %v178_v1  ;;  %v181_v4 = vld [vmem:[%s256_s1 + $0x20] sm:$0xff]   ;;  %v36_v7 = vld [vmem:[%s258_s2 + $0x8] sm:$0xff]  ;;  %v182_v8 = vld [vmem:[%s256_s1 + $0x18] sm:$0xff]  }
   0x3   :  { %116 = vmatprep.subr.bf16.mxu0 %v190_v0  ;;  %v189_v5 = vld [vmem:[%s257_s0 + $0x4] ss:$8 sps:$4 sm:$0xff]   ;;  %v183_v9 = vld [vmem:[%s256_s1 + $0x10] sm:$0xff]   ;;  %v187_v13 = vld [vmem:[%s257_s0] ss:$8 sps:$4 sm:$0xff]  }
   0x4   :  { %v35_v6 = vld [vmem:[%s258_s2] sm:$0xff]  ;;  %175 = vmatprep.mubr.msk.bf16.mxu0 %vm110_vm0, %v189_v5  ;;  %v184_v10 = vld [vmem:[%s256_s1 + $0x8] sm:$0xff]  }
   0x5   :  { %39 = vperm.xlu0 %177, %v35_v6   ;;  %v185_v11 = vld [vmem:[%s256_s1] sm:$0xff]  }
   0x6   :  { %117 = vmatpush1.bf16.msra.mxu0 %v179_v2  ;;  %v186_v12 = vld [vmem:[%s256_s1 + $0x40] sm:$0xff]  }
   0x7   :  { %118 = vmatprep.subr.bf16.mxu0 %v190_v0 }
   0x9   :  { %44 = vperm.xlu0 %177, %v36_v7  }
   0xa   :  { %119 = vmatpush1.bf16.msra.mxu0 %v180_v3 }
   0xb   :  { %120 = vmatprep.subr.bf16.mxu0 %v190_v0 }
   0xe   :  { %121 = vmatpush1.bf16.msra.mxu0 %v181_v4 }
   0xf   :  { %122 = vmatprep.subr.bf16.mxu0 %v190_v0 }
  0x12   :  { %123 = vmatpush1.bf16.msra.mxu0 %v182_v8 }
  0x13   :  { %124 = vmatprep.subr.bf16.mxu0 %v190_v0 }
  0x16   :  { %125 = vmatpush1.bf16.msra.mxu0 %v183_v9 }
  0x17   :  { %126 = vmatprep.subr.bf16.mxu0 %v190_v0 }
  0x1a   :  { %127 = vmatpush1.bf16.msra.mxu0 %v184_v10 }
  0x1b   :  { %128 = vmatprep.subr.bf16.mxu0 %v190_v0 }
  0x1e   :  { %129 = vmatpush1.bf16.msra.mxu0 %v185_v11 }
  0x1f   :  { %144 = vmatprep.subr.bf16.mxu0 %v190_v0 }
  0x22   :  { %145 = vmatpush2.bf16.msra.mxu0 %v186_v12 }
  0x25   :  { %147 = vmatmul.mubr.bf16.vlgmr.msra.gmra.mxu0 %v187_v13 }
  0x80   :  { %v40_v14 = vpop.permute.xlu0 %39 }
  0x84   :  { %v45_v19 = vpop.permute.xlu0 %44 }
  0xe5   :  { %v148_v15 = vpop.f32.mrf.mxu0 }
  0xe6   :  { %v149_v16 = vadd.f32 %v148_v15, %v40_v14 }
  0xe7   :  { %v150_v17 = vpop.f32.mrf.mxu0 }
  0xe8   :  { %v155_v18 = vmax.f32 %v149_v16, 0.0 }
  0xe9   :  { %v151_v20 = vpop.f32.mrf.mxu0 }
  0xea   :  { %158 = vst.msk [vmem:[%s259_s3] sm:$0xff] %vm157_vm1, %v155_v18  ;;  %v152_v21 = vadd.f32 %v151_v20, %v45_v19 }
  0xeb   :  { %v153_v22 = vpop.f32.mrf.mxu0 }
  0xec   :  { %v156_v23 = vmax.f32 %v152_v21, 0.0 }
  0xee   :  { %159 = vst.msk [vmem:[%s259_s3 + $0x8] sm:$0xff] %vm157_vm1, %v156_v23 }

// kernel: pfenet_forward.46
= control target key start
LH: loop header
LB: loop body
LE: loop exit
PB: predicated region body
PF: predicated region fallthrough
CT: control target
= control target key end

     0   :  { %vm58_vm0 = vcmask 1040384   ;;  %v141_v0 = vmov 0.0   ;;  %v142_v2 = vmov 0   ;;  %vm143_vm1 = vmmov 0   ;;  %s188_s1 = inlined_call_operand.vmem [shape: bf16[33,16], index: 1, kind: input, shape index: {}]   ;;  %s189_s2 = inlined_call_operand.vmem [shape: f32[16,1], index: 2, kind: input, shape index: {}]   ;;  %s190_s0 = inlined_call_operand.vmem [shape: bf16[16,33], index: 0, kind: input, shape index: {}]   ;;  %s191_s3 = inlined_call_operand.vmem [shape: f32[16,16], index: 3, kind: output, shape index: {}]  }
   0x1   :  { %123 = vmatprep.subr.bf16.mxu0 %v141_v0  ;;  %v137_v1 = vld [vmem:[%s188_s1 + $0x10] ss:$0 sps:$4 sm:$0x11]   ;;  %v60_v3 = vsel %vm58_vm0, 65535, %v142_v2  ;;  %129 = vmatprep.mubr.msk.bf16.mxu0 %vm143_vm1, %v141_v0  ;;  %v138_v5 = vld [vmem:[%s188_s1 + $0x8] sm:$0xff]   ;;  %v22_v6 = vld [vmem:[%s189_s2] sm:$0xff] }
   0x2   :  { %136 = vset.pattern.permute.xlu0 %v142_v2  ;;  %v62_v4 = vand.u32 %v137_v1, %v60_v3  ;;  %v23_v7 = vld [vmem:[%s189_s2 + $0x8] sm:$0xff]  ;;  %v139_v8 = vld [vmem:[%s188_s1] sm:$0xff]   ;;  %vm54_vm2 = vcmask 269312   ;;  %vm107_vm3 = vcmask 130048  }
   0x3   :  { %26 = vperm.xlu0 %136, %v22_v6   ;;  %v140_v9 = vld [vmem:[%s190_s0] sm:$0xff]  }
   0x4   :  { %124 = vmatpush3.bf16.msra.mxu0 %v62_v4 }
   0x5   :  { %125 = vmatprep.subr.bf16.mxu0 %v141_v0 }
   0x7   :  { %31 = vperm.xlu0 %136, %v23_v7  }
   0x8   :  { %126 = vmatpush3.bf16.msra.mxu0 %v138_v5 }
   0x9   :  { %127 = vmatprep.subr.bf16.mxu0 %v141_v0 }
   0xc   :  { %128 = vmatpush3.bf16.msra.mxu0 %v139_v8 }
   0xf   :  { %130 = vmatmul.mubr.msk.bf16.vlgmr.msra.gmra.mxu0 %vm54_vm2, %v140_v9 }
  0x7e   :  { %v27_v10 = vpop.permute.xlu0 %26 }
  0x82   :  { %v32_v15 = vpop.permute.xlu0 %31 }
  0xcf   :  { %v98_v11 = vpop.f32.mrf.mxu0 }
  0xd0   :  { %v99_v12 = vadd.f32 %v98_v11, %v27_v10 }
  0xd1   :  { %v131_v13 = vpop.f32.mrf.mxu0 }
  0xd2   :  { %v105_v14 = vmax.f32 %v99_v12, 0.0 }
  0xd3   :  { %v101_v16 = vpop.f32.mrf.mxu0 }
  0xd4   :  { %108 = vst.msk [vmem:[%s191_s3] sm:$0xff] %vm107_vm3, %v105_v14  ;;  %v102_v17 = vadd.f32 %v101_v16, %v32_v15 }
  0xd5   :  { %v132_v18 = vpop.f32.mrf.mxu0 }
  0xd6   :  { %v106_v19 = vmax.f32 %v102_v17, 0.0 }
  0xd8   :  { %109 = vst.msk [vmem:[%s191_s3 + $0x8] sm:$0xff] %vm107_vm3, %v106_v19 }

// kernel: pfenet_forward.47
= control target key start
LH: loop header
LB: loop body
LE: loop exit
PB: predicated region body
PF: predicated region fallthrough
CT: control target
= control target key end

     0   :  { %v126_v0 = vmov 0.0   ;;  %vm127_vm0 = vmmov 0   ;;  %v128_v2 = vmov 0   ;;  %vm50_vm1 = vcmask 261120   ;;  %s170_s1 = inlined_call_operand.vmem [shape: bf16[32,16], index: 1, kind: input, shape index: {}]   ;;  %s171_s2 = inlined_call_operand.vmem [shape: f32[16,1], index: 2, kind: input, shape index: {}]   ;;  %s172_s0 = inlined_call_operand.vmem [shape: bf16[16,32], index: 0, kind: input, shape index: {}]   ;;  %s173_s3 = inlined_call_operand.vmem [shape: f32[16,16], index: 3, kind: output, shape index: {}]  }
   0x1   :  { %111 = vmatprep.subr.bf16.mxu0 %v126_v0  ;;  %v123_v1 = vld [vmem:[%s170_s1 + $0x8] sm:$0xff]   ;;  %115 = vmatprep.mubr.msk.bf16.mxu0 %vm127_vm0, %v126_v0  ;;  %v124_v3 = vld [vmem:[%s170_s1] sm:$0xff]   ;;  %vm97_vm2 = vcmask 130048  }
   0x2   :  { %122 = vset.pattern.permute.xlu0 %v128_v2  ;;  %112 = vmatpush3.bf16.msra.mxu0 %v123_v1  ;;  %v21_v4 = vld [vmem:[%s171_s2] sm:$0xff]  ;;  %v22_v6 = vld [vmem:[%s171_s2 + $0x8] sm:$0xff] }
   0x3   :  { %113 = vmatprep.subr.bf16.mxu0 %v126_v0  ;;  %25 = vperm.xlu0 %122, %v21_v4   ;;  %v125_v5 = vld [vmem:[%s172_s0] sm:$0xff]  }
   0x6   :  { %114 = vmatpush3.bf16.msra.mxu0 %v124_v3 }
   0x7   :  { %30 = vperm.xlu0 %122, %v22_v6  }
   0x9   :  { %116 = vmatmul.mubr.msk.bf16.vlgmr.msra.gmra.mxu0 %vm50_vm1, %v125_v5 }
  0x7e   :  { %v26_v7 = vpop.permute.xlu0 %25 }
  0x82   :  { %v31_v12 = vpop.permute.xlu0 %30 }
  0xc9   :  { %v88_v8 = vpop.f32.mrf.mxu0 }
  0xca   :  { %v89_v9 = vadd.f32 %v88_v8, %v26_v7 }
  0xcb   :  { %v117_v10 = vpop.f32.mrf.mxu0 }
  0xcc   :  { %v95_v11 = vmax.f32 %v89_v9, 0.0 }
  0xcd   :  { %v91_v13 = vpop.f32.mrf.mxu0 }
  0xce   :  { %98 = vst.msk [vmem:[%s173_s3] sm:$0xff] %vm97_vm2, %v95_v11  ;;  %v92_v14 = vadd.f32 %v91_v13, %v31_v12 }
  0xcf   :  { %v118_v15 = vpop.f32.mrf.mxu0 }
  0xd0   :  { %v96_v16 = vmax.f32 %v92_v14, 0.0 }
  0xd2   :  { %99 = vst.msk [vmem:[%s173_s3 + $0x8] sm:$0xff] %vm97_vm2, %v96_v16 }

// kernel: pfenet_forward.48
= control target key start
LH: loop header
LB: loop body
LE: loop exit
PB: predicated region body
PF: predicated region fallthrough
CT: control target
= control target key end

     0   :  { %v189_v0 = vmov 0   ;;  %vm110_vm0 = vcmask 130048   ;;  %s258_s1 = inlined_call_operand.vmem [shape: bf16[144,16], index: 1, kind: input, shape index: {}]   ;;  %s259_s0 = inlined_call_operand.vmem [shape: bf16[16,144], index: 0, kind: input, shape index: {}]   ;;  %s260_s2 = inlined_call_operand.vmem [shape: f32[16,1], index: 2, kind: input, shape index: {}]   ;;  %s261_s3 = inlined_call_operand.vmem [shape: f32[16,16], index: 3, kind: output, shape index: {}]  }
   0x1   :  { %114 = vmatprep.subr.bf16.mxu0 %v189_v0  ;;  %v177_v1 = vld [vmem:[%s258_s1 + $0x38] sm:$0xff]   ;;  %176 = vset.pattern.permute.xlu0 %v189_v0  ;;  %v178_v2 = vld [vmem:[%s258_s1 + $0x30] sm:$0xff]   ;;  %v179_v3 = vld [vmem:[%s258_s1 + $0x28] sm:$0xff]  }
   0x2   :  { %115 = vmatpush1.bf16.msra.mxu0 %v177_v1  ;;  %v180_v4 = vld [vmem:[%s258_s1 + $0x20] sm:$0xff]   ;;  %v36_v7 = vld [vmem:[%s260_s2 + $0x8] sm:$0xff]  ;;  %v181_v8 = vld [vmem:[%s258_s1 + $0x18] sm:$0xff]  }
   0x3   :  { %116 = vmatprep.subr.bf16.mxu0 %v189_v0  ;;  %v188_v5 = vld [vmem:[%s259_s0 + $0x4] ss:$8 sps:$4 sm:$0xff]   ;;  %v182_v9 = vld [vmem:[%s258_s1 + $0x10] sm:$0xff]   ;;  %v186_v13 = vld [vmem:[%s259_s0] ss:$8 sps:$4 sm:$0xff]  }
   0x4   :  { %v35_v6 = vld [vmem:[%s260_s2] sm:$0xff]  ;;  %174 = vmatprep.mubr.msk.bf16.mxu0 %vm110_vm0, %v188_v5  ;;  %v183_v10 = vld [vmem:[%s258_s1 + $0x8] sm:$0xff]  }
   0x5   :  { %39 = vperm.xlu0 %176, %v35_v6   ;;  %v184_v11 = vld [vmem:[%s258_s1] sm:$0xff]  }
   0x6   :  { %117 = vmatpush1.bf16.msra.mxu0 %v178_v2  ;;  %v185_v12 = vld [vmem:[%s258_s1 + $0x40] sm:$0xff]  }
   0x7   :  { %118 = vmatprep.subr.bf16.mxu0 %v189_v0 }
   0x9   :  { %44 = vperm.xlu0 %176, %v36_v7  }
   0xa   :  { %119 = vmatpush1.bf16.msra.mxu0 %v179_v3 }
   0xb   :  { %120 = vmatprep.subr.bf16.mxu0 %v189_v0 }
   0xe   :  { %121 = vmatpush1.bf16.msra.mxu0 %v180_v4 }
   0xf   :  { %122 = vmatprep.subr.bf16.mxu0 %v189_v0 }
  0x12   :  { %123 = vmatpush1.bf16.msra.mxu0 %v181_v8 }
  0x13   :  { %124 = vmatprep.subr.bf16.mxu0 %v189_v0 }
  0x16   :  { %125 = vmatpush1.bf16.msra.mxu0 %v182_v9 }
  0x17   :  { %126 = vmatprep.subr.bf16.mxu0 %v189_v0 }
  0x1a   :  { %127 = vmatpush1.bf16.msra.mxu0 %v183_v10 }
  0x1b   :  { %128 = vmatprep.subr.bf16.mxu0 %v189_v0 }
  0x1e   :  { %129 = vmatpush1.bf16.msra.mxu0 %v184_v11 }
  0x1f   :  { %144 = vmatprep.subr.bf16.mxu0 %v189_v0 }
  0x22   :  { %145 = vmatpush2.bf16.msra.mxu0 %v185_v12 }
  0x25   :  { %147 = vmatmul.mubr.bf16.vlgmr.msra.gmra.mxu0 %v186_v13 }
  0x80   :  { %v40_v14 = vpop.permute.xlu0 %39 }
  0x84   :  { %v45_v19 = vpop.permute.xlu0 %44 }
  0xe5   :  { %v148_v15 = vpop.f32.mrf.mxu0 }
  0xe6   :  { %v149_v16 = vadd.f32 %v148_v15, %v40_v14 }
  0xe7   :  { %v150_v17 = vpop.f32.mrf.mxu0 }
  0xe8   :  { %v155_v18 = vmax.f32 %v149_v16, 0.0 }
  0xe9   :  { %v151_v20 = vpop.f32.mrf.mxu0 }
  0xea   :  { %157 = vst.msk [vmem:[%s261_s3] sm:$0xff] %vm110_vm0, %v155_v18  ;;  %v152_v21 = vadd.f32 %v151_v20, %v45_v19 }
  0xeb   :  { %v153_v22 = vpop.f32.mrf.mxu0 }
  0xec   :  { %v156_v23 = vmax.f32 %v152_v21, 0.0 }
  0xee   :  { %158 = vst.msk [vmem:[%s261_s3 + $0x8] sm:$0xff] %vm110_vm0, %v156_v23 }

// kernel: pfenet_forward.50
= control target key start
LH: loop header
LB: loop body
LE: loop exit
PB: predicated region body
PF: predicated region fallthrough
CT: control target
= control target key end

     0   :  { %vm58_vm0 = vcmask 1040384   ;;  %v141_v0 = vmov 0.0   ;;  %v142_v2 = vmov 0   ;;  %vm143_vm1 = vmmov 0   ;;  %s188_s1 = inlined_call_operand.vmem [shape: bf16[33,4], index: 1, kind: input, shape index: {}]   ;;  %s189_s2 = inlined_call_operand.vmem [shape: f32[16,1], index: 2, kind: input, shape index: {}]   ;;  %s190_s0 = inlined_call_operand.vmem [shape: bf16[16,33], index: 0, kind: input, shape index: {}]   ;;  %s191_s3 = inlined_call_operand.vmem [shape: f32[16,4], index: 3, kind: output, shape index: {}]  }
   0x1   :  { %123 = vmatprep.subr.bf16.mxu0 %v141_v0  ;;  %v137_v1 = vld [vmem:[%s188_s1 + $0x10] ss:$0 sps:$4 sm:$0x11]   ;;  %v60_v3 = vsel %vm58_vm0, 65535, %v142_v2  ;;  %129 = vmatprep.mubr.msk.bf16.mxu0 %vm143_vm1, %v141_v0  ;;  %v138_v5 = vld [vmem:[%s188_s1 + $0x8] sm:$0xff]   ;;  %v22_v6 = vld [vmem:[%s189_s2] sm:$0xff] }
   0x2   :  { %136 = vset.pattern.permute.xlu0 %v142_v2  ;;  %v62_v4 = vand.u32 %v137_v1, %v60_v3  ;;  %v23_v7 = vld [vmem:[%s189_s2 + $0x8] sm:$0xff]  ;;  %v139_v8 = vld [vmem:[%s188_s1] sm:$0xff]   ;;  %vm54_vm2 = vcmask 269312   ;;  %vm107_vm3 = vcmask 31744  }
   0x3   :  { %26 = vperm.xlu0 %136, %v22_v6   ;;  %v140_v9 = vld [vmem:[%s190_s0] sm:$0xff]  }
   0x4   :  { %124 = vmatpush3.bf16.msra.mxu0 %v62_v4 }
   0x5   :  { %125 = vmatprep.subr.bf16.mxu0 %v141_v0 }
   0x7   :  { %31 = vperm.xlu0 %136, %v23_v7  }
   0x8   :  { %126 = vmatpush3.bf16.msra.mxu0 %v138_v5 }
   0x9   :  { %127 = vmatprep.subr.bf16.mxu0 %v141_v0 }
   0xc   :  { %128 = vmatpush3.bf16.msra.mxu0 %v139_v8 }
   0xf   :  { %130 = vmatmul.mubr.msk.bf16.vlgmr.msra.gmra.mxu0 %vm54_vm2, %v140_v9 }
  0x7e   :  { %v27_v10 = vpop.permute.xlu0 %26 }
  0x82   :  { %v32_v15 = vpop.permute.xlu0 %31 }
  0xcf   :  { %v98_v11 = vpop.f32.mrf.mxu0 }
  0xd0   :  { %v99_v12 = vadd.f32 %v98_v11, %v27_v10 }
  0xd1   :  { %v131_v13 = vpop.f32.mrf.mxu0 }
  0xd2   :  { %v105_v14 = vmax.f32 %v99_v12, 0.0 }
  0xd3   :  { %v101_v16 = vpop.f32.mrf.mxu0 }
  0xd4   :  { %108 = vst.msk [vmem:[%s191_s3] sm:$0xff] %vm107_vm3, %v105_v14  ;;  %v102_v17 = vadd.f32 %v101_v16, %v32_v15 }
  0xd5   :  { %v132_v18 = vpop.f32.mrf.mxu0 }
  0xd6   :  { %v106_v19 = vmax.f32 %v102_v17, 0.0 }
  0xd8   :  { %109 = vst.msk [vmem:[%s191_s3 + $0x8] sm:$0xff] %vm107_vm3, %v106_v19 }

// kernel: pfenet_forward.51
= control target key start
LH: loop header
LB: loop body
LE: loop exit
PB: predicated region body
PF: predicated region fallthrough
CT: control target
= control target key end

     0   :  { %v126_v0 = vmov 0.0   ;;  %vm127_vm0 = vmmov 0   ;;  %v128_v2 = vmov 0   ;;  %vm50_vm1 = vcmask 261120   ;;  %s170_s1 = inlined_call_operand.vmem [shape: bf16[32,4], index: 1, kind: input, shape index: {}]   ;;  %s171_s2 = inlined_call_operand.vmem [shape: f32[16,1], index: 2, kind: input, shape index: {}]   ;;  %s172_s0 = inlined_call_operand.vmem [shape: bf16[16,32], index: 0, kind: input, shape index: {}]   ;;  %s173_s3 = inlined_call_operand.vmem [shape: f32[16,4], index: 3, kind: output, shape index: {}]  }
   0x1   :  { %111 = vmatprep.subr.bf16.mxu0 %v126_v0  ;;  %v123_v1 = vld [vmem:[%s170_s1 + $0x8] sm:$0xff]   ;;  %115 = vmatprep.mubr.msk.bf16.mxu0 %vm127_vm0, %v126_v0  ;;  %v124_v3 = vld [vmem:[%s170_s1] sm:$0xff]   ;;  %vm97_vm2 = vcmask 31744  }
   0x2   :  { %122 = vset.pattern.permute.xlu0 %v128_v2  ;;  %112 = vmatpush3.bf16.msra.mxu0 %v123_v1  ;;  %v21_v4 = vld [vmem:[%s171_s2] sm:$0xff]  ;;  %v22_v6 = vld [vmem:[%s171_s2 + $0x8] sm:$0xff] }
   0x3   :  { %113 = vmatprep.subr.bf16.mxu0 %v126_v0  ;;  %25 = vperm.xlu0 %122, %v21_v4   ;;  %v125_v5 = vld [vmem:[%s172_s0] sm:$0xff]  }
   0x6   :  { %114 = vmatpush3.bf16.msra.mxu0 %v124_v3 }
   0x7   :  { %30 = vperm.xlu0 %122, %v22_v6  }
   0x9   :  { %116 = vmatmul.mubr.msk.bf16.vlgmr.msra.gmra.mxu0 %vm50_vm1, %v125_v5 }
  0x7e   :  { %v26_v7 = vpop.permute.xlu0 %25 }
  0x82   :  { %v31_v12 = vpop.permute.xlu0 %30 }
  0xc9   :  { %v88_v8 = vpop.f32.mrf.mxu0 }
  0xca   :  { %v89_v9 = vadd.f32 %v88_v8, %v26_v7 }
  0xcb   :  { %v117_v10 = vpop.f32.mrf.mxu0 }
  0xcc   :  { %v95_v11 = vmax.f32 %v89_v9, 0.0 }
  0xcd   :  { %v91_v13 = vpop.f32.mrf.mxu0 }
  0xce   :  { %98 = vst.msk [vmem:[%s173_s3] sm:$0xff] %vm97_vm2, %v95_v11  ;;  %v92_v14 = vadd.f32 %v91_v13, %v31_v12 }
  0xcf   :  { %v118_v15 = vpop.f32.mrf.mxu0 }
  0xd0   :  { %v96_v16 = vmax.f32 %v92_v14, 0.0 }
  0xd2   :  { %99 = vst.msk [vmem:[%s173_s3 + $0x8] sm:$0xff] %vm97_vm2, %v96_v16 }

// kernel: pfenet_forward.52
= control target key start
LH: loop header
LB: loop body
LE: loop exit
PB: predicated region body
PF: predicated region fallthrough
CT: control target
= control target key end

     0   :  { %v190_v0 = vmov 0   ;;  %vm110_vm0 = vcmask 130048   ;;  %vm157_vm1 = vcmask 31744   ;;  %s256_s1 = inlined_call_operand.vmem [shape: bf16[144,4], index: 1, kind: input, shape index: {}]   ;;  %s257_s0 = inlined_call_operand.vmem [shape: bf16[16,144], index: 0, kind: input, shape index: {}]   ;;  %s258_s2 = inlined_call_operand.vmem [shape: f32[16,1], index: 2, kind: input, shape index: {}]   ;;  %s259_s3 = inlined_call_operand.vmem [shape: f32[16,4], index: 3, kind: output, shape index: {}]  }
   0x1   :  { %114 = vmatprep.subr.bf16.mxu0 %v190_v0  ;;  %v178_v1 = vld [vmem:[%s256_s1 + $0x38] sm:$0xff]   ;;  %177 = vset.pattern.permute.xlu0 %v190_v0  ;;  %v179_v2 = vld [vmem:[%s256_s1 + $0x30] sm:$0xff]   ;;  %v180_v3 = vld [vmem:[%s256_s1 + $0x28] sm:$0xff]  }
   0x2   :  { %115 = vmatpush1.bf16.msra.mxu0 %v178_v1  ;;  %v181_v4 = vld [vmem:[%s256_s1 + $0x20] sm:$0xff]   ;;  %v36_v7 = vld [vmem:[%s258_s2 + $0x8] sm:$0xff]  ;;  %v182_v8 = vld [vmem:[%s256_s1 + $0x18] sm:$0xff]  }
   0x3   :  { %116 = vmatprep.subr.bf16.mxu0 %v190_v0  ;;  %v189_v5 = vld [vmem:[%s257_s0 + $0x4] ss:$8 sps:$4 sm:$0xff]   ;;  %v183_v9 = vld [vmem:[%s256_s1 + $0x10] sm:$0xff]   ;;  %v187_v13 = vld [vmem:[%s257_s0] ss:$8 sps:$4 sm:$0xff]  }
   0x4   :  { %v35_v6 = vld [vmem:[%s258_s2] sm:$0xff]  ;;  %175 = vmatprep.mubr.msk.bf16.mxu0 %vm110_vm0, %v189_v5  ;;  %v184_v10 = vld [vmem:[%s256_s1 + $0x8] sm:$0xff]  }
   0x5   :  { %39 = vperm.xlu0 %177, %v35_v6   ;;  %v185_v11 = vld [vmem:[%s256_s1] sm:$0xff]  }
   0x6   :  { %117 = vmatpush1.bf16.msra.mxu0 %v179_v2  ;;  %v186_v12 = vld [vmem:[%s256_s1 + $0x40] sm:$0xff]  }
   0x7   :  { %118 = vmatprep.subr.bf16.mxu0 %v190_v0 }
   0x9   :  { %44 = vperm.xlu0 %177, %v36_v7  }
   0xa   :  { %119 = vmatpush1.bf16.msra.mxu0 %v180_v3 }
   0xb   :  { %120 = vmatprep.subr.bf16.mxu0 %v190_v0 }
   0xe   :  { %121 = vmatpush1.bf16.msra.mxu0 %v181_v4 }
   0xf   :  { %122 = vmatprep.subr.bf16.mxu0 %v190_v0 }
  0x12   :  { %123 = vmatpush1.bf16.msra.mxu0 %v182_v8 }
  0x13   :  { %124 = vmatprep.subr.bf16.mxu0 %v190_v0 }
  0x16   :  { %125 = vmatpush1.bf16.msra.mxu0 %v183_v9 }
  0x17   :  { %126 = vmatprep.subr.bf16.mxu0 %v190_v0 }
  0x1a   :  { %127 = vmatpush1.bf16.msra.mxu0 %v184_v10 }
  0x1b   :  { %128 = vmatprep.subr.bf16.mxu0 %v190_v0 }
  0x1e   :  { %129 = vmatpush1.bf16.msra.mxu0 %v185_v11 }
  0x1f   :  { %144 = vmatprep.subr.bf16.mxu0 %v190_v0 }
  0x22   :  { %145 = vmatpush2.bf16.msra.mxu0 %v186_v12 }
  0x25   :  { %147 = vmatmul.mubr.bf16.vlgmr.msra.gmra.mxu0 %v187_v13 }
  0x80   :  { %v40_v14 = vpop.permute.xlu0 %39 }
  0x84   :  { %v45_v19 = vpop.permute.xlu0 %44 }
  0xe5   :  { %v148_v15 = vpop.f32.mrf.mxu0 }
  0xe6   :  { %v149_v16 = vadd.f32 %v148_v15, %v40_v14 }
  0xe7   :  { %v150_v17 = vpop.f32.mrf.mxu0 }
  0xe8   :  { %v155_v18 = vmax.f32 %v149_v16, 0.0 }
  0xe9   :  { %v151_v20 = vpop.f32.mrf.mxu0 }
  0xea   :  { %158 = vst.msk [vmem:[%s259_s3] sm:$0xff] %vm157_vm1, %v155_v18  ;;  %v152_v21 = vadd.f32 %v151_v20, %v45_v19 }
  0xeb   :  { %v153_v22 = vpop.f32.mrf.mxu0 }
  0xec   :  { %v156_v23 = vmax.f32 %v152_v21, 0.0 }
  0xee   :  { %159 = vst.msk [vmem:[%s259_s3 + $0x8] sm:$0xff] %vm157_vm1, %v156_v23 }

// kernel: pfenet_forward.54
= control target key start
LH: loop header
LB: loop body
LE: loop exit
PB: predicated region body
PF: predicated region fallthrough
CT: control target
= control target key end

     0   :  { %v139_v0 = vmov 0.0   ;;  %vm140_vm0 = vmmov 0   ;;  %v141_v2 = vmov 0   ;;  %vm58_vm1 = vcmask 392192   ;;  %s186_s1 = inlined_call_operand.vmem [shape: bf16[48,81], index: 1, kind: input, shape index: {}]   ;;  %s187_s2 = inlined_call_operand.vmem [shape: f32[16,1], index: 2, kind: input, shape index: {}]   ;;  %s188_s0 = inlined_call_operand.vmem [shape: bf16[16,48], index: 0, kind: input, shape index: {}]   ;;  %s189_s3 = inlined_call_operand.vmem [shape: f32[16,81], index: 3, kind: output, shape index: {}]  }
   0x1   :  { %121 = vmatprep.subr.bf16.mxu0 %v139_v0  ;;  %v135_v1 = vld [vmem:[%s186_s1 + $0x10] sm:$0xff]   ;;  %127 = vmatprep.mubr.msk.bf16.mxu0 %vm140_vm0, %v139_v0  ;;  %v136_v3 = vld [vmem:[%s186_s1 + $0x8] sm:$0xff]   ;;  %v23_v4 = vld [vmem:[%s187_s2] sm:$0xff]  ;;  %vm105_vm2 = vcmask 662528  }
   0x2   :  { %134 = vset.pattern.permute.xlu0 %v141_v2  ;;  %122 = vmatpush3.bf16.msra.mxu0 %v135_v1  ;;  %v137_v5 = vld [vmem:[%s186_s1] sm:$0xff]   ;;  %v24_v6 = vld [vmem:[%s187_s2 + $0x8] sm:$0xff] }
   0x3   :  { %123 = vmatprep.subr.bf16.mxu0 %v139_v0  ;;  %27 = vperm.xlu0 %134, %v23_v4   ;;  %v138_v7 = vld [vmem:[%s188_s0] sm:$0xff]  }
   0x6   :  { %124 = vmatpush3.bf16.msra.mxu0 %v136_v3 }
   0x7   :  { %125 = vmatprep.subr.bf16.mxu0 %v139_v0  ;;  %32 = vperm.xlu0 %134, %v24_v6  }
   0xa   :  { %126 = vmatpush3.bf16.msra.mxu0 %v137_v5 }
   0xd   :  { %128 = vmatmul.mubr.msk.bf16.vlgmr.msra.gmra.mxu0 %vm58_vm1, %v138_v7 }
  0x7e   :  { %v28_v8 = vpop.permute.xlu0 %27 }
  0x82   :  { %v33_v13 = vpop.permute.xlu0 %32 }
  0xcd   :  { %v96_v9 = vpop.f32.mrf.mxu0 }
  0xce   :  { %v97_v10 = vadd.f32 %v96_v9, %v28_v8 }
  0xcf   :  { %v129_v11 = vpop.f32.mrf.mxu0 }
  0xd0   :  { %v103_v12 = vmax.f32 %v97_v10, 0.0 }
  0xd1   :  { %v99_v14 = vpop.f32.mrf.mxu0 }
  0xd2   :  { %106 = vst.msk [vmem:[%s189_s3] sm:$0xff] %vm105_vm2, %v103_v12  ;;  %v100_v15 = vadd.f32 %v99_v14, %v33_v13 }
  0xd3   :  { %v130_v16 = vpop.f32.mrf.mxu0 }
  0xd4   :  { %v104_v17 = vmax.f32 %v100_v15, 0.0 }
  0xd6   :  { %107 = vst.msk [vmem:[%s189_s3 + $0x8] sm:$0xff] %vm105_vm2, %v104_v17 }

// kernel: pfenet_forward.55
= control target key start
LH: loop header
LB: loop body
LE: loop exit
PB: predicated region body
PF: predicated region fallthrough
CT: control target
= control target key end

     0   :  { %v190_v0 = vmov 0   ;;  %vm110_vm0 = vcmask 130048   ;;  %vm157_vm1 = vcmask 662528   ;;  %s256_s1 = inlined_call_operand.vmem [shape: bf16[144,81], index: 1, kind: input, shape index: {}]   ;;  %s257_s0 = inlined_call_operand.vmem [shape: bf16[16,144], index: 0, kind: input, shape index: {}]   ;;  %s258_s2 = inlined_call_operand.vmem [shape: f32[16,1], index: 2, kind: input, shape index: {}]   ;;  %s259_s3 = inlined_call_operand.vmem [shape: f32[16,81], index: 3, kind: output, shape index: {}]  }
   0x1   :  { %114 = vmatprep.subr.bf16.mxu0 %v190_v0  ;;  %v178_v1 = vld [vmem:[%s256_s1 + $0x38] sm:$0xff]   ;;  %177 = vset.pattern.permute.xlu0 %v190_v0  ;;  %v179_v2 = vld [vmem:[%s256_s1 + $0x30] sm:$0xff]   ;;  %v180_v3 = vld [vmem:[%s256_s1 + $0x28] sm:$0xff]  }
   0x2   :  { %115 = vmatpush1.bf16.msra.mxu0 %v178_v1  ;;  %v181_v4 = vld [vmem:[%s256_s1 + $0x20] sm:$0xff]   ;;  %v36_v7 = vld [vmem:[%s258_s2 + $0x8] sm:$0xff]  ;;  %v182_v8 = vld [vmem:[%s256_s1 + $0x18] sm:$0xff]  }
   0x3   :  { %116 = vmatprep.subr.bf16.mxu0 %v190_v0  ;;  %v189_v5 = vld [vmem:[%s257_s0 + $0x4] ss:$8 sps:$4 sm:$0xff]   ;;  %v183_v9 = vld [vmem:[%s256_s1 + $0x10] sm:$0xff]   ;;  %v187_v13 = vld [vmem:[%s257_s0] ss:$8 sps:$4 sm:$0xff]  }
   0x4   :  { %v35_v6 = vld [vmem:[%s258_s2] sm:$0xff]  ;;  %175 = vmatprep.mubr.msk.bf16.mxu0 %vm110_vm0, %v189_v5  ;;  %v184_v10 = vld [vmem:[%s256_s1 + $0x8] sm:$0xff]  }
   0x5   :  { %39 = vperm.xlu0 %177, %v35_v6   ;;  %v185_v11 = vld [vmem:[%s256_s1] sm:$0xff]  }
   0x6   :  { %117 = vmatpush1.bf16.msra.mxu0 %v179_v2  ;;  %v186_v12 = vld [vmem:[%s256_s1 + $0x40] sm:$0xff]  }
   0x7   :  { %118 = vmatprep.subr.bf16.mxu0 %v190_v0 }
   0x9   :  { %44 = vperm.xlu0 %177, %v36_v7  }
   0xa   :  { %119 = vmatpush1.bf16.msra.mxu0 %v180_v3 }
   0xb   :  { %120 = vmatprep.subr.bf16.mxu0 %v190_v0 }
   0xe   :  { %121 = vmatpush1.bf16.msra.mxu0 %v181_v4 }
   0xf   :  { %122 = vmatprep.subr.bf16.mxu0 %v190_v0 }
  0x12   :  { %123 = vmatpush1.bf16.msra.mxu0 %v182_v8 }
  0x13   :  { %124 = vmatprep.subr.bf16.mxu0 %v190_v0 }
  0x16   :  { %125 = vmatpush1.bf16.msra.mxu0 %v183_v9 }
  0x17   :  { %126 = vmatprep.subr.bf16.mxu0 %v190_v0 }
  0x1a   :  { %127 = vmatpush1.bf16.msra.mxu0 %v184_v10 }
  0x1b   :  { %128 = vmatprep.subr.bf16.mxu0 %v190_v0 }
  0x1e   :  { %129 = vmatpush1.bf16.msra.mxu0 %v185_v11 }
  0x1f   :  { %144 = vmatprep.subr.bf16.mxu0 %v190_v0 }
  0x22   :  { %145 = vmatpush2.bf16.msra.mxu0 %v186_v12 }
  0x25   :  { %147 = vmatmul.mubr.bf16.vlgmr.msra.gmra.mxu0 %v187_v13 }
  0x80   :  { %v40_v14 = vpop.permute.xlu0 %39 }
  0x84   :  { %v45_v19 = vpop.permute.xlu0 %44 }
  0xe5   :  { %v148_v15 = vpop.f32.mrf.mxu0 }
  0xe6   :  { %v149_v16 = vadd.f32 %v148_v15, %v40_v14 }
  0xe7   :  { %v150_v17 = vpop.f32.mrf.mxu0 }
  0xe8   :  { %v155_v18 = vmax.f32 %v149_v16, 0.0 }
  0xe9   :  { %v151_v20 = vpop.f32.mrf.mxu0 }
  0xea   :  { %158 = vst.msk [vmem:[%s259_s3] sm:$0xff] %vm157_vm1, %v155_v18  ;;  %v152_v21 = vadd.f32 %v151_v20, %v45_v19 }
  0xeb   :  { %v153_v22 = vpop.f32.mrf.mxu0 }
  0xec   :  { %v156_v23 = vmax.f32 %v152_v21, 0.0 }
  0xee   :  { %159 = vst.msk [vmem:[%s259_s3 + $0x8] sm:$0xff] %vm157_vm1, %v156_v23 }

// kernel: pfenet_forward.57
= control target key start
LH: loop header
LB: loop body
LE: loop exit
PB: predicated region body
PF: predicated region fallthrough
CT: control target
= control target key end

     0   :  { %v258_v0 = vmov 0   ;;  %vm116_vm0 = vcmask 130048   ;;  %v259_v14 = vmov 0.0   ;;  %vm260_vm1 = vmmov 0   ;;  %s341_s1 = inlined_call_operand.vmem [shape: bf16[144,81], index: 1, kind: input, shape index: {}]   ;;  %s342_s0 = inlined_call_operand.vmem [shape: bf16[16,144], index: 0, kind: input, shape index: {}]   ;;  %s343_s2 = inlined_call_operand.vmem [shape: f32[16,1], index: 2, kind: input, shape index: {}]   ;;  %s344_s4 = inlined_call_operand.vmem [shape: f32[2,1], index: 4, kind: input, shape index: {}]   ;;  %s345_s3 = inlined_call_operand.vmem [shape: bf16[2,16], index: 3, kind: input, shape index: {}]   ;;  %s346_s5 = inlined_call_operand.vmem [shape: f32[2,81], index: 5, kind: output, shape index: {}]  }
   0x1   :  { %120 = vmatprep.subr.bf16.mxu0 %v258_v0  ;;  %v246_v1 = vld [vmem:[%s341_s1 + $0x38] sm:$0xff]   ;;  %244 = vset.pattern.permute.xlu0 %v258_v0  ;;  %v247_v2 = vld [vmem:[%s341_s1 + $0x30] sm:$0xff]   ;;  %v248_v3 = vld [vmem:[%s341_s1 + $0x28] sm:$0xff]   ;;  %vm214_vm2 = vcmask 656384  }
   0x2   :  { %245 = vset.pattern.permute.xlu1 %v258_v0  ;;  %121 = vmatpush1.bf16.msra.mxu0 %v246_v1  ;;  %v249_v4 = vld [vmem:[%s341_s1 + $0x20] sm:$0xff]   ;;  %v42_v7 = vld [vmem:[%s343_s2 + $0x8] sm:$0xff]  ;;  %v250_v8 = vld [vmem:[%s341_s1 + $0x18] sm:$0xff]  }
   0x3   :  { %122 = vmatprep.subr.bf16.mxu0 %v258_v0  ;;  %v257_v5 = vld [vmem:[%s342_s0 + $0x4] ss:$8 sps:$4 sm:$0xff]   ;;  %v251_v9 = vld [vmem:[%s341_s1 + $0x10] sm:$0xff]   ;;  %v255_v13 = vld [vmem:[%s342_s0] ss:$8 sps:$4 sm:$0xff]   ;;  %235 = vmatprep.subr.bf16.mxu1 %v259_v14 }
   0x4   :  { %v41_v6 = vld [vmem:[%s343_s2] sm:$0xff]  ;;  %231 = vmatprep.mubr.msk.bf16.mxu0 %vm116_vm0, %v257_v5  ;;  %v252_v10 = vld [vmem:[%s341_s1 + $0x8] sm:$0xff]   ;;  %237 = vmatprep.mubr.msk.bf16.mxu1 %vm260_vm1, %v259_v14 }
   0x5   :  { %45 = vperm.xlu0 %244, %v41_v6   ;;  %v253_v11 = vld [vmem:[%s341_s1] sm:$0xff]  }
   0x6   :  { %123 = vmatpush1.bf16.msra.mxu0 %v247_v2  ;;  %v254_v12 = vld [vmem:[%s341_s1 + $0x40] sm:$0xff]  }
   0x7   :  { %124 = vmatprep.subr.bf16.mxu0 %v258_v0  ;;  %v165_v15 = vld [vmem:[%s344_s4] sm:$0x3] }
   0x8   :  { %168 = vperm.xlu1 %245, %v165_v15   ;;  %v163_v27 = vld [vmem:[%s345_s3] sm:$0x1] }
   0x9   :  { %50 = vperm.xlu0 %244, %v42_v7  }
   0xa   :  { %125 = vmatpush1.bf16.msra.mxu0 %v248_v3 }
   0xb   :  { %126 = vmatprep.subr.bf16.mxu0 %v258_v0 }
   0xe   :  { %127 = vmatpush1.bf16.msra.mxu0 %v249_v4 }
   0xf   :  { %128 = vmatprep.subr.bf16.mxu0 %v258_v0 }
  0x12   :  { %129 = vmatpush1.bf16.msra.mxu0 %v250_v8 }
  0x13   :  { %130 = vmatprep.subr.bf16.mxu0 %v258_v0 }
  0x16   :  { %131 = vmatpush1.bf16.msra.mxu0 %v251_v9 }
  0x17   :  { %132 = vmatprep.subr.bf16.mxu0 %v258_v0 }
  0x1a   :  { %133 = vmatpush1.bf16.msra.mxu0 %v252_v10 }
  0x1b   :  { %134 = vmatprep.subr.bf16.mxu0 %v258_v0 }
  0x1e   :  { %135 = vmatpush1.bf16.msra.mxu0 %v253_v11 }
  0x1f   :  { %150 = vmatprep.subr.bf16.mxu0 %v258_v0 }
  0x22   :  { %151 = vmatpush2.bf16.msra.mxu0 %v254_v12 }
  0x25   :  { %153 = vmatmul.mubr.bf16.vlgmr.msra.gmra.mxu0 %v255_v13 }
  0x80   :  { %v46_v16 = vpop.permute.xlu0 %45 }
  0x83   :  { %v169_v28 = vpop.permute.xlu1 %168 }
  0x84   :  { %v51_v20 = vpop.permute.xlu0 %50 }
  0xe5   :  { %v154_v17 = vpop.f32.mrf.mxu0 }
  0xe6   :  { %v155_v19 = vadd.f32 %v154_v17, %v46_v16 }
  0xe7   :  { %v156_v18 = vpop.f32.mrf.mxu0 }
  0xe8   :  { %v161_v24 = vmax.f32 %v155_v19, 0.0 }
  0xe9   :  { %v157_v21 = vpop.f32.mrf.mxu0 }
  0xea   :  { %v158_v22 = vadd.f32 %v157_v21, %v51_v20 }
  0xeb   :  { %v159_v23 = vpop.f32.mrf.mxu0 }
  0xec   :  { %v162_v25 = vmax.f32 %v158_v22, 0.0 }
  0xee   :  { %v164_v26 = vpack.c.bf16 %v162_v25, %v161_v24 }
  0xf0   :  { %236 = vmatpush3.bf16.msra.mxu1 %v164_v26 }
  0xf3   :  { %238 = vmatmul.mubr.msk.bf16.vlgmr.msra.gmra.mxu1 %vm116_vm0, %v163_v27 }
 0x1b3   :  { %v208_v29 = vpop.f32.mrf.mxu1 }
 0x1b4   :  { %v209_v30 = vadd.f32 %v208_v29, %v169_v28 }
 0x1b5   :  { %v239_v31 = vpop.f32.mrf.mxu1 }
 0x1b6   :  { %215 = vst.msk [vmem:[%s346_s5] sm:$0x3] %vm214_vm2, %v209_v30 }
 0x1b7   :  { %v211_v32 = vpop.f32.mrf.mxu1 }
 0x1b9   :  { %v240_v33 = vpop.f32.mrf.mxu1 }

</bundles_post_ra>
